<compile_context>
chip_gen: v6e
topology: v6e:2x2x1
jax: 0.10.0
libtpu: 0.0.40
codegen_flags: <defaults>
</compile_context>

<pallas_src>
import math
import jax
import jax.numpy as jnp
from jax.experimental import pallas as pl
from jax.experimental.pallas import tpu as pltpu

# ----------------------------- model dims -----------------------------------
VOCAB = 128
MAX_POS = 64
TYPE_VOCAB = 2
HIDDEN = 64
NUM_LAYERS = 2
NUM_HEADS = 2
HEAD_DIM = HIDDEN // NUM_HEADS      # 32
HD_PAD = 128                        # per-head projection width, padded to a full lane block
INTERMEDIATE = 128
NUM_CLASSES = 3
C_PAD = 128                         # lane-padded classifier output width
LN_EPS = 1e-12


# --------------------------- in-kernel helpers -------------------------------
def _layernorm(x, g, b):
    mu = jnp.mean(x, axis=-1, keepdims=True)
    var = jnp.mean((x - mu) * (x - mu), axis=-1, keepdims=True)
    return (x - mu) * jax.lax.rsqrt(var + LN_EPS) * g + b


def _gelu(x):
    # TODO(synk): HF BERT default uses erf-based GELU; tanh approximation used here.
    return 0.5 * x * (1.0 + jnp.tanh(0.7978845608028654 * (x + 0.044715 * x * x * x)))


# ------------------------------ fused kernel ---------------------------------
def fused_forward_kernel(ids_ref, mask_ref,
                         wemb_ref, pemb_ref, temb_ref, embln_ref,
                         wqkv_ref, bqkv_ref, wo_ref, wi_ref, wo2_ref,
                         vech_ref, bi_ref,
                         wp_ref, bp_ref, wc_ref, bc_ref,
                         out_ref):
    B, S = mask_ref.shape
    BS = B * S
    H = HIDDEN
    ROWS = out_ref.shape[0]
    scale = 1.0 / math.sqrt(HEAD_DIM)

    # ---- embeddings, fully in-kernel (no wrapper gather / HBM round trip) ----
    ids = ids_ref[...]                                                   # (BS, 1) int32
    vocab_iota = jax.lax.broadcasted_iota(jnp.int32, (BS, VOCAB), 1)
    one_hot = (vocab_iota == ids).astype(jnp.float32)                    # (BS, VOCAB)
    word = jnp.dot(one_hot, wemb_ref[...],
                   preferred_element_type=jnp.float32)                   # (BS, H) f32

    pos = pemb_ref[...][0:S, :]                                          # (S, H) static slice
    typ = temb_ref[...][0:1, :]                                          # (1, H) token_type=0
    emb = (word.reshape(B, S, H) + pos[None, :, :] + typ[None, :, :]).reshape(BS, H)

    embln = embln_ref[...]                                               # (2, H)
    h = _layernorm(emb, embln[0:1], embln[1:2])                          # (BS, H) f32

    # Additive key mask, computed once in-kernel and reused by every layer/head.
    mask_f = mask_ref[...].astype(jnp.float32)                           # (B, S)
    neg = ((1.0 - mask_f) * -10000.0)[:, None, :]                        # (B, 1, S)

    # TODO(synk): for real BERT sizes, stream per-layer weights HBM->VMEM
    # (layer grid axis marked "arbitrary" / emit_pipeline) instead of keeping
    # all layers resident; the fully-resident design is fine at ~0.5 MB.
    for l in range(NUM_LAYERS):                                          # static unroll
        vech = vech_ref[l]                                               # (6, H)

        # Fused, lane-padded Q/K/V projection: one (BS,H)@(H,768) bf16 matmul.
        # Every per-head block below is a full 128-lane slab -> free aligned slices.
        qkv = jnp.dot(h.astype(jnp.bfloat16), wqkv_ref[l],
                      preferred_element_type=jnp.float32) + bqkv_ref[l]  # (BS, 3*NH*HD_PAD)

        attn = None
        for hh in range(NUM_HEADS):                                      # static unroll; no concat
            qo = (0 * NUM_HEADS + hh) * HD_PAD
            ko = (1 * NUM_HEADS + hh) * HD_PAD
            vo = (2 * NUM_HEADS + hh) * HD_PAD
            q3 = qkv[:, qo:qo + HD_PAD].reshape(B, S, HD_PAD).astype(jnp.bfloat16)
            k3 = qkv[:, ko:ko + HD_PAD].reshape(B, S, HD_PAD).astype(jnp.bfloat16)
            v3 = qkv[:, vo:vo + HD_PAD].reshape(B, S, HD_PAD).astype(jnp.bfloat16)

            s = jnp.einsum('bqd,bkd->bqk', q3, k3,
                           preferred_element_type=jnp.float32) * scale + neg
            # No max-subtraction: post-scale scores are O(1); masked keys give
            # exp(-1e4) -> 0, so the softmax is safe without the extra XLU reduce.
            p = jnp.exp(s)
            p = p * pl.reciprocal(jnp.sum(p, axis=-1, keepdims=True), approx=True)
            ctx = jnp.einsum('bqk,bkd->bqd', p.astype(jnp.bfloat16), v3,
                             preferred_element_type=jnp.float32)         # (B, S, HD_PAD)

            # Per-head output projection accumulated directly (replaces the
            # lane-dim concatenate; zero-padded HD lanes contribute nothing).
            contrib = jnp.dot(ctx.reshape(BS, HD_PAD).astype(jnp.bfloat16),
                              wo_ref[l * NUM_HEADS + hh],
                              preferred_element_type=jnp.float32)        # (BS, H)
            attn = contrib if attn is None else attn + contrib

        h1 = _layernorm(h + attn + vech[0:1], vech[1:2], vech[2:3])

        ff = _gelu(jnp.dot(h1.astype(jnp.bfloat16), wi_ref[l],
                           preferred_element_type=jnp.float32) + bi_ref[l])
        ffo = jnp.dot(ff.astype(jnp.bfloat16), wo2_ref[l],
                      preferred_element_type=jnp.float32) + vech[3:4]
        h = _layernorm(h1 + ffo, vech[4:5], vech[5:6])

    # ---- pooler + classifier: CLS rows via one-hot row-select matmul, output
    # padded to a full (8,128) f32 tile so the final store is a dense vst.
    row_i = jax.lax.broadcasted_iota(jnp.int32, (ROWS, BS), 0)
    col_i = jax.lax.broadcasted_iota(jnp.int32, (ROWS, BS), 1)
    sel = (col_i == row_i * S).astype(jnp.float32)                       # pad rows select nothing
    cls = jnp.dot(sel, h, preferred_element_type=jnp.float32)            # (ROWS, H)
    pooled = jnp.tanh(jnp.dot(cls.astype(jnp.bfloat16), wp_ref[...],
                              preferred_element_type=jnp.float32) + bp_ref[...])
    out_ref[...] = jnp.dot(pooled.astype(jnp.bfloat16), wc_ref[...],
                           preferred_element_type=jnp.float32) + bc_ref[...]


# --------------------------- parameter init -----------------------------------
def init_params(key):
    std = 0.02
    ks = iter(jax.random.split(key, 64))

    def nrm(shape):
        return std * jax.random.normal(next(ks), shape, dtype=jnp.float32)

    wqkv_l, wo_l, wi_l, wo2_l = [], [], [], []
    for _ in range(NUM_LAYERS):
        wq = nrm((HIDDEN, NUM_HEADS, HEAD_DIM))
        wk = nrm((HIDDEN, NUM_HEADS, HEAD_DIM))
        wv = nrm((HIDDEN, NUM_HEADS, HEAD_DIM))
        # lane-padded layout: lanes = [Q_h0 | Q_h1 | K_h0 | K_h1 | V_h0 | V_h1],
        # each head block HD_PAD=128 wide with real data in the first HEAD_DIM lanes.
        wqkv = jnp.zeros((HIDDEN, 3, NUM_HEADS, HD_PAD), jnp.float32)
        wqkv = wqkv.at[:, 0, :, :HEAD_DIM].set(wq)
        wqkv = wqkv.at[:, 1, :, :HEAD_DIM].set(wk)
        wqkv = wqkv.at[:, 2, :, :HEAD_DIM].set(wv)
        wqkv_l.append(wqkv.reshape(HIDDEN, 3 * NUM_HEADS * HD_PAD))

        wo = jnp.zeros((NUM_HEADS, HD_PAD, HIDDEN), jnp.float32)
        wo = wo.at[:, :HEAD_DIM, :].set(nrm((NUM_HEADS, HEAD_DIM, HIDDEN)))
        wo_l.append(wo)

        wi_l.append(nrm((HIDDEN, INTERMEDIATE)))
        wo2_l.append(nrm((INTERMEDIATE, HIDDEN)))

    # packed per-layer H-wide vectors: [bo, ln1_g, ln1_b, bo2, ln2_g, ln2_b]
    vech_one = jnp.stack([jnp.zeros(HIDDEN), jnp.ones(HIDDEN), jnp.zeros(HIDDEN),
                          jnp.zeros(HIDDEN), jnp.ones(HIDDEN), jnp.zeros(HIDDEN)])
    vech = jnp.tile(vech_one[None], (NUM_LAYERS, 1, 1)).astype(jnp.float32)

    cls_w = jnp.zeros((HIDDEN, C_PAD), jnp.float32)
    cls_w = cls_w.at[:, :NUM_CLASSES].set(nrm((HIDDEN, NUM_CLASSES)))

    return {
        "word_emb": nrm((VOCAB, HIDDEN)),                                # f32 (VOCAB, H)
        "pos_emb": nrm((MAX_POS, HIDDEN)),
        "type_emb": nrm((TYPE_VOCAB, HIDDEN)),
        "emb_ln": jnp.stack([jnp.ones(HIDDEN), jnp.zeros(HIDDEN)]).astype(jnp.float32),
        "wqkv": jnp.stack(wqkv_l).astype(jnp.bfloat16),                  # (L, H, 3*NH*HD_PAD)
        "bqkv": jnp.zeros((NUM_LAYERS, 1, 3 * NUM_HEADS * HD_PAD), jnp.float32),
        "wo":   jnp.concatenate(wo_l, axis=0).astype(jnp.bfloat16),      # (L*NH, HD_PAD, H)
        "wi":   jnp.stack(wi_l).astype(jnp.bfloat16),                    # (L, H, I)
        "wo2":  jnp.stack(wo2_l).astype(jnp.bfloat16),                   # (L, I, H)
        "vech": vech,                                                    # (L, 6, H)
        "bi":   jnp.zeros((NUM_LAYERS, 1, INTERMEDIATE), jnp.float32),
        "pooler_w": nrm((HIDDEN, HIDDEN)).astype(jnp.bfloat16),
        "pooler_b": jnp.zeros((1, HIDDEN), jnp.float32),
        "cls_w": cls_w.astype(jnp.bfloat16),                             # (H, C_PAD)
        "cls_b": jnp.zeros((1, C_PAD), jnp.float32),
    }


# ------------------------------ forward ----------------------------------------
@jax.jit
def character_evaluator_forward(params, input_ids, attention_masks):
    """Equivalent of CharacterEvaluator.forward: returns logits [B, NUM_CLASSES]."""
    B, S = input_ids.shape
    rows = max(8, ((B + 7) // 8) * 8)                 # sublane-padded output rows
    ids = input_ids.reshape(B * S, 1).astype(jnp.int32)

    # TODO(synk): once batch grows, add a batch grid axis with
    # dimension_semantics=("parallel",) to engage v7x's second TensorCore;
    # at this toy size a gridless single-call kernel is optimal.
    logits_pad = pl.pallas_call(
        fused_forward_kernel,
        out_shape=jax.ShapeDtypeStruct((rows, C_PAD), jnp.float32),
        compiler_params=pltpu.CompilerParams(vmem_limit_bytes=32 * 1024 * 1024),
    )(ids, attention_masks.astype(jnp.int32),
      params["word_emb"], params["pos_emb"], params["type_emb"], params["emb_ln"],
      params["wqkv"], params["bqkv"], params["wo"], params["wi"], params["wo2"],
      params["vech"], params["bi"],
      params["pooler_w"], params["pooler_b"], params["cls_w"], params["cls_b"])

    return logits_pad[:B, :NUM_CLASSES]


# -------------------------------- main -----------------------------------------
if __name__ == "__main__":
    B, S = 4, 16
    root = jax.random.PRNGKey(0)
    k_param, k_ids = jax.random.split(root)

    params = init_params(k_param)
    input_ids = jax.random.randint(k_ids, (B, S), 0, VOCAB, dtype=jnp.int32)
    lengths = jnp.array([S, 12, S, 8], dtype=jnp.int32)
    attention_masks = (jnp.arange(S, dtype=jnp.int32)[None, :] < lengths[:, None]).astype(jnp.int32)

    logits = character_evaluator_forward(params, input_ids, attention_masks)
    logits = jax.block_until_ready(logits)
    assert logits.shape == (B, NUM_CLASSES)
    assert bool(jnp.all(jnp.isfinite(logits)))
    print("KERNEL_OK")
</pallas_src>

<mosaic_0001>
module attributes {stable_mosaic.version = 11 : i64} {
  func.func @fused_forward_kernel(%arg0: memref<64x1xi32, #tpu.memory_space<vmem>>, %arg1: memref<4x16xi32, #tpu.memory_space<vmem>>, %arg2: memref<128x64xf32, #tpu.memory_space<vmem>>, %arg3: memref<64x64xf32, #tpu.memory_space<vmem>>, %arg4: memref<2x64xf32, #tpu.memory_space<vmem>>, %arg5: memref<2x64xf32, #tpu.memory_space<vmem>>, %arg6: memref<2x64x768xbf16, #tpu.memory_space<vmem>>, %arg7: memref<2x1x768xf32, #tpu.memory_space<vmem>>, %arg8: memref<4x128x64xbf16, #tpu.memory_space<vmem>>, %arg9: memref<2x64x128xbf16, #tpu.memory_space<vmem>>, %arg10: memref<2x128x64xbf16, #tpu.memory_space<vmem>>, %arg11: memref<2x6x64xf32, #tpu.memory_space<vmem>>, %arg12: memref<2x1x128xf32, #tpu.memory_space<vmem>>, %arg13: memref<64x64xbf16, #tpu.memory_space<vmem>>, %arg14: memref<1x64xf32, #tpu.memory_space<vmem>>, %arg15: memref<64x128xbf16, #tpu.memory_space<vmem>>, %arg16: memref<1x128xf32, #tpu.memory_space<vmem>>, %arg17: memref<8x128xf32, #tpu.memory_space<vmem>>) attributes {dimension_semantics = [], scalar_prefetch = 0 : i64, scratch_operands = 0 : i64, tpu.core_type = #tpu.core_type<tc>} {
    %c0 = arith.constant 0 : index
    %c0_0 = arith.constant 0 : index
    %0 = vector.load %arg0[%c0, %c0_0] : memref<64x1xi32, #tpu.memory_space<vmem>>, vector<64x1xi32>
    %1 = tpu.iota {dimensions = array<i32: 1>} : vector<64x128xi32>
    %2 = vector.broadcast %0 : vector<64x1xi32> to vector<64x128xi32>
    %3 = arith.cmpi eq, %1, %2 : vector<64x128xi32>
    %4 = arith.extui %3 : vector<64x128xi1> to vector<64x128xi32>
    %5 = arith.sitofp %4 : vector<64x128xi32> to vector<64x128xf32>
    %c0_1 = arith.constant 0 : index
    %c0_2 = arith.constant 0 : index
    %6 = vector.load %arg2[%c0_1, %c0_2] : memref<128x64xf32, #tpu.memory_space<vmem>>, vector<128x64xf32>
    %cst = arith.constant dense<0.000000e+00> : vector<64x64xf32>
    %7 = tpu.matmul %5, %6, %cst {dimension_numbers = #tpu.dot_dimension_numbers<[1], [0], [0], [1], [0, 0, 1, 1], [], []>} : vector<64x128xf32>, vector<128x64xf32>, vector<64x64xf32> -> vector<64x64xf32>
    %c0_3 = arith.constant 0 : index
    %c0_4 = arith.constant 0 : index
    %8 = vector.load %arg3[%c0_3, %c0_4] : memref<64x64xf32, #tpu.memory_space<vmem>>, vector<64x64xf32>
    %9 = vector.extract_strided_slice %8 {offsets = [0, 0], sizes = [16, 64], strides = [1, 1]} : vector<64x64xf32> to vector<16x64xf32>
    %c0_5 = arith.constant 0 : index
    %c0_6 = arith.constant 0 : index
    %10 = vector.load %arg4[%c0_5, %c0_6] : memref<2x64xf32, #tpu.memory_space<vmem>>, vector<2x64xf32>
    %11 = vector.extract_strided_slice %10 {offsets = [0, 0], sizes = [1, 64], strides = [1, 1]} : vector<2x64xf32> to vector<1x64xf32>
    %12 = vector.shape_cast %7 : vector<64x64xf32> to vector<4x16x64xf32>
    %13 = vector.shape_cast %9 : vector<16x64xf32> to vector<1x16x64xf32>
    %14 = vector.broadcast %13 : vector<1x16x64xf32> to vector<4x16x64xf32>
    %15 = arith.addf %12, %14 : vector<4x16x64xf32>
    %16 = vector.shape_cast %11 : vector<1x64xf32> to vector<1x1x64xf32>
    %17 = vector.broadcast %16 : vector<1x1x64xf32> to vector<4x16x64xf32>
    %18 = arith.addf %15, %17 : vector<4x16x64xf32>
    %19 = vector.shape_cast %18 : vector<4x16x64xf32> to vector<64x64xf32>
    %c0_7 = arith.constant 0 : index
    %c0_8 = arith.constant 0 : index
    %20 = vector.load %arg5[%c0_7, %c0_8] : memref<2x64xf32, #tpu.memory_space<vmem>>, vector<2x64xf32>
    %21 = vector.extract_strided_slice %20 {offsets = [0, 0], sizes = [1, 64], strides = [1, 1]} : vector<2x64xf32> to vector<1x64xf32>
    %22 = vector.extract_strided_slice %20 {offsets = [1, 0], sizes = [1, 64], strides = [1, 1]} : vector<2x64xf32> to vector<1x64xf32>
    %cst_9 = arith.constant dense<0.000000e+00> : vector<64xf32>
    %23 = vector.multi_reduction <add>, %19, %cst_9 [1] : vector<64x64xf32> to vector<64xf32>
    %24 = vector.shape_cast %23 : vector<64xf32> to vector<64x1xf32>
    %cst_10 = arith.constant 6.400000e+01 : f32
    %25 = vector.broadcast %cst_10 : f32 to vector<64x1xf32>
    %26 = arith.divf %24, %25 : vector<64x1xf32>
    %27 = vector.broadcast %26 : vector<64x1xf32> to vector<64x64xf32>
    %28 = arith.subf %19, %27 : vector<64x64xf32>
    %29 = vector.broadcast %26 : vector<64x1xf32> to vector<64x64xf32>
    %30 = arith.subf %19, %29 : vector<64x64xf32>
    %31 = arith.mulf %28, %30 : vector<64x64xf32>
    %cst_11 = arith.constant dense<0.000000e+00> : vector<64xf32>
    %32 = vector.multi_reduction <add>, %31, %cst_11 [1] : vector<64x64xf32> to vector<64xf32>
    %33 = vector.shape_cast %32 : vector<64xf32> to vector<64x1xf32>
    %cst_12 = arith.constant 6.400000e+01 : f32
    %34 = vector.broadcast %cst_12 : f32 to vector<64x1xf32>
    %35 = arith.divf %33, %34 : vector<64x1xf32>
    %36 = vector.broadcast %26 : vector<64x1xf32> to vector<64x64xf32>
    %37 = arith.subf %19, %36 : vector<64x64xf32>
    %cst_13 = arith.constant 9.99999996E-13 : f32
    %38 = vector.broadcast %cst_13 : f32 to vector<64x1xf32>
    %39 = arith.addf %35, %38 : vector<64x1xf32>
    %40 = math.rsqrt %39 : vector<64x1xf32>
    %41 = vector.broadcast %40 : vector<64x1xf32> to vector<64x64xf32>
    %42 = arith.mulf %37, %41 : vector<64x64xf32>
    %43 = vector.broadcast %21 : vector<1x64xf32> to vector<64x64xf32>
    %44 = arith.mulf %42, %43 : vector<64x64xf32>
    %45 = vector.broadcast %22 : vector<1x64xf32> to vector<64x64xf32>
    %46 = arith.addf %44, %45 : vector<64x64xf32>
    %c0_14 = arith.constant 0 : index
    %c0_15 = arith.constant 0 : index
    %47 = vector.load %arg1[%c0_14, %c0_15] : memref<4x16xi32, #tpu.memory_space<vmem>>, vector<4x16xi32>
    %48 = arith.sitofp %47 : vector<4x16xi32> to vector<4x16xf32>
    %cst_16 = arith.constant 1.000000e+00 : f32
    %49 = vector.broadcast %cst_16 : f32 to vector<4x16xf32>
    %50 = arith.subf %49, %48 : vector<4x16xf32>
    %cst_17 = arith.constant -1.000000e+04 : f32
    %51 = vector.broadcast %cst_17 : f32 to vector<4x16xf32>
    %52 = arith.mulf %50, %51 : vector<4x16xf32>
    %53 = vector.shape_cast %52 : vector<4x16xf32> to vector<4x1x16xf32>
    %c0_18 = arith.constant 0 : index
    %c0_19 = arith.constant 0 : index
    %c0_20 = arith.constant 0 : index
    %54 = vector.load %arg11[%c0_18, %c0_19, %c0_20] : memref<2x6x64xf32, #tpu.memory_space<vmem>>, vector<1x6x64xf32>
    %55 = vector.shape_cast %54 : vector<1x6x64xf32> to vector<6x64xf32>
    %56 = arith.truncf %46 : vector<64x64xf32> to vector<64x64xbf16>
    %c0_21 = arith.constant 0 : index
    %c0_22 = arith.constant 0 : index
    %c0_23 = arith.constant 0 : index
    %57 = vector.load %arg6[%c0_21, %c0_22, %c0_23] : memref<2x64x768xbf16, #tpu.memory_space<vmem>>, vector<1x64x768xbf16>
    %58 = vector.shape_cast %57 : vector<1x64x768xbf16> to vector<64x768xbf16>
    %cst_24 = arith.constant dense<0.000000e+00> : vector<64x768xf32>
    %59 = tpu.matmul %56, %58, %cst_24 {dimension_numbers = #tpu.dot_dimension_numbers<[1], [0], [0], [1], [0, 0, 1, 1], [], []>} : vector<64x64xbf16>, vector<64x768xbf16>, vector<64x768xf32> -> vector<64x768xf32>
    %c0_25 = arith.constant 0 : index
    %c0_26 = arith.constant 0 : index
    %c0_27 = arith.constant 0 : index
    %60 = vector.load %arg7[%c0_25, %c0_26, %c0_27] : memref<2x1x768xf32, #tpu.memory_space<vmem>>, vector<1x1x768xf32>
    %61 = vector.shape_cast %60 : vector<1x1x768xf32> to vector<1x768xf32>
    %62 = vector.broadcast %61 : vector<1x768xf32> to vector<64x768xf32>
    %63 = arith.addf %59, %62 : vector<64x768xf32>
    %64 = vector.extract_strided_slice %63 {offsets = [0, 0], sizes = [64, 128], strides = [1, 1]} : vector<64x768xf32> to vector<64x128xf32>
    %65 = vector.shape_cast %64 : vector<64x128xf32> to vector<4x16x128xf32>
    %66 = arith.truncf %65 : vector<4x16x128xf32> to vector<4x16x128xbf16>
    %67 = vector.extract_strided_slice %63 {offsets = [0, 256], sizes = [64, 128], strides = [1, 1]} : vector<64x768xf32> to vector<64x128xf32>
    %68 = vector.shape_cast %67 : vector<64x128xf32> to vector<4x16x128xf32>
    %69 = arith.truncf %68 : vector<4x16x128xf32> to vector<4x16x128xbf16>
    %70 = vector.extract_strided_slice %63 {offsets = [0, 512], sizes = [64, 128], strides = [1, 1]} : vector<64x768xf32> to vector<64x128xf32>
    %71 = vector.shape_cast %70 : vector<64x128xf32> to vector<4x16x128xf32>
    %72 = arith.truncf %71 : vector<4x16x128xf32> to vector<4x16x128xbf16>
    "tpu.trace_start"() <{level = 10 : i32, message = "bqd,bkd->bqk"}> : () -> ()
    %cst_28 = arith.constant dense<0.000000e+00> : vector<4x16x16xf32>
    %73 = tpu.matmul %66, %69, %cst_28 {dimension_numbers = #tpu.dot_dimension_numbers<[2], [2], [1], [1], [0, 0, 0, 1, 1, 1], [0], [0]>} : vector<4x16x128xbf16>, vector<4x16x128xbf16>, vector<4x16x16xf32> -> vector<4x16x16xf32>
    "tpu.trace_stop"() : () -> ()
    %cst_29 = arith.constant 0.176776692 : f32
    %74 = vector.broadcast %cst_29 : f32 to vector<4x16x16xf32>
    %75 = arith.mulf %73, %74 : vector<4x16x16xf32>
    %76 = vector.broadcast %53 : vector<4x1x16xf32> to vector<4x16x16xf32>
    %77 = arith.addf %75, %76 : vector<4x16x16xf32>
    %78 = math.exp %77 : vector<4x16x16xf32>
    %cst_30 = arith.constant dense<0.000000e+00> : vector<4x16xf32>
    %79 = vector.multi_reduction <add>, %78, %cst_30 [2] : vector<4x16x16xf32> to vector<4x16xf32>
    %80 = vector.shape_cast %79 : vector<4x16xf32> to vector<4x16x1xf32>
    %81 = tpu.reciprocal %80 {approx = true} : vector<4x16x1xf32> -> vector<4x16x1xf32>
    %82 = vector.broadcast %81 : vector<4x16x1xf32> to vector<4x16x16xf32>
    %83 = arith.mulf %78, %82 : vector<4x16x16xf32>
    %84 = arith.truncf %83 : vector<4x16x16xf32> to vector<4x16x16xbf16>
    "tpu.trace_start"() <{level = 10 : i32, message = "bqk,bkd->bqd"}> : () -> ()
    %cst_31 = arith.constant dense<0.000000e+00> : vector<4x16x128xf32>
    %85 = tpu.matmul %84, %72, %cst_31 {dimension_numbers = #tpu.dot_dimension_numbers<[2], [1], [1], [2], [0, 0, 0, 1, 1, 2], [0], [0]>} : vector<4x16x16xbf16>, vector<4x16x128xbf16>, vector<4x16x128xf32> -> vector<4x16x128xf32>
    "tpu.trace_stop"() : () -> ()
    %86 = vector.shape_cast %85 : vector<4x16x128xf32> to vector<64x128xf32>
    %87 = arith.truncf %86 : vector<64x128xf32> to vector<64x128xbf16>
    %c0_32 = arith.constant 0 : index
    %c0_33 = arith.constant 0 : index
    %c0_34 = arith.constant 0 : index
    %88 = vector.load %arg8[%c0_32, %c0_33, %c0_34] : memref<4x128x64xbf16, #tpu.memory_space<vmem>>, vector<1x128x64xbf16>
    %89 = vector.shape_cast %88 : vector<1x128x64xbf16> to vector<128x64xbf16>
    %cst_35 = arith.constant dense<0.000000e+00> : vector<64x64xf32>
    %90 = tpu.matmul %87, %89, %cst_35 {dimension_numbers = #tpu.dot_dimension_numbers<[1], [0], [0], [1], [0, 0, 1, 1], [], []>} : vector<64x128xbf16>, vector<128x64xbf16>, vector<64x64xf32> -> vector<64x64xf32>
    %91 = vector.extract_strided_slice %63 {offsets = [0, 128], sizes = [64, 128], strides = [1, 1]} : vector<64x768xf32> to vector<64x128xf32>
    %92 = vector.shape_cast %91 : vector<64x128xf32> to vector<4x16x128xf32>
    %93 = arith.truncf %92 : vector<4x16x128xf32> to vector<4x16x128xbf16>
    %94 = vector.extract_strided_slice %63 {offsets = [0, 384], sizes = [64, 128], strides = [1, 1]} : vector<64x768xf32> to vector<64x128xf32>
    %95 = vector.shape_cast %94 : vector<64x128xf32> to vector<4x16x128xf32>
    %96 = arith.truncf %95 : vector<4x16x128xf32> to vector<4x16x128xbf16>
    %97 = vector.extract_strided_slice %63 {offsets = [0, 640], sizes = [64, 128], strides = [1, 1]} : vector<64x768xf32> to vector<64x128xf32>
    %98 = vector.shape_cast %97 : vector<64x128xf32> to vector<4x16x128xf32>
    %99 = arith.truncf %98 : vector<4x16x128xf32> to vector<4x16x128xbf16>
    "tpu.trace_start"() <{level = 10 : i32, message = "bqd,bkd->bqk"}> : () -> ()
    %cst_36 = arith.constant dense<0.000000e+00> : vector<4x16x16xf32>
    %100 = tpu.matmul %93, %96, %cst_36 {dimension_numbers = #tpu.dot_dimension_numbers<[2], [2], [1], [1], [0, 0, 0, 1, 1, 1], [0], [0]>} : vector<4x16x128xbf16>, vector<4x16x128xbf16>, vector<4x16x16xf32> -> vector<4x16x16xf32>
    "tpu.trace_stop"() : () -> ()
    %cst_37 = arith.constant 0.176776692 : f32
    %101 = vector.broadcast %cst_37 : f32 to vector<4x16x16xf32>
    %102 = arith.mulf %100, %101 : vector<4x16x16xf32>
    %103 = vector.broadcast %53 : vector<4x1x16xf32> to vector<4x16x16xf32>
    %104 = arith.addf %102, %103 : vector<4x16x16xf32>
    %105 = math.exp %104 : vector<4x16x16xf32>
    %cst_38 = arith.constant dense<0.000000e+00> : vector<4x16xf32>
    %106 = vector.multi_reduction <add>, %105, %cst_38 [2] : vector<4x16x16xf32> to vector<4x16xf32>
    %107 = vector.shape_cast %106 : vector<4x16xf32> to vector<4x16x1xf32>
    %108 = tpu.reciprocal %107 {approx = true} : vector<4x16x1xf32> -> vector<4x16x1xf32>
    %109 = vector.broadcast %108 : vector<4x16x1xf32> to vector<4x16x16xf32>
    %110 = arith.mulf %105, %109 : vector<4x16x16xf32>
    %111 = arith.truncf %110 : vector<4x16x16xf32> to vector<4x16x16xbf16>
    "tpu.trace_start"() <{level = 10 : i32, message = "bqk,bkd->bqd"}> : () -> ()
    %cst_39 = arith.constant dense<0.000000e+00> : vector<4x16x128xf32>
    %112 = tpu.matmul %111, %99, %cst_39 {dimension_numbers = #tpu.dot_dimension_numbers<[2], [1], [1], [2], [0, 0, 0, 1, 1, 2], [0], [0]>} : vector<4x16x16xbf16>, vector<4x16x128xbf16>, vector<4x16x128xf32> -> vector<4x16x128xf32>
    "tpu.trace_stop"() : () -> ()
    %113 = vector.shape_cast %112 : vector<4x16x128xf32> to vector<64x128xf32>
    %114 = arith.truncf %113 : vector<64x128xf32> to vector<64x128xbf16>
    %c1 = arith.constant 1 : index
    %c0_40 = arith.constant 0 : index
    %c0_41 = arith.constant 0 : index
    %115 = vector.load %arg8[%c1, %c0_40, %c0_41] : memref<4x128x64xbf16, #tpu.memory_space<vmem>>, vector<1x128x64xbf16>
    %116 = vector.shape_cast %115 : vector<1x128x64xbf16> to vector<128x64xbf16>
    %cst_42 = arith.constant dense<0.000000e+00> : vector<64x64xf32>
    %117 = tpu.matmul %114, %116, %cst_42 {dimension_numbers = #tpu.dot_dimension_numbers<[1], [0], [0], [1], [0, 0, 1, 1], [], []>} : vector<64x128xbf16>, vector<128x64xbf16>, vector<64x64xf32> -> vector<64x64xf32>
    %118 = arith.addf %90, %117 : vector<64x64xf32>
    %119 = arith.addf %46, %118 : vector<64x64xf32>
    %120 = vector.extract_strided_slice %55 {offsets = [0, 0], sizes = [1, 64], strides = [1, 1]} : vector<6x64xf32> to vector<1x64xf32>
    %121 = vector.broadcast %120 : vector<1x64xf32> to vector<64x64xf32>
    %122 = arith.addf %119, %121 : vector<64x64xf32>
    %123 = vector.extract_strided_slice %55 {offsets = [1, 0], sizes = [1, 64], strides = [1, 1]} : vector<6x64xf32> to vector<1x64xf32>
    %124 = vector.extract_strided_slice %55 {offsets = [2, 0], sizes = [1, 64], strides = [1, 1]} : vector<6x64xf32> to vector<1x64xf32>
    %cst_43 = arith.constant dense<0.000000e+00> : vector<64xf32>
    %125 = vector.multi_reduction <add>, %122, %cst_43 [1] : vector<64x64xf32> to vector<64xf32>
    %126 = vector.shape_cast %125 : vector<64xf32> to vector<64x1xf32>
    %cst_44 = arith.constant 6.400000e+01 : f32
    %127 = vector.broadcast %cst_44 : f32 to vector<64x1xf32>
    %128 = arith.divf %126, %127 : vector<64x1xf32>
    %129 = vector.broadcast %128 : vector<64x1xf32> to vector<64x64xf32>
    %130 = arith.subf %122, %129 : vector<64x64xf32>
    %131 = vector.broadcast %128 : vector<64x1xf32> to vector<64x64xf32>
    %132 = arith.subf %122, %131 : vector<64x64xf32>
    %133 = arith.mulf %130, %132 : vector<64x64xf32>
    %cst_45 = arith.constant dense<0.000000e+00> : vector<64xf32>
    %134 = vector.multi_reduction <add>, %133, %cst_45 [1] : vector<64x64xf32> to vector<64xf32>
    %135 = vector.shape_cast %134 : vector<64xf32> to vector<64x1xf32>
    %cst_46 = arith.constant 6.400000e+01 : f32
    %136 = vector.broadcast %cst_46 : f32 to vector<64x1xf32>
    %137 = arith.divf %135, %136 : vector<64x1xf32>
    %138 = vector.broadcast %128 : vector<64x1xf32> to vector<64x64xf32>
    %139 = arith.subf %122, %138 : vector<64x64xf32>
    %cst_47 = arith.constant 9.99999996E-13 : f32
    %140 = vector.broadcast %cst_47 : f32 to vector<64x1xf32>
    %141 = arith.addf %137, %140 : vector<64x1xf32>
    %142 = math.rsqrt %141 : vector<64x1xf32>
    %143 = vector.broadcast %142 : vector<64x1xf32> to vector<64x64xf32>
    %144 = arith.mulf %139, %143 : vector<64x64xf32>
    %145 = vector.broadcast %123 : vector<1x64xf32> to vector<64x64xf32>
    %146 = arith.mulf %144, %145 : vector<64x64xf32>
    %147 = vector.broadcast %124 : vector<1x64xf32> to vector<64x64xf32>
    %148 = arith.addf %146, %147 : vector<64x64xf32>
    %149 = arith.truncf %148 : vector<64x64xf32> to vector<64x64xbf16>
    %c0_48 = arith.constant 0 : index
    %c0_49 = arith.constant 0 : index
    %c0_50 = arith.constant 0 : index
    %150 = vector.load %arg9[%c0_48, %c0_49, %c0_50] : memref<2x64x128xbf16, #tpu.memory_space<vmem>>, vector<1x64x128xbf16>
    %151 = vector.shape_cast %150 : vector<1x64x128xbf16> to vector<64x128xbf16>
    %cst_51 = arith.constant dense<0.000000e+00> : vector<64x128xf32>
    %152 = tpu.matmul %149, %151, %cst_51 {dimension_numbers = #tpu.dot_dimension_numbers<[1], [0], [0], [1], [0, 0, 1, 1], [], []>} : vector<64x64xbf16>, vector<64x128xbf16>, vector<64x128xf32> -> vector<64x128xf32>
    %c0_52 = arith.constant 0 : index
    %c0_53 = arith.constant 0 : index
    %c0_54 = arith.constant 0 : index
    %153 = vector.load %arg12[%c0_52, %c0_53, %c0_54] : memref<2x1x128xf32, #tpu.memory_space<vmem>>, vector<1x1x128xf32>
    %154 = vector.shape_cast %153 : vector<1x1x128xf32> to vector<1x128xf32>
    %155 = vector.broadcast %154 : vector<1x128xf32> to vector<64x128xf32>
    %156 = arith.addf %152, %155 : vector<64x128xf32>
    %cst_55 = arith.constant 5.000000e-01 : f32
    %157 = vector.broadcast %cst_55 : f32 to vector<64x128xf32>
    %158 = arith.mulf %157, %156 : vector<64x128xf32>
    %cst_56 = arith.constant 4.471500e-02 : f32
    %159 = vector.broadcast %cst_56 : f32 to vector<64x128xf32>
    %160 = arith.mulf %159, %156 : vector<64x128xf32>
    %161 = arith.mulf %160, %156 : vector<64x128xf32>
    %162 = arith.mulf %161, %156 : vector<64x128xf32>
    %163 = arith.addf %156, %162 : vector<64x128xf32>
    %cst_57 = arith.constant 0.797884583 : f32
    %164 = vector.broadcast %cst_57 : f32 to vector<64x128xf32>
    %165 = arith.mulf %164, %163 : vector<64x128xf32>
    %166 = math.tanh %165 : vector<64x128xf32>
    %cst_58 = arith.constant 1.000000e+00 : f32
    %167 = vector.broadcast %cst_58 : f32 to vector<64x128xf32>
    %168 = arith.addf %167, %166 : vector<64x128xf32>
    %169 = arith.mulf %158, %168 : vector<64x128xf32>
    %170 = arith.truncf %169 : vector<64x128xf32> to vector<64x128xbf16>
    %c0_59 = arith.constant 0 : index
    %c0_60 = arith.constant 0 : index
    %c0_61 = arith.constant 0 : index
    %171 = vector.load %arg10[%c0_59, %c0_60, %c0_61] : memref<2x128x64xbf16, #tpu.memory_space<vmem>>, vector<1x128x64xbf16>
    %172 = vector.shape_cast %171 : vector<1x128x64xbf16> to vector<128x64xbf16>
    %cst_62 = arith.constant dense<0.000000e+00> : vector<64x64xf32>
    %173 = tpu.matmul %170, %172, %cst_62 {dimension_numbers = #tpu.dot_dimension_numbers<[1], [0], [0], [1], [0, 0, 1, 1], [], []>} : vector<64x128xbf16>, vector<128x64xbf16>, vector<64x64xf32> -> vector<64x64xf32>
    %174 = vector.extract_strided_slice %55 {offsets = [3, 0], sizes = [1, 64], strides = [1, 1]} : vector<6x64xf32> to vector<1x64xf32>
    %175 = vector.broadcast %174 : vector<1x64xf32> to vector<64x64xf32>
    %176 = arith.addf %173, %175 : vector<64x64xf32>
    %177 = arith.addf %148, %176 : vector<64x64xf32>
    %178 = vector.extract_strided_slice %55 {offsets = [4, 0], sizes = [1, 64], strides = [1, 1]} : vector<6x64xf32> to vector<1x64xf32>
    %179 = vector.extract_strided_slice %55 {offsets = [5, 0], sizes = [1, 64], strides = [1, 1]} : vector<6x64xf32> to vector<1x64xf32>
    %cst_63 = arith.constant dense<0.000000e+00> : vector<64xf32>
    %180 = vector.multi_reduction <add>, %177, %cst_63 [1] : vector<64x64xf32> to vector<64xf32>
    %181 = vector.shape_cast %180 : vector<64xf32> to vector<64x1xf32>
    %cst_64 = arith.constant 6.400000e+01 : f32
    %182 = vector.broadcast %cst_64 : f32 to vector<64x1xf32>
    %183 = arith.divf %181, %182 : vector<64x1xf32>
    %184 = vector.broadcast %183 : vector<64x1xf32> to vector<64x64xf32>
    %185 = arith.subf %177, %184 : vector<64x64xf32>
    %186 = vector.broadcast %183 : vector<64x1xf32> to vector<64x64xf32>
    %187 = arith.subf %177, %186 : vector<64x64xf32>
    %188 = arith.mulf %185, %187 : vector<64x64xf32>
    %cst_65 = arith.constant dense<0.000000e+00> : vector<64xf32>
    %189 = vector.multi_reduction <add>, %188, %cst_65 [1] : vector<64x64xf32> to vector<64xf32>
    %190 = vector.shape_cast %189 : vector<64xf32> to vector<64x1xf32>
    %cst_66 = arith.constant 6.400000e+01 : f32
    %191 = vector.broadcast %cst_66 : f32 to vector<64x1xf32>
    %192 = arith.divf %190, %191 : vector<64x1xf32>
    %193 = vector.broadcast %183 : vector<64x1xf32> to vector<64x64xf32>
    %194 = arith.subf %177, %193 : vector<64x64xf32>
    %cst_67 = arith.constant 9.99999996E-13 : f32
    %195 = vector.broadcast %cst_67 : f32 to vector<64x1xf32>
    %196 = arith.addf %192, %195 : vector<64x1xf32>
    %197 = math.rsqrt %196 : vector<64x1xf32>
    %198 = vector.broadcast %197 : vector<64x1xf32> to vector<64x64xf32>
    %199 = arith.mulf %194, %198 : vector<64x64xf32>
    %200 = vector.broadcast %178 : vector<1x64xf32> to vector<64x64xf32>
    %201 = arith.mulf %199, %200 : vector<64x64xf32>
    %202 = vector.broadcast %179 : vector<1x64xf32> to vector<64x64xf32>
    %203 = arith.addf %201, %202 : vector<64x64xf32>
    %c1_68 = arith.constant 1 : index
    %c0_69 = arith.constant 0 : index
    %c0_70 = arith.constant 0 : index
    %204 = vector.load %arg11[%c1_68, %c0_69, %c0_70] : memref<2x6x64xf32, #tpu.memory_space<vmem>>, vector<1x6x64xf32>
    %205 = vector.shape_cast %204 : vector<1x6x64xf32> to vector<6x64xf32>
    %206 = arith.truncf %203 : vector<64x64xf32> to vector<64x64xbf16>
    %c1_71 = arith.constant 1 : index
    %c0_72 = arith.constant 0 : index
    %c0_73 = arith.constant 0 : index
    %207 = vector.load %arg6[%c1_71, %c0_72, %c0_73] : memref<2x64x768xbf16, #tpu.memory_space<vmem>>, vector<1x64x768xbf16>
    %208 = vector.shape_cast %207 : vector<1x64x768xbf16> to vector<64x768xbf16>
    %cst_74 = arith.constant dense<0.000000e+00> : vector<64x768xf32>
    %209 = tpu.matmul %206, %208, %cst_74 {dimension_numbers = #tpu.dot_dimension_numbers<[1], [0], [0], [1], [0, 0, 1, 1], [], []>} : vector<64x64xbf16>, vector<64x768xbf16>, vector<64x768xf32> -> vector<64x768xf32>
    %c1_75 = arith.constant 1 : index
    %c0_76 = arith.constant 0 : index
    %c0_77 = arith.constant 0 : index
    %210 = vector.load %arg7[%c1_75, %c0_76, %c0_77] : memref<2x1x768xf32, #tpu.memory_space<vmem>>, vector<1x1x768xf32>
    %211 = vector.shape_cast %210 : vector<1x1x768xf32> to vector<1x768xf32>
    %212 = vector.broadcast %211 : vector<1x768xf32> to vector<64x768xf32>
    %213 = arith.addf %209, %212 : vector<64x768xf32>
    %214 = vector.extract_strided_slice %213 {offsets = [0, 0], sizes = [64, 128], strides = [1, 1]} : vector<64x768xf32> to vector<64x128xf32>
    %215 = vector.shape_cast %214 : vector<64x128xf32> to vector<4x16x128xf32>
    %216 = arith.truncf %215 : vector<4x16x128xf32> to vector<4x16x128xbf16>
    %217 = vector.extract_strided_slice %213 {offsets = [0, 256], sizes = [64, 128], strides = [1, 1]} : vector<64x768xf32> to vector<64x128xf32>
    %218 = vector.shape_cast %217 : vector<64x128xf32> to vector<4x16x128xf32>
    %219 = arith.truncf %218 : vector<4x16x128xf32> to vector<4x16x128xbf16>
    %220 = vector.extract_strided_slice %213 {offsets = [0, 512], sizes = [64, 128], strides = [1, 1]} : vector<64x768xf32> to vector<64x128xf32>
    %221 = vector.shape_cast %220 : vector<64x128xf32> to vector<4x16x128xf32>
    %222 = arith.truncf %221 : vector<4x16x128xf32> to vector<4x16x128xbf16>
    "tpu.trace_start"() <{level = 10 : i32, message = "bqd,bkd->bqk"}> : () -> ()
    %cst_78 = arith.constant dense<0.000000e+00> : vector<4x16x16xf32>
    %223 = tpu.matmul %216, %219, %cst_78 {dimension_numbers = #tpu.dot_dimension_numbers<[2], [2], [1], [1], [0, 0, 0, 1, 1, 1], [0], [0]>} : vector<4x16x128xbf16>, vector<4x16x128xbf16>, vector<4x16x16xf32> -> vector<4x16x16xf32>
    "tpu.trace_stop"() : () -> ()
    %cst_79 = arith.constant 0.176776692 : f32
    %224 = vector.broadcast %cst_79 : f32 to vector<4x16x16xf32>
    %225 = arith.mulf %223, %224 : vector<4x16x16xf32>
    %226 = vector.broadcast %53 : vector<4x1x16xf32> to vector<4x16x16xf32>
    %227 = arith.addf %225, %226 : vector<4x16x16xf32>
    %228 = math.exp %227 : vector<4x16x16xf32>
    %cst_80 = arith.constant dense<0.000000e+00> : vector<4x16xf32>
    %229 = vector.multi_reduction <add>, %228, %cst_80 [2] : vector<4x16x16xf32> to vector<4x16xf32>
    %230 = vector.shape_cast %229 : vector<4x16xf32> to vector<4x16x1xf32>
    %231 = tpu.reciprocal %230 {approx = true} : vector<4x16x1xf32> -> vector<4x16x1xf32>
    %232 = vector.broadcast %231 : vector<4x16x1xf32> to vector<4x16x16xf32>
    %233 = arith.mulf %228, %232 : vector<4x16x16xf32>
    %234 = arith.truncf %233 : vector<4x16x16xf32> to vector<4x16x16xbf16>
    "tpu.trace_start"() <{level = 10 : i32, message = "bqk,bkd->bqd"}> : () -> ()
    %cst_81 = arith.constant dense<0.000000e+00> : vector<4x16x128xf32>
    %235 = tpu.matmul %234, %222, %cst_81 {dimension_numbers = #tpu.dot_dimension_numbers<[2], [1], [1], [2], [0, 0, 0, 1, 1, 2], [0], [0]>} : vector<4x16x16xbf16>, vector<4x16x128xbf16>, vector<4x16x128xf32> -> vector<4x16x128xf32>
    "tpu.trace_stop"() : () -> ()
    %236 = vector.shape_cast %235 : vector<4x16x128xf32> to vector<64x128xf32>
    %237 = arith.truncf %236 : vector<64x128xf32> to vector<64x128xbf16>
    %c2 = arith.constant 2 : index
    %c0_82 = arith.constant 0 : index
    %c0_83 = arith.constant 0 : index
    %238 = vector.load %arg8[%c2, %c0_82, %c0_83] : memref<4x128x64xbf16, #tpu.memory_space<vmem>>, vector<1x128x64xbf16>
    %239 = vector.shape_cast %238 : vector<1x128x64xbf16> to vector<128x64xbf16>
    %cst_84 = arith.constant dense<0.000000e+00> : vector<64x64xf32>
    %240 = tpu.matmul %237, %239, %cst_84 {dimension_numbers = #tpu.dot_dimension_numbers<[1], [0], [0], [1], [0, 0, 1, 1], [], []>} : vector<64x128xbf16>, vector<128x64xbf16>, vector<64x64xf32> -> vector<64x64xf32>
    %241 = vector.extract_strided_slice %213 {offsets = [0, 128], sizes = [64, 128], strides = [1, 1]} : vector<64x768xf32> to vector<64x128xf32>
    %242 = vector.shape_cast %241 : vector<64x128xf32> to vector<4x16x128xf32>
    %243 = arith.truncf %242 : vector<4x16x128xf32> to vector<4x16x128xbf16>
    %244 = vector.extract_strided_slice %213 {offsets = [0, 384], sizes = [64, 128], strides = [1, 1]} : vector<64x768xf32> to vector<64x128xf32>
    %245 = vector.shape_cast %244 : vector<64x128xf32> to vector<4x16x128xf32>
    %246 = arith.truncf %245 : vector<4x16x128xf32> to vector<4x16x128xbf16>
    %247 = vector.extract_strided_slice %213 {offsets = [0, 640], sizes = [64, 128], strides = [1, 1]} : vector<64x768xf32> to vector<64x128xf32>
    %248 = vector.shape_cast %247 : vector<64x128xf32> to vector<4x16x128xf32>
    %249 = arith.truncf %248 : vector<4x16x128xf32> to vector<4x16x128xbf16>
    "tpu.trace_start"() <{level = 10 : i32, message = "bqd,bkd->bqk"}> : () -> ()
    %cst_85 = arith.constant dense<0.000000e+00> : vector<4x16x16xf32>
    %250 = tpu.matmul %243, %246, %cst_85 {dimension_numbers = #tpu.dot_dimension_numbers<[2], [2], [1], [1], [0, 0, 0, 1, 1, 1], [0], [0]>} : vector<4x16x128xbf16>, vector<4x16x128xbf16>, vector<4x16x16xf32> -> vector<4x16x16xf32>
    "tpu.trace_stop"() : () -> ()
    %cst_86 = arith.constant 0.176776692 : f32
    %251 = vector.broadcast %cst_86 : f32 to vector<4x16x16xf32>
    %252 = arith.mulf %250, %251 : vector<4x16x16xf32>
    %253 = vector.broadcast %53 : vector<4x1x16xf32> to vector<4x16x16xf32>
    %254 = arith.addf %252, %253 : vector<4x16x16xf32>
    %255 = math.exp %254 : vector<4x16x16xf32>
    %cst_87 = arith.constant dense<0.000000e+00> : vector<4x16xf32>
    %256 = vector.multi_reduction <add>, %255, %cst_87 [2] : vector<4x16x16xf32> to vector<4x16xf32>
    %257 = vector.shape_cast %256 : vector<4x16xf32> to vector<4x16x1xf32>
    %258 = tpu.reciprocal %257 {approx = true} : vector<4x16x1xf32> -> vector<4x16x1xf32>
    %259 = vector.broadcast %258 : vector<4x16x1xf32> to vector<4x16x16xf32>
    %260 = arith.mulf %255, %259 : vector<4x16x16xf32>
    %261 = arith.truncf %260 : vector<4x16x16xf32> to vector<4x16x16xbf16>
    "tpu.trace_start"() <{level = 10 : i32, message = "bqk,bkd->bqd"}> : () -> ()
    %cst_88 = arith.constant dense<0.000000e+00> : vector<4x16x128xf32>
    %262 = tpu.matmul %261, %249, %cst_88 {dimension_numbers = #tpu.dot_dimension_numbers<[2], [1], [1], [2], [0, 0, 0, 1, 1, 2], [0], [0]>} : vector<4x16x16xbf16>, vector<4x16x128xbf16>, vector<4x16x128xf32> -> vector<4x16x128xf32>
    "tpu.trace_stop"() : () -> ()
    %263 = vector.shape_cast %262 : vector<4x16x128xf32> to vector<64x128xf32>
    %264 = arith.truncf %263 : vector<64x128xf32> to vector<64x128xbf16>
    %c3 = arith.constant 3 : index
    %c0_89 = arith.constant 0 : index
    %c0_90 = arith.constant 0 : index
    %265 = vector.load %arg8[%c3, %c0_89, %c0_90] : memref<4x128x64xbf16, #tpu.memory_space<vmem>>, vector<1x128x64xbf16>
    %266 = vector.shape_cast %265 : vector<1x128x64xbf16> to vector<128x64xbf16>
    %cst_91 = arith.constant dense<0.000000e+00> : vector<64x64xf32>
    %267 = tpu.matmul %264, %266, %cst_91 {dimension_numbers = #tpu.dot_dimension_numbers<[1], [0], [0], [1], [0, 0, 1, 1], [], []>} : vector<64x128xbf16>, vector<128x64xbf16>, vector<64x64xf32> -> vector<64x64xf32>
    %268 = arith.addf %240, %267 : vector<64x64xf32>
    %269 = arith.addf %203, %268 : vector<64x64xf32>
    %270 = vector.extract_strided_slice %205 {offsets = [0, 0], sizes = [1, 64], strides = [1, 1]} : vector<6x64xf32> to vector<1x64xf32>
    %271 = vector.broadcast %270 : vector<1x64xf32> to vector<64x64xf32>
    %272 = arith.addf %269, %271 : vector<64x64xf32>
    %273 = vector.extract_strided_slice %205 {offsets = [1, 0], sizes = [1, 64], strides = [1, 1]} : vector<6x64xf32> to vector<1x64xf32>
    %274 = vector.extract_strided_slice %205 {offsets = [2, 0], sizes = [1, 64], strides = [1, 1]} : vector<6x64xf32> to vector<1x64xf32>
    %cst_92 = arith.constant dense<0.000000e+00> : vector<64xf32>
    %275 = vector.multi_reduction <add>, %272, %cst_92 [1] : vector<64x64xf32> to vector<64xf32>
    %276 = vector.shape_cast %275 : vector<64xf32> to vector<64x1xf32>
    %cst_93 = arith.constant 6.400000e+01 : f32
    %277 = vector.broadcast %cst_93 : f32 to vector<64x1xf32>
    %278 = arith.divf %276, %277 : vector<64x1xf32>
    %279 = vector.broadcast %278 : vector<64x1xf32> to vector<64x64xf32>
    %280 = arith.subf %272, %279 : vector<64x64xf32>
    %281 = vector.broadcast %278 : vector<64x1xf32> to vector<64x64xf32>
    %282 = arith.subf %272, %281 : vector<64x64xf32>
    %283 = arith.mulf %280, %282 : vector<64x64xf32>
    %cst_94 = arith.constant dense<0.000000e+00> : vector<64xf32>
    %284 = vector.multi_reduction <add>, %283, %cst_94 [1] : vector<64x64xf32> to vector<64xf32>
    %285 = vector.shape_cast %284 : vector<64xf32> to vector<64x1xf32>
    %cst_95 = arith.constant 6.400000e+01 : f32
    %286 = vector.broadcast %cst_95 : f32 to vector<64x1xf32>
    %287 = arith.divf %285, %286 : vector<64x1xf32>
    %288 = vector.broadcast %278 : vector<64x1xf32> to vector<64x64xf32>
    %289 = arith.subf %272, %288 : vector<64x64xf32>
    %cst_96 = arith.constant 9.99999996E-13 : f32
    %290 = vector.broadcast %cst_96 : f32 to vector<64x1xf32>
    %291 = arith.addf %287, %290 : vector<64x1xf32>
    %292 = math.rsqrt %291 : vector<64x1xf32>
    %293 = vector.broadcast %292 : vector<64x1xf32> to vector<64x64xf32>
    %294 = arith.mulf %289, %293 : vector<64x64xf32>
    %295 = vector.broadcast %273 : vector<1x64xf32> to vector<64x64xf32>
    %296 = arith.mulf %294, %295 : vector<64x64xf32>
    %297 = vector.broadcast %274 : vector<1x64xf32> to vector<64x64xf32>
    %298 = arith.addf %296, %297 : vector<64x64xf32>
    %299 = arith.truncf %298 : vector<64x64xf32> to vector<64x64xbf16>
    %c1_97 = arith.constant 1 : index
    %c0_98 = arith.constant 0 : index
    %c0_99 = arith.constant 0 : index
    %300 = vector.load %arg9[%c1_97, %c0_98, %c0_99] : memref<2x64x128xbf16, #tpu.memory_space<vmem>>, vector<1x64x128xbf16>
    %301 = vector.shape_cast %300 : vector<1x64x128xbf16> to vector<64x128xbf16>
    %cst_100 = arith.constant dense<0.000000e+00> : vector<64x128xf32>
    %302 = tpu.matmul %299, %301, %cst_100 {dimension_numbers = #tpu.dot_dimension_numbers<[1], [0], [0], [1], [0, 0, 1, 1], [], []>} : vector<64x64xbf16>, vector<64x128xbf16>, vector<64x128xf32> -> vector<64x128xf32>
    %c1_101 = arith.constant 1 : index
    %c0_102 = arith.constant 0 : index
    %c0_103 = arith.constant 0 : index
    %303 = vector.load %arg12[%c1_101, %c0_102, %c0_103] : memref<2x1x128xf32, #tpu.memory_space<vmem>>, vector<1x1x128xf32>
    %304 = vector.shape_cast %303 : vector<1x1x128xf32> to vector<1x128xf32>
    %305 = vector.broadcast %304 : vector<1x128xf32> to vector<64x128xf32>
    %306 = arith.addf %302, %305 : vector<64x128xf32>
    %cst_104 = arith.constant 5.000000e-01 : f32
    %307 = vector.broadcast %cst_104 : f32 to vector<64x128xf32>
    %308 = arith.mulf %307, %306 : vector<64x128xf32>
    %cst_105 = arith.constant 4.471500e-02 : f32
    %309 = vector.broadcast %cst_105 : f32 to vector<64x128xf32>
    %310 = arith.mulf %309, %306 : vector<64x128xf32>
    %311 = arith.mulf %310, %306 : vector<64x128xf32>
    %312 = arith.mulf %311, %306 : vector<64x128xf32>
    %313 = arith.addf %306, %312 : vector<64x128xf32>
    %cst_106 = arith.constant 0.797884583 : f32
    %314 = vector.broadcast %cst_106 : f32 to vector<64x128xf32>
    %315 = arith.mulf %314, %313 : vector<64x128xf32>
    %316 = math.tanh %315 : vector<64x128xf32>
    %cst_107 = arith.constant 1.000000e+00 : f32
    %317 = vector.broadcast %cst_107 : f32 to vector<64x128xf32>
    %318 = arith.addf %317, %316 : vector<64x128xf32>
    %319 = arith.mulf %308, %318 : vector<64x128xf32>
    %320 = arith.truncf %319 : vector<64x128xf32> to vector<64x128xbf16>
    %c1_108 = arith.constant 1 : index
    %c0_109 = arith.constant 0 : index
    %c0_110 = arith.constant 0 : index
    %321 = vector.load %arg10[%c1_108, %c0_109, %c0_110] : memref<2x128x64xbf16, #tpu.memory_space<vmem>>, vector<1x128x64xbf16>
    %322 = vector.shape_cast %321 : vector<1x128x64xbf16> to vector<128x64xbf16>
    %cst_111 = arith.constant dense<0.000000e+00> : vector<64x64xf32>
    %323 = tpu.matmul %320, %322, %cst_111 {dimension_numbers = #tpu.dot_dimension_numbers<[1], [0], [0], [1], [0, 0, 1, 1], [], []>} : vector<64x128xbf16>, vector<128x64xbf16>, vector<64x64xf32> -> vector<64x64xf32>
    %324 = vector.extract_strided_slice %205 {offsets = [3, 0], sizes = [1, 64], strides = [1, 1]} : vector<6x64xf32> to vector<1x64xf32>
    %325 = vector.broadcast %324 : vector<1x64xf32> to vector<64x64xf32>
    %326 = arith.addf %323, %325 : vector<64x64xf32>
    %327 = arith.addf %298, %326 : vector<64x64xf32>
    %328 = vector.extract_strided_slice %205 {offsets = [4, 0], sizes = [1, 64], strides = [1, 1]} : vector<6x64xf32> to vector<1x64xf32>
    %329 = vector.extract_strided_slice %205 {offsets = [5, 0], sizes = [1, 64], strides = [1, 1]} : vector<6x64xf32> to vector<1x64xf32>
    %cst_112 = arith.constant dense<0.000000e+00> : vector<64xf32>
    %330 = vector.multi_reduction <add>, %327, %cst_112 [1] : vector<64x64xf32> to vector<64xf32>
    %331 = vector.shape_cast %330 : vector<64xf32> to vector<64x1xf32>
    %cst_113 = arith.constant 6.400000e+01 : f32
    %332 = vector.broadcast %cst_113 : f32 to vector<64x1xf32>
    %333 = arith.divf %331, %332 : vector<64x1xf32>
    %334 = vector.broadcast %333 : vector<64x1xf32> to vector<64x64xf32>
    %335 = arith.subf %327, %334 : vector<64x64xf32>
    %336 = vector.broadcast %333 : vector<64x1xf32> to vector<64x64xf32>
    %337 = arith.subf %327, %336 : vector<64x64xf32>
    %338 = arith.mulf %335, %337 : vector<64x64xf32>
    %cst_114 = arith.constant dense<0.000000e+00> : vector<64xf32>
    %339 = vector.multi_reduction <add>, %338, %cst_114 [1] : vector<64x64xf32> to vector<64xf32>
    %340 = vector.shape_cast %339 : vector<64xf32> to vector<64x1xf32>
    %cst_115 = arith.constant 6.400000e+01 : f32
    %341 = vector.broadcast %cst_115 : f32 to vector<64x1xf32>
    %342 = arith.divf %340, %341 : vector<64x1xf32>
    %343 = vector.broadcast %333 : vector<64x1xf32> to vector<64x64xf32>
    %344 = arith.subf %327, %343 : vector<64x64xf32>
    %cst_116 = arith.constant 9.99999996E-13 : f32
    %345 = vector.broadcast %cst_116 : f32 to vector<64x1xf32>
    %346 = arith.addf %342, %345 : vector<64x1xf32>
    %347 = math.rsqrt %346 : vector<64x1xf32>
    %348 = vector.broadcast %347 : vector<64x1xf32> to vector<64x64xf32>
    %349 = arith.mulf %344, %348 : vector<64x64xf32>
    %350 = vector.broadcast %328 : vector<1x64xf32> to vector<64x64xf32>
    %351 = arith.mulf %349, %350 : vector<64x64xf32>
    %352 = vector.broadcast %329 : vector<1x64xf32> to vector<64x64xf32>
    %353 = arith.addf %351, %352 : vector<64x64xf32>
    %354 = tpu.iota {dimensions = array<i32: 0>} : vector<8x64xi32>
    %355 = tpu.iota {dimensions = array<i32: 1>} : vector<8x64xi32>
    %c16_i32 = arith.constant 16 : i32
    %356 = vector.broadcast %c16_i32 : i32 to vector<8x64xi32>
    %357 = arith.muli %354, %356 : vector<8x64xi32>
    %358 = arith.cmpi eq, %355, %357 : vector<8x64xi32>
    %359 = arith.extui %358 : vector<8x64xi1> to vector<8x64xi32>
    %360 = arith.sitofp %359 : vector<8x64xi32> to vector<8x64xf32>
    %cst_117 = arith.constant dense<0.000000e+00> : vector<8x64xf32>
    %361 = tpu.matmul %360, %353, %cst_117 {dimension_numbers = #tpu.dot_dimension_numbers<[1], [0], [0], [1], [0, 0, 1, 1], [], []>} : vector<8x64xf32>, vector<64x64xf32>, vector<8x64xf32> -> vector<8x64xf32>
    %362 = arith.truncf %361 : vector<8x64xf32> to vector<8x64xbf16>
    %c0_118 = arith.constant 0 : index
    %c0_119 = arith.constant 0 : index
    %363 = vector.load %arg13[%c0_118, %c0_119] : memref<64x64xbf16, #tpu.memory_space<vmem>>, vector<64x64xbf16>
    %cst_120 = arith.constant dense<0.000000e+00> : vector<8x64xf32>
    %364 = tpu.matmul %362, %363, %cst_120 {dimension_numbers = #tpu.dot_dimension_numbers<[1], [0], [0], [1], [0, 0, 1, 1], [], []>} : vector<8x64xbf16>, vector<64x64xbf16>, vector<8x64xf32> -> vector<8x64xf32>
    %c0_121 = arith.constant 0 : index
    %c0_122 = arith.constant 0 : index
    %365 = vector.load %arg14[%c0_121, %c0_122] : memref<1x64xf32, #tpu.memory_space<vmem>>, vector<1x64xf32>
    %366 = vector.broadcast %365 : vector<1x64xf32> to vector<8x64xf32>
    %367 = arith.addf %364, %366 : vector<8x64xf32>
    %368 = math.tanh %367 : vector<8x64xf32>
    %369 = arith.truncf %368 : vector<8x64xf32> to vector<8x64xbf16>
    %c0_123 = arith.constant 0 : index
    %c0_124 = arith.constant 0 : index
    %370 = vector.load %arg15[%c0_123, %c0_124] : memref<64x128xbf16, #tpu.memory_space<vmem>>, vector<64x128xbf16>
    %cst_125 = arith.constant dense<0.000000e+00> : vector<8x128xf32>
    %371 = tpu.matmul %369, %370, %cst_125 {dimension_numbers = #tpu.dot_dimension_numbers<[1], [0], [0], [1], [0, 0, 1, 1], [], []>} : vector<8x64xbf16>, vector<64x128xbf16>, vector<8x128xf32> -> vector<8x128xf32>
    %c0_126 = arith.constant 0 : index
    %c0_127 = arith.constant 0 : index
    %372 = vector.load %arg16[%c0_126, %c0_127] : memref<1x128xf32, #tpu.memory_space<vmem>>, vector<1x128xf32>
    %373 = vector.broadcast %372 : vector<1x128xf32> to vector<8x128xf32>
    %374 = arith.addf %371, %373 : vector<8x128xf32>
    %c0_128 = arith.constant 0 : index
    %c0_129 = arith.constant 0 : index
    %375 = vector.load %arg17[%c0_128, %c0_129] : memref<8x128xf32, #tpu.memory_space<vmem>>, vector<8x128xf32>
    tpu.vector_store %arg17[%c0_128, %c0_129], %374 {strides = array<i32>} : memref<8x128xf32, #tpu.memory_space<vmem>>, vector<8x128xf32>,
    return
  }
}

</mosaic_0001>

<bundles_post_ra>
// kernel: character_evaluator_forward.1
= control target key start
LH: loop header
LB: loop body
LE: loop exit
PB: predicated region body
PF: predicated region fallthrough
CT: control target
= control target key end

     0   :  { %v8068_v0 = vmov 0   ;;  %v65_v25 = vlaneseq  ;;  %v6314_v29 = vmov 1.0   ;;  %vm260_vm8 = vcmask 523264   ;;  %s8048_s0 = inlined_call_operand.vmem [shape: s32[64,1], index: 0, kind: input, shape index: {}]   ;;  %s8049_s2 = inlined_call_operand.vmem [shape: f32[128,64], index: 2, kind: input, shape index: {}]   ;;  %s8050_s4 = inlined_call_operand.vmem [shape: f32[2,64], index: 4, kind: input, shape index: {}]   ;;  %s8051_s3 = inlined_call_operand.vmem [shape: f32[64,64], index: 3, kind: input, shape index: {}]   ;;  %s8052_s6 = inlined_call_operand.vmem [shape: bf16[2,64,768], index: 6, kind: input, shape index: {}]   ;;  %s8053_s5 = inlined_call_operand.vmem [shape: f32[2,64], index: 5, kind: input, shape index: {}]   ;;  %s8054_s7 = inlined_call_operand.vmem [shape: f32[2,1,768], index: 7, kind: input, shape index: {}]   ;;  %s8055_s1 = inlined_call_operand.vmem [shape: s32[4,16], index: 1, kind: input, shape index: {}]   ;;  %s8056_s8 = inlined_call_operand.vmem [shape: bf16[4,128,64], index: 8, kind: input, shape index: {}]   ;;  %s8057_s11 = inlined_call_operand.vmem [shape: f32[2,6,64], index: 11, kind: input, shape index: {}]   ;;  %s8058_s9 = inlined_call_operand.vmem [shape: bf16[2,64,128], index: 9, kind: input, shape index: {}]   ;;  %s8059_s10 = inlined_call_operand.vmem [shape: bf16[2,128,64], index: 10, kind: input, shape index: {}]   ;;  %s8060_s12 = inlined_call_operand.vmem [shape: f32[2,1,128], index: 12, kind: input, shape index: {}]   ;;  %s8061_s13 = inlined_call_operand.vmem [shape: bf16[64,64], index: 13, kind: input, shape index: {}]   ;;  %s8062_s15 = inlined_call_operand.vmem [shape: bf16[64,128], index: 15, kind: input, shape index: {}]   ;;  %s8063_s14 = inlined_call_operand.vmem [shape: f32[1,64], index: 14, kind: input, shape index: {}]   ;;  %s8064_s16 = inlined_call_operand.vmem [shape: f32[1,128], index: 16, kind: input, shape index: {}]   ;;  %s8065_s17 = inlined_call_operand.vmem [shape: f32[8,128], index: 17, kind: output, shape index: {}]  }
   0x1   :  { %8085 = sst [smem:[#allocation9_spill]] %s8048_s0  ;;  %5933 = vset.pattern.permute.xlu1 %v8068_v0  ;;  %5932 = vset.pattern.permute.xlu0 %v8068_v0  ;;  %v238_v38 = vld [vmem:[%s8050_s4] sm:$0x3]  ;;  %v237_v39 = vld [vmem:[%s8051_s3 + $0x8] sm:$0xff]  ;;  %vm6316_vm9 = vmmov 0   ;;  %vm1059_vm10 = vcmask 130048  }
   0x2   :  { %8086 = sst [smem:[#allocation10_spill]] %s8049_s2  ;;  %644 = vmatprep.mubr.bf16.mxu1 %v8068_v0  ;;  %v6483_v26 = vand.u32 127, %v65_v25  ;;  %v6494_v36 = vshrl.u32 %v65_v25, 7  ;;  %v236_v42 = vld [vmem:[%s8051_s3] sm:$0xff] }
   0x3   :  { %s8087_s26 = sld [smem:[#allocation9_spill]] }
   0x4   :  { %s8088_s20 = sld [smem:[#allocation10_spill]]  ;;  %8089 = vst [vmem:[#allocation2_spill] sm:$0xff] %v6483_v26  ;;  %8090 = vst [vmem:[#allocation3_spill] sm:$0xff] %v6494_v36  ;;  %v6497_v37 = vsub.s32 0, %v6494_v36 }
   0x6   :  { %v250_v40 = vrot.slane %v238_v38, %v6497_v37 }
   0x9   :  { %v59_v1 = vld [vmem:[%s8087_s26 + $0x10] sm:$0xff]  ;;  %v57_v2 = vld [vmem:[%s8087_s26] sm:$0xff]  ;;  %v60_v3 = vld [vmem:[%s8087_s26 + $0x18] sm:$0xff] }
   0xa   :  { %74 = vperm.xlu1 %5933, %v59_v1   ;;  %68 = vperm.xlu0 %5932, %v57_v2   ;;  %v58_v4 = vld [vmem:[%s8087_s26 + $0x8] sm:$0xff]  ;;  %v130_v5 = vld [vmem:[%s8088_s20 + $0x78] sm:$0xff]  ;;  %v129_v6 = vld [vmem:[%s8088_s20 + $0x70] sm:$0xff] }
   0xb   :  { %5472 = vmatprep.subr.mxu0 %v130_v5  ;;  %v128_v7 = vld [vmem:[%s8088_s20 + $0x68] sm:$0xff]  ;;  %v61_v9 = vld [vmem:[%s8087_s26 + $0x20] sm:$0xff]  ;;  %v64_v11 = vld [vmem:[%s8087_s26 + $0x38] sm:$0xff] }
   0xc   :  { %5473 = vmatpush3.msra.mxu0 %v130_v5  ;;  %v62_v8 = vld [vmem:[%s8087_s26 + $0x28] sm:$0xff]  ;;  %v127_v10 = vld [vmem:[%s8088_s20 + $0x60] sm:$0xff]  ;;  %v63_v12 = vld [vmem:[%s8087_s26 + $0x30] sm:$0xff] }
   0xd   :  { %5474 = vmatprep.subr.mxu0 %v129_v6  ;;  %v126_v13 = vld [vmem:[%s8088_s20 + $0x58] sm:$0xff]  ;;  %v125_v14 = vld [vmem:[%s8088_s20 + $0x50] sm:$0xff]  ;;  %v124_v15 = vld [vmem:[%s8088_s20 + $0x48] sm:$0xff] }
   0xe   :  { %77 = vperm.xlu1 %5933, %v60_v3   ;;  %71 = vperm.xlu0 %5932, %v58_v4   ;;  %v123_v16 = vld [vmem:[%s8088_s20 + $0x40] sm:$0xff]  ;;  %v122_v17 = vld [vmem:[%s8088_s20 + $0x38] sm:$0xff]  ;;  %v121_v18 = vld [vmem:[%s8088_s20 + $0x30] sm:$0xff] }
   0xf   :  { %5475 = vmatpush3.msra.mxu0 %v129_v6  ;;  %v120_v19 = vld [vmem:[%s8088_s20 + $0x28] sm:$0xff]  ;;  %v119_v20 = vld [vmem:[%s8088_s20 + $0x20] sm:$0xff]  ;;  %v118_v21 = vld [vmem:[%s8088_s20 + $0x18] sm:$0xff] }
  0x10   :  { %5476 = vmatprep.subr.mxu0 %v128_v7  ;;  %v117_v22 = vld [vmem:[%s8088_s20 + $0x10] sm:$0xff]  ;;  %v116_v23 = vld [vmem:[%s8088_s20 + $0x8] sm:$0xff]  ;;  %v115_v24 = vld [vmem:[%s8088_s20] sm:$0xff] }
  0x11   :  { %5477 = vmatpush3.msra.mxu0 %v128_v7 }
  0x12   :  { %83 = vperm.xlu1 %5933, %v62_v8   ;;  %80 = vperm.xlu0 %5932, %v61_v9  }
  0x13   :  { %5478 = vmatprep.subr.mxu0 %v127_v10 }
  0x14   :  { %5479 = vmatpush3.msra.mxu0 %v127_v10 }
  0x15   :  { %5480 = vmatprep.subr.mxu0 %v126_v13 }
  0x16   :  { %89 = vperm.xlu1 %5933, %v64_v11   ;;  %86 = vperm.xlu0 %5932, %v63_v12  }
  0x17   :  { %5481 = vmatpush3.msra.mxu0 %v126_v13 }
  0x18   :  { %5482 = vmatprep.subr.mxu0 %v125_v14 }
  0x19   :  { %5483 = vmatpush3.msra.mxu0 %v125_v14 }
  0x1a   :  { %5484 = vmatprep.subr.mxu0 %v124_v15 }
  0x1b   :  { %5485 = vmatpush3.msra.mxu0 %v124_v15 }
  0x1c   :  { %5486 = vmatprep.subr.mxu0 %v123_v16 }
  0x1d   :  { %5487 = vmatpush3.msra.mxu0 %v123_v16 }
  0x1e   :  { %5488 = vmatprep.subr.mxu0 %v122_v17 }
  0x1f   :  { %5489 = vmatpush3.msra.mxu0 %v122_v17 }
  0x20   :  { %5490 = vmatprep.subr.mxu0 %v121_v18 }
  0x21   :  { %5491 = vmatpush3.msra.mxu0 %v121_v18 }
  0x22   :  { %5492 = vmatprep.subr.mxu0 %v120_v19 }
  0x23   :  { %5493 = vmatpush3.msra.mxu0 %v120_v19 }
  0x24   :  { %5494 = vmatprep.subr.mxu0 %v119_v20 }
  0x25   :  { %5495 = vmatpush3.msra.mxu0 %v119_v20 }
  0x26   :  { %5496 = vmatprep.subr.mxu0 %v118_v21 }
  0x27   :  { %5497 = vmatpush3.msra.mxu0 %v118_v21 }
  0x28   :  { %5498 = vmatprep.subr.mxu0 %v117_v22 }
  0x29   :  { %5499 = vmatpush3.msra.mxu0 %v117_v22 }
  0x2a   :  { %5500 = vmatprep.subr.mxu0 %v116_v23 }
  0x2b   :  { %5501 = vmatpush3.msra.mxu0 %v116_v23 }
  0x2c   :  { %5502 = vmatprep.subr.mxu0 %v115_v24 }
  0x2d   :  { %5503 = vmatpush3.msra.mxu0 %v115_v24 }
  0x85   :  { %v75_v27 = vpop.permute.xlu1 %74  ;;  %v69_v28 = vpop.permute.xlu0 %68 }
  0x86   :  { %vm91_vm0 = vcmp.eq.s32.totalorder %v6483_v26, %v69_v28  ;;  %vm93_vm1 = vcmp.eq.s32.totalorder %v6483_v26, %v75_v27 }
  0x87   :  { %5504 = vmatprep.mubr.msk.f32.mxu0 %vm91_vm0, %v6314_v29 }
  0x89   :  { %v78_v30 = vpop.permute.xlu1 %77  ;;  %v72_v31 = vpop.permute.xlu0 %71 }
  0x8a   :  { %vm92_vm2 = vcmp.eq.s32.totalorder %v6483_v26, %v72_v31  ;;  %vm94_vm3 = vcmp.eq.s32.totalorder %v6483_v26, %v78_v30 }
  0x8b   :  { %5505 = vmatmul.mubr.msk.f32.vlgmr.msra.gmra.mxu0 %vm92_vm2, %v6314_v29 }
  0x8c   :  { %5507 = vmatprep.mubr.msk.f32.mxu0 %vm93_vm1, %v6314_v29 }
  0x8d   :  { %v84_v32 = vpop.permute.xlu1 %83  ;;  %v81_v33 = vpop.permute.xlu0 %80 }
  0x8e   :  { %vm95_vm4 = vcmp.eq.s32.totalorder %v6483_v26, %v81_v33  ;;  %vm96_vm5 = vcmp.eq.s32.totalorder %v6483_v26, %v84_v32 }
  0x8f   :  { %5508 = vmatmul.mubr.msk.f32.gmra.mxu0 %vm94_vm3, %v6314_v29 }
  0x90   :  { %5510 = vmatprep.mubr.msk.f32.mxu0 %vm95_vm4, %v6314_v29 }
  0x91   :  { %v87_v34 = vpop.permute.xlu0 %86  ;;  %v90_v35 = vpop.permute.xlu1 %89 }
  0x92   :  { %vm97_vm6 = vcmp.eq.s32.totalorder %v6483_v26, %v87_v34  ;;  %vm98_vm7 = vcmp.eq.s32.totalorder %v6483_v26, %v90_v35 }
  0x93   :  { %5511 = vmatmul.mubr.msk.f32.gmra.mxu0 %vm96_vm5, %v6314_v29 }
  0x94   :  { %5513 = vmatprep.mubr.msk.f32.mxu0 %vm97_vm6, %v6314_v29 }
  0x97   :  { %5514 = vmatmul.mubr.msk.f32.gmra.mxu0 %vm98_vm7, %v6314_v29 }
  0x98   :  { %717 = vmatprep.mubr.bf16.mxu0 %v8068_v0 }
 0x14b   :  { %v5506_v41 = vpop.f32.mrf.mxu0 }
 0x14c   :  { %v240_v43 = vadd.f32 %v5506_v41, %v237_v39 }
 0x14d   :  { %v197_v44 = vpop.f32.mrf.mxu0 }
 0x14e   :  { %v239_v45 = vadd.f32 %v236_v42, %v197_v44  ;;  %v252_v46 = vadd.f32 %v250_v40, %v240_v43 }
 0x14f   :  { %v5509_v47 = vpop.f32.mrf.mxu0 }
 0x150   :  { %v264_v48 = vsel %vm260_vm8, %v252_v46, 0.0  ;;  %v251_v49 = vadd.f32 %v250_v40, %v239_v45  ;;  %v242_v50 = vadd.f32 %v5509_v47, %v237_v39 }
 0x151   :  { %265 = vadd.xlane.f32.xlu1 %v264_v48  ;;  %v207_v51 = vpop.f32.mrf.mxu0 }
 0x152   :  { %v241_v52 = vadd.f32 %v236_v42, %v207_v51  ;;  %v261_v53 = vsel %vm260_vm8, %v251_v49, 0.0  ;;  %v254_v57 = vadd.f32 %v250_v40, %v242_v50 }
 0x153   :  { %262 = vadd.xlane.f32.xlu0 %v261_v53  ;;  %v5512_v54 = vpop.f32.mrf.mxu0 }
 0x154   :  { %v253_v55 = vadd.f32 %v250_v40, %v241_v52  ;;  %v244_v58 = vadd.f32 %v5512_v54, %v237_v39  ;;  %v270_v1 = vsel %vm260_vm8, %v254_v57, 0.0  ;;  %v5934_v54 = vld [vmem:[%s8052_s6 + $0x94] ss:$24 sps:$4 sm:$0xff]  }
 0x155   :  { %v217_v56 = vpop.f32.mrf.mxu0  ;;  %620 = vmatprep.subr.bf16.mxu1 %v5934_v54 }
 0x156   :  { %v243_v59 = vadd.f32 %v236_v42, %v217_v56  ;;  %v267_v60 = vsel %vm260_vm8, %v253_v55, 0.0  ;;  %v256_v5 = vadd.f32 %v250_v40, %v244_v58  ;;  %v5938_v56 = vld [vmem:[%s8052_s6 + $0x9c] ss:$24 sps:$4 sm:$0xff]  }
 0x157   :  { %268 = vadd.xlane.f32.xlu0 %v267_v60  ;;  %v5515_v61 = vpop.f32.mrf.mxu0  ;;  %693 = vmatprep.subr.bf16.mxu0 %v5938_v56  ;;  %v5940_v58 = vld [vmem:[%s8052_s6 + $0x64] ss:$24 sps:$4 sm:$0xff]   ;;  %v5942_v60 = vld [vmem:[%s8052_s6 + $0x68] ss:$24 sps:$4 sm:$0xff]  }
 0x158   :  { %v255_v62 = vadd.f32 %v250_v40, %v243_v59  ;;  %v246_v2 = vadd.f32 %v5515_v61, %v237_v39  ;;  %v276_v7 = vsel %vm260_vm8, %v256_v5, 0.0  ;;  %v5944_v59 = vld [vmem:[%s8052_s6 + $0x6c] ss:$24 sps:$4 sm:$0xff]   ;;  %v5945_v61 = vld [vmem:[%s8052_s6 + $0x60] ss:$24 sps:$4 sm:$0xff]  }
 0x159   :  { %v227_v63 = vpop.f32.mrf.mxu0 }
 0x15a   :  { %v245_v3 = vadd.f32 %v236_v42, %v227_v63  ;;  %v273_v4 = vsel %vm260_vm8, %v255_v62, 0.0  ;;  %v258_v9 = vadd.f32 %v250_v40, %v246_v2  ;;  %v5950_v63 = vld [vmem:[%s8052_s6 + $0x3c] ss:$24 sps:$4 sm:$0xff]   ;;  %v5951_v2 = vld [vmem:[%s8052_s6 + $0x30] ss:$24 sps:$4 sm:$0xff]  }
 0x15b   :  { %271 = vadd.xlane.f32.xlu0 %v270_v1  ;;  %274 = vadd.xlane.f32.xlu1 %v273_v4  ;;  %v5948_v1 = vld [vmem:[%s8052_s6 + $0x38] ss:$24 sps:$4 sm:$0xff]   ;;  %v5954_v4 = vld [vmem:[%s8052_s6 + $0x8] ss:$24 sps:$4 sm:$0xff]  }
 0x15c   :  { %v257_v6 = vadd.f32 %v250_v40, %v245_v3  ;;  %v282_v10 = vsel %vm260_vm8, %v258_v9, 0.0  ;;  %v5952_v3 = vld [vmem:[%s8052_s6 + $0x4] ss:$24 sps:$4 sm:$0xff]  }
 0x15e   :  { %v279_v8 = vsel %vm260_vm8, %v257_v6, 0.0 }
 0x15f   :  { %277 = vadd.xlane.f32.xlu0 %v276_v7  ;;  %280 = vadd.xlane.f32.xlu1 %v279_v8  ;;  %v5960_v7 = vld [vmem:[%s8052_s6 + $0xa4] ss:$24 sps:$4 sm:$0xff]  }
 0x163   :  { %283 = vadd.xlane.f32.xlu0 %v282_v10 }
 0x1da   :  { %v266_v11 = vpop.xlane.xlu1 %265 }
 0x1db   :  { %v287_v12 = vmul.f32 0.015625, %v266_v11 }
 0x1dc   :  { %v263_v13 = vpop.xlane.xlu0 %262 }
 0x1dd   :  { %v6517_v14 = vsub.f32 %v252_v46, %v287_v12  ;;  %v286_v15 = vmul.f32 0.015625, %v263_v13 }
 0x1df   :  { %v6519_v16 = vsub.f32 %v251_v49, %v286_v15  ;;  %v303_v17 = vmul.f32 %v6517_v14, %v6517_v14 }
 0x1e0   :  { %v269_v18 = vpop.xlane.xlu0 %268 }
 0x1e1   :  { %v288_v19 = vmul.f32 0.015625, %v269_v18  ;;  %v313_v20 = vsel %vm260_vm8, %v303_v17, 0.0  ;;  %v302_v21 = vmul.f32 %v6519_v16, %v6519_v16 }
 0x1e2   :  { %314 = vadd.xlane.f32.xlu0 %v313_v20 }
 0x1e3   :  { %v6526_v22 = vsub.f32 %v253_v55, %v288_v19  ;;  %v310_v23 = vsel %vm260_vm8, %v302_v21, 0.0  ;;  %v5936_v55 = vld [vmem:[%s8052_s6 + $0x98] ss:$24 sps:$4 sm:$0xff]  }
 0x1e4   :  { %v275_v24 = vpop.xlane.xlu1 %274  ;;  %311 = vadd.xlane.f32.xlu1 %v310_v23  ;;  %v272_v25 = vpop.xlane.xlu0 %271  ;;  %694 = vmatpush1.bf16.msra.mxu0 %v5936_v55 }
 0x1e5   :  { %v290_v27 = vmul.f32 0.015625, %v275_v24  ;;  %v289_v28 = vmul.f32 0.015625, %v272_v25  ;;  %v304_v29 = vmul.f32 %v6526_v22, %v6526_v22  ;;  %695 = vmatprep.subr.bf16.mxu0 %v5944_v59 }
 0x1e7   :  { %v6531_v30 = vsub.f32 %v255_v62, %v290_v27  ;;  %v6533_v31 = vsub.f32 %v254_v57, %v289_v28  ;;  %v316_v32 = vsel %vm260_vm8, %v304_v29, 0.0  ;;  %v5939_v57 = vld [vmem:[%s8052_s6 + $0x90] ss:$24 sps:$4 sm:$0xff]   ;;  %v5946_v62 = vld [vmem:[%s8052_s6 + $0x34] ss:$24 sps:$4 sm:$0xff]  }
 0x1e8   :  { %v281_v33 = vpop.xlane.xlu1 %280  ;;  %317 = vadd.xlane.f32.xlu1 %v316_v32  ;;  %v278_v34 = vpop.xlane.xlu0 %277  ;;  %621 = vmatpush1.bf16.msra.mxu1 %v5939_v57  ;;  %v259_v28 = vld [vmem:[%s8053_s5] sm:$0x3]  ;;  %v5963_v57 = vld [vmem:[%s8052_s6 + $0x74] ss:$24 sps:$4 sm:$0xff]  }
 0x1e9   :  { %v292_v35 = vmul.f32 0.015625, %v281_v33  ;;  %v291_v38 = vmul.f32 0.015625, %v278_v34  ;;  %v306_v39 = vmul.f32 %v6531_v30, %v6531_v30  ;;  %v305_v40 = vmul.f32 %v6533_v31, %v6533_v31  ;;  %622 = vmatprep.subr.bf16.mxu1 %v5940_v58  ;;  %696 = vmatpush1.bf16.msra.mxu0 %v5942_v60 }
 0x1ea   :  { %697 = vmatprep.subr.bf16.mxu0 %v5950_v63  ;;  %v6612_v34 = vrot.slane %v259_v28, %v6497_v37  ;;  %v5966_v63 = vld [vmem:[%s8052_s6 + $0x44] ss:$24 sps:$4 sm:$0xff]  }
 0x1eb   :  { %v6540_v41 = vsub.f32 %v257_v6, %v292_v35  ;;  %v6542_v42 = vsub.f32 %v256_v5, %v291_v38  ;;  %v322_v43 = vsel %vm260_vm8, %v306_v39, 0.0  ;;  %v319_v44 = vsel %vm260_vm8, %v305_v40, 0.0  ;;  %v5956_v5 = vld [vmem:[%s8052_s6 + $0xc] ss:$24 sps:$4 sm:$0xff]   ;;  %v5957_v6 = vld [vmem:[%s8052_s6] ss:$24 sps:$4 sm:$0xff]  }
 0x1ec   :  { %323 = vadd.xlane.f32.xlu1 %v322_v43  ;;  %320 = vadd.xlane.f32.xlu0 %v319_v44  ;;  %v284_v45 = vpop.xlane.xlu0 %283  ;;  %v6615_v35 = vsub.s32 1, %v6494_v36 }
 0x1ed   :  { %v293_v46 = vmul.f32 0.015625, %v284_v45  ;;  %v308_v47 = vmul.f32 %v6540_v41, %v6540_v41  ;;  %v307_v48 = vmul.f32 %v6542_v42, %v6542_v42  ;;  %623 = vmatpush1.bf16.msra.mxu1 %v5945_v61  ;;  %698 = vmatpush1.bf16.msra.mxu0 %v5948_v1  ;;  %v5961_v61 = vld [vmem:[%s8052_s6 + $0x70] ss:$24 sps:$4 sm:$0xff]  }
 0x1ee   :  { %624 = vmatprep.subr.bf16.mxu1 %v5946_v62  ;;  %699 = vmatprep.subr.bf16.mxu0 %v5956_v5 }
 0x1ef   :  { %v6550_v49 = vsub.f32 %v258_v9, %v293_v46  ;;  %v328_v50 = vsel %vm260_vm8, %v308_v47, 0.0  ;;  %v325_v51 = vsel %vm260_vm8, %v307_v48, 0.0 }
 0x1f0   :  { %329 = vadd.xlane.f32.xlu1 %v328_v50  ;;  %326 = vadd.xlane.f32.xlu0 %v325_v51  ;;  %v381_v50 = vrot.slane %v259_v28, %v6615_v35 }
 0x1f1   :  { %v309_v52 = vmul.f32 %v6550_v49, %v6550_v49  ;;  %625 = vmatpush1.bf16.msra.mxu1 %v5951_v2  ;;  %700 = vmatpush1.bf16.msra.mxu0 %v5954_v4 }
 0x1f2   :  { %626 = vmatprep.subr.bf16.mxu1 %v5952_v3 }
 0x1f3   :  { %v331_v53 = vsel %vm260_vm8, %v309_v52, 0.0 }
 0x1f4   :  { %332 = vadd.xlane.f32.xlu0 %v331_v53 }
 0x1f5   :  { %627 = vmatpush1.bf16.msra.mxu1 %v5957_v6 }
 0x1f6   :  { %766 = vmatprep.subr.bf16.mxu1 %v5960_v7  ;;  %v5964_v7 = vld [vmem:[%s8052_s6 + $0x40] ss:$24 sps:$4 sm:$0xff]  }
 0x26b   :  { %v315_v8 = vpop.xlane.xlu0 %314 }
 0x26c   :  { %v335_v9 = vmul.f32 0.015625, %v315_v8 }
 0x26d   :  { %v312_v10 = vpop.xlane.xlu1 %311 }
 0x26e   :  { %v343_v11 = vadd.f32 1e-12, %v335_v9  ;;  %v334_v12 = vmul.f32 0.015625, %v312_v10  ;;  %v5969_v9 = vld [vmem:[%s8052_s6 + $0x14] ss:$24 sps:$4 sm:$0xff]  }
 0x270   :  { %6070 = vrsqrt.f32 %v343_v11  ;;  %v342_v13 = vadd.f32 1e-12, %v334_v12  ;;  %v5967_v12 = vld [vmem:[%s8052_s6 + $0x10] ss:$24 sps:$4 sm:$0xff]  }
 0x271   :  { %v318_v15 = vpop.xlane.xlu1 %317 }
 0x272   :  { %6072 = vrsqrt.f32 %v342_v13  ;;  %v336_v17 = vmul.f32 0.015625, %v318_v15 }
 0x274   :  { %v344_v18 = vadd.f32 1e-12, %v336_v17 }
 0x275   :  { %v324_v19 = vpop.xlane.xlu1 %323  ;;  %v321_v20 = vpop.xlane.xlu0 %320 }
 0x276   :  { %6074 = vrsqrt.f32 %v344_v18  ;;  %v338_v21 = vmul.f32 0.015625, %v324_v19  ;;  %v337_v23 = vmul.f32 0.015625, %v321_v20 }
 0x278   :  { %v345_v24 = vadd.f32 1e-12, %v337_v23  ;;  %v346_v25 = vadd.f32 1e-12, %v338_v21  ;;  %v8070_v21 = vmov 0.0   ;;  %v6708_v23 = vsub.s32 2, %v6494_v36 }
 0x279   :  { %v327_v27 = vpop.xlane.xlu0 %326  ;;  %v330_v29 = vpop.xlane.xlu1 %329  ;;  %5516 = vmatprep.subr.bf16.mxu0 %v8070_v21 }
 0x27a   :  { %v339_v32 = vmul.f32 0.015625, %v327_v27  ;;  %6076 = vrsqrt.f32 %v345_v24  ;;  %v340_v39 = vmul.f32 0.015625, %v330_v29  ;;  %8092 = vst [vmem:[#allocation5_spill] sm:$0xff] %v6708_v23  ;;  %v6713_v24 = vld [vmem:[%s8054_s7] sm:$0x3f] }
 0x27b   :  { %6078 = vrsqrt.f32 %v346_v25  ;;  %v461_v28 = vrot.slane %v6713_v24, %v6708_v23 }
 0x27c   :  { %v347_v33 = vadd.f32 1e-12, %v339_v32  ;;  %v348_v51 = vadd.f32 1e-12, %v340_v39 }
 0x27d   :  { %v6071_v38 = vpop.eup %6070  ;;  %v333_v40 = vpop.xlane.xlu0 %332 }
 0x27e   :  { %v341_v43 = vmul.f32 0.015625, %v333_v40  ;;  %v359_v44 = vmul.f32 %v6071_v38, %v6517_v14  ;;  %6080 = vrsqrt.f32 %v347_v33 }
 0x27f   :  { %v6073_v45 = vpop.eup %6072 }
 0x280   :  { %v349_v46 = vadd.f32 1e-12, %v341_v43  ;;  %v358_v47 = vmul.f32 %v6073_v45, %v6519_v16  ;;  %v371_v48 = vmul.f32 %v6612_v34, %v359_v44  ;;  %v5958_v16 = vld [vmem:[%s8052_s6 + $0xa0] ss:$24 sps:$4 sm:$0xff]   ;;  %v453_v45 = vrot.slane %v6713_v24, %v6497_v37 }
 0x282   :  { %v370_v52 = vmul.f32 %v6612_v34, %v358_v47  ;;  %6082 = vrsqrt.f32 %v349_v46  ;;  %v6624_v55 = vadd.f32 %v381_v50, %v371_v48 }
 0x283   :  { %v6075_v53 = vpop.eup %6074  ;;  %6084 = vrsqrt.f32 %v348_v51 }
 0x284   :  { %v6622_v54 = vadd.f32 %v381_v50, %v370_v52  ;;  %v360_v14 = vmul.f32 %v6075_v53, %v6526_v22 }
 0x286   :  { %v420_v56 = vpack.c.bf16 %v6624_v55, %v6622_v54  ;;  %v372_v59 = vmul.f32 %v6612_v34, %v360_v14 }
 0x287   :  { %v6077_v58 = vpop.eup %6076 }
 0x288   :  { %5034 = vmatmul.mubr.msk.bf16.vlgmr.msra.gmra.mxu1 %vm260_vm8, %v420_v56  ;;  %5038 = vmatmul.mubr.msk.bf16.vlgmr.msra.gmra.mxu0 %vm260_vm8, %v420_v56  ;;  %v361_v22 = vmul.f32 %v6077_v58, %v6533_v31  ;;  %v6079_v60 = vpop.eup %6078  ;;  %v6648_v2 = vadd.f32 %v381_v50, %v372_v59 }
 0x289   :  { %654 = vmatprep.mubr.bf16.mxu1 %v8068_v0  ;;  %727 = vmatprep.mubr.bf16.mxu0 %v8068_v0  ;;  %v362_v31 = vmul.f32 %v6079_v60, %v6531_v30 }
 0x28a   :  { %767 = vmatpush1.bf16.msra.mxu1 %v5958_v16  ;;  %v373_v62 = vmul.f32 %v6612_v34, %v361_v22 }
 0x28b   :  { %768 = vmatprep.subr.bf16.mxu1 %v5963_v57  ;;  %v6081_v1 = vpop.eup %6080  ;;  %v374_v30 = vmul.f32 %v6612_v34, %v362_v31 }
 0x28c   :  { %v6650_v3 = vadd.f32 %v381_v50, %v373_v62  ;;  %v363_v4 = vmul.f32 %v6081_v1, %v6542_v42 }
 0x28d   :  { %v6674_v13 = vadd.f32 %v381_v50, %v374_v30 }
 0x28e   :  { %769 = vmatpush1.bf16.msra.mxu1 %v5961_v61  ;;  %v421_v5 = vpack.c.bf16 %v6650_v3, %v6648_v2  ;;  %v375_v6 = vmul.f32 %v6612_v34, %v363_v4 }
 0x28f   :  { %770 = vmatprep.subr.bf16.mxu1 %v5966_v63  ;;  %v6083_v8 = vpop.eup %6082 }
 0x290   :  { %5035 = vmatmul.mubr.msk.bf16.gmra.mxu1 %vm260_vm8, %v421_v5  ;;  %5039 = vmatmul.mubr.msk.bf16.gmra.mxu0 %vm260_vm8, %v421_v5  ;;  %v6085_v42 = vpop.eup %6084  ;;  %v6668_v10 = vadd.f32 %v381_v50, %v375_v6  ;;  %v365_v11 = vmul.f32 %v6083_v8, %v6550_v49 }
 0x291   :  { %664 = vmatprep.mubr.bf16.mxu1 %v8068_v0  ;;  %737 = vmatprep.mubr.bf16.mxu0 %v8068_v0  ;;  %v364_v15 = vmul.f32 %v6085_v42, %v6540_v41 }
 0x292   :  { %8091 = vst [vmem:[#allocation4_spill] sm:$0xff] %v6668_v10  ;;  %771 = vmatpush1.bf16.msra.mxu1 %v5964_v7  ;;  %v422_v17 = vpack.c.bf16 %v6668_v10, %v6674_v13  ;;  %v377_v18 = vmul.f32 %v6612_v34, %v365_v11 }
 0x293   :  { %772 = vmatprep.subr.bf16.mxu1 %v5969_v9  ;;  %v376_v49 = vmul.f32 %v6612_v34, %v364_v15 }
 0x294   :  { %v6685_v19 = vadd.f32 %v381_v50, %v377_v18 }
 0x295   :  { %v6687_v20 = vadd.f32 %v381_v50, %v376_v49 }
 0x296   :  { %773 = vmatpush1.bf16.msra.mxu1 %v5967_v12 }
 0x297   :  { %v423_v41 = vpack.c.bf16 %v6685_v19, %v6687_v20  ;;  %5522 = vmatprep.subr.bf16.mxu1 %v8070_v21 }
 0x298   :  { %5036 = vmatmul.mubr.msk.bf16.gmra.mxu1 %vm260_vm8, %v422_v17  ;;  %5040 = vmatmul.mubr.msk.bf16.gmra.mxu0 %vm260_vm8, %v422_v17 }
 0x299   :  { %674 = vmatprep.mubr.bf16.mxu1 %v8068_v0  ;;  %747 = vmatprep.mubr.bf16.mxu0 %v8068_v0 }
 0x2a0   :  { %5037 = vmatmul.mubr.msk.bf16.gmra.mxu1 %vm260_vm8, %v423_v41  ;;  %5041 = vmatmul.mubr.msk.bf16.gmra.mxu0 %vm260_vm8, %v423_v41 }
 0x2a1   :  { %790 = vmatprep.mubr.bf16.mxu1 %v8068_v0  ;;  %5518 = vmatprep.mubr.msk.bf16.mxu0 %vm6316_vm9, %v8070_v21 }
 0x2a8   :  { %5042 = vmatmul.mubr.msk.bf16.vlgmr.msra.gmra.mxu1 %vm260_vm8, %v420_v56 }
 0x2a9   :  { %800 = vmatprep.mubr.bf16.mxu1 %v8068_v0 }
 0x2b0   :  { %5043 = vmatmul.mubr.msk.bf16.gmra.mxu1 %vm260_vm8, %v421_v5 }
 0x2b1   :  { %810 = vmatprep.mubr.bf16.mxu1 %v8068_v0 }
 0x2b8   :  { %5044 = vmatmul.mubr.msk.bf16.gmra.mxu1 %vm260_vm8, %v422_v17 }
 0x2b9   :  { %820 = vmatprep.mubr.bf16.mxu1 %v8068_v0 }
 0x2c0   :  { %5045 = vmatmul.mubr.msk.bf16.gmra.mxu1 %vm260_vm8, %v423_v41 }
 0x2c1   :  { %5524 = vmatprep.mubr.msk.bf16.mxu1 %vm6316_vm9, %v8070_v21 }
 0x348   :  { %v646_v25 = vpop.f32.mrf.mxu1  ;;  %v719_v27 = vpop.f32.mrf.mxu0 }
 0x349   :  { %v720_v38 = vadd.f32 %v719_v27, %v461_v28  ;;  %v647_v52 = vadd.f32 %v646_v25, %v453_v45 }
 0x34a   :  { %v6717_v29 = vpop.f32.mrf.mxu1  ;;  %v6719_v32 = vpop.f32.mrf.mxu0 }
 0x34c   :  { %v650_v33 = vpop.f32.mrf.mxu1  ;;  %v723_v34 = vpop.f32.mrf.mxu0 }
 0x34d   :  { %v724_v39 = vadd.f32 %v723_v34, %v461_v28  ;;  %v651_v48 = vadd.f32 %v650_v33, %v453_v45  ;;  %v6755_v34 = vsub.s32 4, %v6494_v36 }
 0x34e   :  { %v6721_v40 = vpop.f32.mrf.mxu1  ;;  %v6723_v43 = vpop.f32.mrf.mxu0 }
 0x34f   :  { %v835_v44 = vpack.c.bf16 %v724_v39, %v720_v38  ;;  %v831_v56 = vpack.c.bf16 %v651_v48, %v647_v52  ;;  %8093 = vst [vmem:[#allocation6_spill] sm:$0xff] %v6755_v34 }
 0x350   :  { %v656_v46 = vpop.f32.mrf.mxu1  ;;  %v729_v47 = vpop.f32.mrf.mxu0 }
 0x351   :  { %5517 = vmatpush3.bf16.xpose.msra.mxu0 %v835_v44  ;;  %v730_v16 = vadd.f32 %v729_v47, %v461_v28  ;;  %v657_v31 = vadd.f32 %v656_v46, %v453_v45  ;;  %v469_v47 = vrot.slane %v6713_v24, %v6755_v34 }
 0x352   :  { %5528 = vmatprep.subr.bf16.mxu0 %v8070_v21  ;;  %v6728_v50 = vpop.f32.mrf.mxu1  ;;  %v6730_v51 = vpop.f32.mrf.mxu0 }
 0x354   :  { %v660_v53 = vpop.f32.mrf.mxu1  ;;  %v733_v14 = vpop.f32.mrf.mxu0 }
 0x355   :  { %v734_v57 = vadd.f32 %v733_v14, %v461_v28  ;;  %v661_v62 = vadd.f32 %v660_v53, %v453_v45 }
 0x356   :  { %v6732_v58 = vpop.f32.mrf.mxu1  ;;  %v6734_v22 = vpop.f32.mrf.mxu0 }
 0x357   :  { %v836_v59 = vpack.c.bf16 %v734_v57, %v730_v16  ;;  %v832_v8 = vpack.c.bf16 %v661_v62, %v657_v31 }
 0x358   :  { %5519 = vmatmul.mubr.bf16.vlgmr.msra.gmra.mxu0 %v831_v56  ;;  %v666_v60 = vpop.f32.mrf.mxu1  ;;  %v739_v61 = vpop.f32.mrf.mxu0 }
 0x359   :  { %5530 = vmatprep.mubr.msk.bf16.mxu0 %vm6316_vm9, %v8070_v21  ;;  %5523 = vmatpush3.bf16.xpose.msra.mxu1 %v836_v59  ;;  %v740_v6 = vadd.f32 %v739_v61, %v461_v28  ;;  %v667_v49 = vadd.f32 %v666_v60, %v453_v45 }
 0x35a   :  { %v6738_v63 = vpop.f32.mrf.mxu1  ;;  %v6740_v1 = vpop.f32.mrf.mxu0  ;;  %5534 = vmatprep.subr.bf16.mxu1 %v8070_v21 }
 0x35c   :  { %v670_v4 = vpop.f32.mrf.mxu1  ;;  %v743_v5 = vpop.f32.mrf.mxu0 }
 0x35d   :  { %v744_v7 = vadd.f32 %v743_v5, %v461_v28  ;;  %v671_v15 = vadd.f32 %v670_v4, %v453_v45 }
 0x35e   :  { %v6743_v9 = vpop.f32.mrf.mxu1  ;;  %v6745_v30 = vpop.f32.mrf.mxu0 }
 0x35f   :  { %v837_v42 = vpack.c.bf16 %v744_v7, %v740_v6  ;;  %v833_v38 = vpack.c.bf16 %v671_v15, %v667_v49 }
 0x360   :  { %v676_v11 = vpop.f32.mrf.mxu1  ;;  %v749_v12 = vpop.f32.mrf.mxu0  ;;  %5525 = vmatmul.mubr.bf16.vlgmr.msra.gmra.mxu1 %v832_v8 }
 0x361   :  { %5529 = vmatpush3.bf16.xpose.msra.mxu0 %v837_v42  ;;  %5536 = vmatprep.mubr.msk.bf16.mxu1 %vm6316_vm9, %v8070_v21  ;;  %v750_v27 = vadd.f32 %v749_v12, %v461_v28 }
 0x362   :  { %v6747_v17 = vpop.f32.mrf.mxu1  ;;  %v6749_v18 = vpop.f32.mrf.mxu0  ;;  %5540 = vmatprep.subr.bf16.mxu0 %v8070_v21 }
 0x364   :  { %v680_v41 = vpop.f32.mrf.mxu1  ;;  %v753_v25 = vpop.f32.mrf.mxu0 }
 0x365   :  { %v754_v33 = vadd.f32 %v753_v25, %v461_v28  ;;  %v681_v48 = vadd.f32 %v680_v41, %v453_v45  ;;  %v677_v28 = vadd.f32 %v676_v11, %v453_v45  ;;  %v6774_v45 = vsub.s32 5, %v6494_v36 }
 0x366   :  { %v6757_v39 = vpop.f32.mrf.mxu1 }
 0x367   :  { %v838_v44 = vpack.c.bf16 %v754_v33, %v750_v27  ;;  %v834_v16 = vpack.c.bf16 %v681_v48, %v677_v28  ;;  %8094 = vst [vmem:[#allocation7_spill] sm:$0xff] %v6774_v45  ;;  %v6780_v8 = vrot.slane %v6713_v24, %v6774_v45 }
 0x368   :  { %v792_v46 = vpop.f32.mrf.mxu1  ;;  %5531 = vmatmul.mubr.bf16.vlgmr.msra.gmra.mxu0 %v833_v38 }
 0x369   :  { %5535 = vmatpush3.bf16.xpose.msra.mxu1 %v838_v44  ;;  %5542 = vmatprep.mubr.msk.bf16.mxu0 %vm6316_vm9, %v8070_v21  ;;  %v793_v14 = vadd.f32 %v792_v46, %v469_v47 }
 0x36a   :  { %v6763_v52 = vpop.f32.mrf.mxu1  ;;  %5546 = vmatprep.subr.bf16.mxu1 %v8070_v21 }
 0x36c   :  { %v796_v53 = vpop.f32.mrf.mxu1 }
 0x36d   :  { %v797_v56 = vadd.f32 %v796_v53, %v469_v47 }
 0x36e   :  { %v6766_v57 = vpop.f32.mrf.mxu1 }
 0x36f   :  { %v839_v59 = vpack.c.bf16 %v797_v56, %v793_v14 }
 0x370   :  { %v802_v60 = vpop.f32.mrf.mxu1  ;;  %5537 = vmatmul.mubr.bf16.vlgmr.msra.gmra.mxu1 %v834_v16 }
 0x371   :  { %5541 = vmatpush3.bf16.msra.mxu0 %v839_v59  ;;  %5548 = vmatprep.mubr.msk.bf16.mxu1 %vm6316_vm9, %v8070_v21  ;;  %v803_v31 = vadd.f32 %v802_v60, %v469_v47  ;;  %v390_v60 = vld [vmem:[%s8055_s1] sm:$0xf] }
 0x372   :  { %v6770_v61 = vpop.f32.mrf.mxu1  ;;  %5552 = vmatprep.subr.bf16.mxu0 %v8070_v21 }
 0x374   :  { %v806_v62 = vpop.f32.mrf.mxu1 }
 0x375   :  { %v807_v4 = vadd.f32 %v806_v62, %v469_v47  ;;  %v391_v62 = vcvt.s32.f32 %v390_v60 }
 0x376   :  { %v6776_v5 = vpop.f32.mrf.mxu1 }
 0x377   :  { %v840_v6 = vpack.c.bf16 %v807_v4, %v803_v31  ;;  %v6317_v31 = vmov 1966171168  }
 0x378   :  { %v812_v7 = vpop.f32.mrf.mxu1  ;;  %v396_v4 = vunpack.c.l.s4 %v6317_v31 }
 0x379   :  { %v6782_v42 = vadd.f32 %v812_v7, %v469_v47  ;;  %5547 = vmatpush3.bf16.msra.mxu1 %v840_v6  ;;  %v392_v6 = vsub.f32 1.0, %v391_v62 }
 0x37a   :  { %v814_v11 = vpop.f32.mrf.mxu1  ;;  %5558 = vmatprep.subr.bf16.mxu1 %v8070_v21 }
 0x37b   :  { %v6786_v12 = vadd.f32 %v814_v11, %v6780_v8  ;;  %v393_v7 = vmul.f32 -10000.0, %v392_v6 }
 0x37c   :  { %v816_v15 = vpop.f32.mrf.mxu1 }
 0x37d   :  { %v6788_v49 = vadd.f32 %v816_v15, %v469_v47 }
 0x37e   :  { %v818_v41 = vpop.f32.mrf.mxu1 }
 0x37f   :  { %v6793_v27 = vadd.f32 %v818_v41, %v6780_v8 }
 0x380   :  { %v822_v33 = vpop.f32.mrf.mxu1 }
 0x381   :  { %v6797_v44 = vadd.f32 %v822_v33, %v469_v47  ;;  %v6815_v33 = vpop.f32.mrf.mxu0 }
 0x382   :  { %v824_v46 = vpop.f32.mrf.mxu1 }
 0x383   :  { %v6800_v48 = vadd.f32 %v824_v46, %v6780_v8 }
 0x384   :  { %v826_v28 = vpop.f32.mrf.mxu1 }
 0x385   :  { %v6802_v53 = vadd.f32 %v826_v28, %v469_v47  ;;  %v397_v47 = vunpack.c.0.s8 %v396_v4 }
 0x386   :  { %v828_v14 = vpop.f32.mrf.mxu1 }
 0x387   :  { %v6807_v16 = vadd.f32 %v828_v14, %v6780_v8  ;;  %v400_v11 = vsub.s32 %v397_v47, %v6494_v36 }
 0x389   :  { %v401_v15 = vrot.slane %v393_v7, %v400_v11 }
 0x38b   :  { %v409_v41 = vrot.slane %v401_v15, %v400_v11  ;;  %v402_v14 = vcombine.high %v401_v15, %v401_v15 }
 0x38d   :  { %v6818_v46 = vrot.slane %v409_v41, %v6497_v37  ;;  %v416_v31 = vrot.slane %v402_v14, %v400_v11 }
 0x38f   :  { %v6823_v7 = vrot.slane %v416_v31, %v6497_v37 }
 0x418   :  { %v877_v28 = vpop.f32.mrf.mxu0 }
 0x419   :  { %v1007_v0 = vmul.f32 0.17677669, %v877_v28  ;;  %v417_v28 = vcombine.high %v409_v41, %v409_v41  ;;  %v418_v41 = vcombine.high %v416_v31, %v416_v31 }
 0x41a   :  { %v5520_v59 = vpop.f32.mrf.mxu0 }
 0x41b   :  { %v1035_v60 = vadd.f32 %v6818_v46, %v1007_v0 }
 0x41c   :  { %v880_v38 = vpop.f32.mrf.mxu0 }
 0x41d   :  { %v1043_v62 = vmul.f32 1.442695, %v1035_v60  ;;  %v1008_v4 = vmul.f32 0.17677669, %v880_v38  ;;  %v6828_v60 = vrot.slane %v417_v28, %v6497_v37 }
 0x41e   :  { %v5521_v6 = vpop.f32.mrf.mxu0 }
 0x41f   :  { %6086 = vpow2.f32 %v1043_v62  ;;  %v1036_v47 = vadd.f32 %v6818_v46, %v1008_v4 }
 0x420   :  { %v918_v21 = vpop.f32.mrf.mxu1 }
 0x421   :  { %v1045_v56 = vmul.f32 1.442695, %v1036_v47  ;;  %v1009_v25 = vmul.f32 0.17677669, %v918_v21 }
 0x422   :  { %v5526_v15 = vpop.f32.mrf.mxu1 }
 0x423   :  { %6088 = vpow2.f32 %v1045_v56  ;;  %v1037_v59 = vadd.f32 %v6823_v7, %v1009_v25 }
 0x424   :  { %v921_v0 = vpop.f32.mrf.mxu1 }
 0x425   :  { %v1047_v26 = vmul.f32 1.442695, %v1037_v59  ;;  %v1010_v11 = vmul.f32 0.17677669, %v921_v0 }
 0x426   :  { %v5527_v14 = vpop.f32.mrf.mxu1 }
 0x427   :  { %6090 = vpow2.f32 %v1047_v26  ;;  %v1038_v38 = vadd.f32 %v6823_v7, %v1010_v11  ;;  %v6834_v14 = vrot.slane %v418_v41, %v6497_v37 }
 0x428   :  { %v959_v62 = vpop.f32.mrf.mxu0 }
 0x429   :  { %v1049_v4 = vmul.f32 1.442695, %v1038_v38  ;;  %v1011_v6 = vmul.f32 0.17677669, %v959_v62 }
 0x42a   :  { %v5532_v21 = vpop.f32.mrf.mxu0 }
 0x42b   :  { %6092 = vpow2.f32 %v1049_v4  ;;  %v1039_v25 = vadd.f32 %v6828_v60, %v1011_v6 }
 0x42c   :  { %v6087_v56 = vpop.eup %6086  ;;  %v962_v47 = vpop.f32.mrf.mxu0 }
 0x42d   :  { %v1060_v15 = vsel %vm1059_vm10, %v6087_v56, 0.0  ;;  %v1051_v59 = vmul.f32 1.442695, %v1039_v25  ;;  %v1012_v26 = vmul.f32 0.17677669, %v962_v47 }
 0x42e   :  { %1061 = vadd.xlane.f32.xlu1 %v1060_v15  ;;  %v5533_v0 = vpop.f32.mrf.mxu0 }
 0x42f   :  { %6094 = vpow2.f32 %v1051_v59  ;;  %v1040_v28 = vadd.f32 %v6828_v60, %v1012_v26 }
 0x430   :  { %v6089_v11 = vpop.eup %6088  ;;  %v1000_v38 = vpop.f32.mrf.mxu1 }
 0x431   :  { %v1063_v62 = vsel %vm1059_vm10, %v6089_v11, 0.0  ;;  %v1053_v4 = vmul.f32 1.442695, %v1040_v28  ;;  %v1013_v6 = vmul.f32 0.17677669, %v1000_v38 }
 0x432   :  { %1064 = vadd.xlane.f32.xlu0 %v1063_v62  ;;  %v5538_v31 = vpop.f32.mrf.mxu1 }
 0x433   :  { %6096 = vpow2.f32 %v1053_v4  ;;  %v1041_v21 = vadd.f32 %v6834_v14, %v1013_v6 }
 0x434   :  { %v6091_v25 = vpop.eup %6090  ;;  %v1003_v47 = vpop.f32.mrf.mxu1 }
 0x435   :  { %v1055_v15 = vmul.f32 1.442695, %v1041_v21  ;;  %v1014_v0 = vmul.f32 0.17677669, %v1003_v47  ;;  %v1066_v59 = vsel %vm1059_vm10, %v6091_v25, 0.0 }
 0x436   :  { %1067 = vadd.xlane.f32.xlu1 %v1066_v59  ;;  %v5539_v26 = vpop.f32.mrf.mxu1 }
 0x437   :  { %6098 = vpow2.f32 %v1055_v15  ;;  %v1042_v41 = vadd.f32 %v6834_v14, %v1014_v0 }
 0x438   :  { %v6093_v45 = vpop.eup %6092 }
 0x439   :  { %v1057_v34 = vmul.f32 1.442695, %v1042_v41  ;;  %v1069_v28 = vsel %vm1059_vm10, %v6093_v45, 0.0 }
 0x43a   :  { %1070 = vadd.xlane.f32.xlu0 %v1069_v28 }
 0x43b   :  { %6100 = vpow2.f32 %v1057_v34 }
 0x43c   :  { %v6095_v38 = vpop.eup %6094 }
 0x43d   :  { %v1072_v62 = vsel %vm1059_vm10, %v6095_v38, 0.0 }
 0x43e   :  { %1073 = vadd.xlane.f32.xlu1 %v1072_v62 }
 0x440   :  { %v6097_v4 = vpop.eup %6096 }
 0x441   :  { %v1075_v6 = vsel %vm1059_vm10, %v6097_v4, 0.0 }
 0x442   :  { %1076 = vadd.xlane.f32.xlu0 %v1075_v6 }
 0x444   :  { %v6099_v31 = vpop.eup %6098 }
 0x445   :  { %v1078_v21 = vsel %vm1059_vm10, %v6099_v31, 0.0 }
 0x446   :  { %1079 = vadd.xlane.f32.xlu1 %v1078_v21 }
 0x448   :  { %v6101_v47 = vpop.eup %6100 }
 0x449   :  { %v1081_v15 = vsel %vm1059_vm10, %v6101_v47, 0.0 }
 0x44a   :  { %1082 = vadd.xlane.f32.xlu0 %v1081_v15  ;;  %v8095_v15 = vpack.c.bf16 %v6788_v49, %v6782_v42 }
 0x4b7   :  { %v1062_v0 = vpop.xlane.xlu1 %1061 }
 0x4b8   :  { %6102 = vrcp.f32 %v1062_v0  ;;  %v8096_v0 = vmov 0.0  }
 0x4bb   :  { %v1065_v59 = vpop.xlane.xlu0 %1064 }
 0x4bc   :  { %6104 = vrcp.f32 %v1065_v59 }
 0x4bf   :  { %v1068_v34 = vpop.xlane.xlu1 %1067 }
 0x4c0   :  { %6106 = vrcp.f32 %v1068_v34 }
 0x4c3   :  { %v1071_v26 = vpop.xlane.xlu0 %1070 }
 0x4c4   :  { %6108 = vrcp.f32 %v1071_v26 }
 0x4c5   :  { %v6103_v41 = vpop.eup %6102 }
 0x4c6   :  { %v1092_v6 = vmul.f32 %v6103_v41, %v6087_v56 }
 0x4c7   :  { %v1074_v28 = vpop.xlane.xlu1 %1073 }
 0x4c8   :  { %6110 = vrcp.f32 %v1074_v28  ;;  %v8098_v28 = vpack.c.bf16 %v6802_v53, %v6797_v44 }
 0x4c9   :  { %v6105_v62 = vpop.eup %6104 }
 0x4ca   :  { %v1093_v23 = vmul.f32 %v6105_v62, %v6089_v11 }
 0x4cb   :  { %v1077_v10 = vpop.xlane.xlu0 %1076 }
 0x4cc   :  { %v1100_v21 = vpack.c.bf16 %v1093_v23, %v1092_v6  ;;  %6112 = vrcp.f32 %v1077_v10  ;;  %v6853_v23 = vsub.s32 3, %v6494_v36 }
 0x4cd   :  { %v6107_v59 = vpop.eup %6106 }
 0x4ce   :  { %5543 = vmatmul.mubr.msk.bf16.vlgmr.msra.gmra.mxu0 %vm1059_vm10, %v1100_v21  ;;  %v1094_v56 = vmul.f32 %v6107_v59, %v6091_v25  ;;  %8097 = vst [vmem:[#allocation8_spill] sm:$0xff] %v6853_v23  ;;  %v465_v49 = vrot.slane %v6713_v24, %v6853_v23 }
 0x4cf   :  { %5553 = vmatpush3.bf16.msra.mxu0 %v8095_v15  ;;  %5554 = vmatprep.mubr.msk.bf16.mxu0 %vm6316_vm9, %v8096_v0  ;;  %v1080_v34 = vpop.xlane.xlu1 %1079 }
 0x4d0   :  { %5564 = vmatprep.subr.bf16.mxu0 %v8096_v0  ;;  %6114 = vrcp.f32 %v1080_v34  ;;  %v726_v25 = vadd.f32 %v6723_v43, %v465_v49  ;;  %v722_v21 = vadd.f32 %v6719_v32, %v465_v49  ;;  %v457_v34 = vrot.slane %v6713_v24, %v6615_v35 }
 0x4d1   :  { %v6109_v26 = vpop.eup %6108  ;;  %v746_v32 = vadd.f32 %v6745_v30, %v465_v49  ;;  %v795_v30 = vadd.f32 %v6763_v52, %v6780_v8 }
 0x4d2   :  { %v1095_v11 = vmul.f32 %v6109_v26, %v6093_v45  ;;  %v1304_v59 = vpack.c.bf16 %v726_v25, %v722_v21  ;;  %v653_v53 = vadd.f32 %v6721_v40, %v457_v34  ;;  %v663_v40 = vadd.f32 %v6732_v58, %v457_v34 }
 0x4d3   :  { %v1083_v10 = vpop.xlane.xlu0 %1082  ;;  %v669_v58 = vadd.f32 %v6738_v63, %v457_v34  ;;  %v679_v63 = vadd.f32 %v6747_v17, %v457_v34 }
 0x4d4   :  { %6116 = vrcp.f32 %v1083_v10  ;;  %v1101_v41 = vpack.c.bf16 %v1095_v11, %v1094_v56  ;;  %v732_v56 = vadd.f32 %v6730_v51, %v465_v49  ;;  %v742_v11 = vadd.f32 %v6740_v1, %v465_v49 }
 0x4d5   :  { %v6111_v42 = vpop.eup %6110  ;;  %v799_v51 = vadd.f32 %v6766_v57, %v6780_v8  ;;  %v659_v1 = vadd.f32 %v6728_v50, %v457_v34  ;;  %v683_v57 = vadd.f32 %v6757_v39, %v457_v34  ;;  %v809_v50 = vadd.f32 %v6776_v5, %v6780_v8 }
 0x4d6   :  { %5549 = vmatmul.mubr.msk.bf16.vlgmr.msra.gmra.mxu1 %vm1059_vm10, %v1101_v41  ;;  %v1096_v62 = vmul.f32 %v6111_v42, %v6095_v38  ;;  %v736_v38 = vadd.f32 %v6734_v22, %v465_v49  ;;  %v673_v22 = vadd.f32 %v6743_v9, %v457_v34  ;;  %v752_v9 = vadd.f32 %v6749_v18, %v465_v49 }
 0x4d7   :  { %5559 = vmatpush3.bf16.msra.mxu1 %v8098_v28  ;;  %5560 = vmatprep.mubr.msk.bf16.mxu1 %vm6316_vm9, %v8096_v0  ;;  %v1306_v28 = vpack.c.bf16 %v746_v32, %v742_v11  ;;  %v805_v18 = vadd.f32 %v6770_v61, %v6780_v8  ;;  %v1303_v52 = vpack.c.bf16 %v683_v57, %v679_v63 }
 0x4d8   :  { %5570 = vmatprep.subr.bf16.mxu1 %v8096_v0  ;;  %v1305_v42 = vpack.c.bf16 %v736_v38, %v732_v56 }
 0x4d9   :  { %v6113_v45 = vpop.eup %6112  ;;  %v1309_v39 = vpack.c.bf16 %v809_v50, %v805_v18 }
 0x4da   :  { %v1097_v6 = vmul.f32 %v6113_v45, %v6097_v4  ;;  %v649_v4 = vadd.f32 %v6717_v29, %v457_v34  ;;  %v756_v29 = vadd.f32 %v6815_v33, %v465_v49  ;;  %v1308_v33 = vpack.c.bf16 %v799_v51, %v795_v30 }
 0x4dc   :  { %v1102_v15 = vpack.c.bf16 %v1097_v6, %v1096_v62  ;;  %v1300_v10 = vpack.c.bf16 %v653_v53, %v649_v4  ;;  %v1307_v45 = vpack.c.bf16 %v756_v29, %v752_v9 }
 0x4dd   :  { %v6115_v44 = vpop.eup %6114 }
 0x4de   :  { %5555 = vmatmul.mubr.msk.bf16.vlgmr.msra.gmra.mxu0 %vm1059_vm10, %v1102_v15  ;;  %v1098_v26 = vmul.f32 %v6115_v44, %v6099_v31  ;;  %v1301_v31 = vpack.c.bf16 %v663_v40, %v659_v1 }
 0x4df   :  { %5565 = vmatpush3.bf16.xpose.msra.mxu0 %v1304_v59  ;;  %5566 = vmatprep.mubr.msk.bf16.mxu0 %vm6316_vm9, %v8096_v0 }
 0x4e0   :  { %5576 = vmatprep.subr.bf16.mxu0 %v8096_v0 }
 0x4e1   :  { %v6117_v43 = vpop.eup %6116 }
 0x4e2   :  { %v1099_v24 = vmul.f32 %v6117_v43, %v6101_v47  ;;  %v1302_v47 = vpack.c.bf16 %v673_v22, %v669_v58 }
 0x4e4   :  { %v1103_v41 = vpack.c.bf16 %v1099_v24, %v1098_v26 }
 0x4e6   :  { %5561 = vmatmul.mubr.msk.bf16.vlgmr.msra.gmra.mxu1 %vm1059_vm10, %v1103_v41  ;;  %5567 = vmatmul.mubr.bf16.vlgmr.msra.gmra.mxu0 %v1300_v10 }
 0x4e7   :  { %5571 = vmatpush3.bf16.xpose.msra.mxu1 %v1305_v42  ;;  %5577 = vmatpush3.bf16.xpose.msra.mxu0 %v1306_v28 }
 0x4e8   :  { %5572 = vmatprep.mubr.msk.bf16.mxu1 %vm6316_vm9, %v8096_v0  ;;  %5578 = vmatprep.mubr.msk.bf16.mxu0 %vm6316_vm9, %v8096_v0 }
 0x4e9   :  { %5582 = vmatprep.subr.bf16.mxu1 %v8096_v0  ;;  %5588 = vmatprep.subr.bf16.mxu0 %v8096_v0 }
 0x4ee   :  { %5573 = vmatmul.mubr.bf16.vlgmr.msra.gmra.mxu1 %v1301_v31  ;;  %5579 = vmatmul.mubr.bf16.vlgmr.msra.gmra.mxu0 %v1302_v47 }
 0x4ef   :  { %5583 = vmatpush3.bf16.xpose.msra.mxu1 %v1307_v45  ;;  %5589 = vmatpush3.bf16.msra.mxu0 %v1308_v33 }
 0x4f0   :  { %5584 = vmatprep.mubr.msk.bf16.mxu1 %vm6316_vm9, %v8096_v0  ;;  %5594 = vmatprep.subr.bf16.mxu1 %v8096_v0 }
 0x4f1   :  { %5590 = vmatprep.mubr.msk.bf16.mxu0 %vm6316_vm9, %v8096_v0  ;;  %5600 = vmatprep.subr.bf16.mxu0 %v8096_v0 }
 0x4f6   :  { %5585 = vmatmul.mubr.bf16.vlgmr.msra.gmra.mxu1 %v1303_v52 }
 0x4f7   :  { %5595 = vmatpush3.bf16.msra.mxu1 %v1309_v39  ;;  %5596 = vmatprep.mubr.msk.bf16.mxu1 %vm6316_vm9, %v8096_v0 }
 0x4f8   :  { %5606 = vmatprep.subr.bf16.mxu1 %v8096_v0 }
 0x58e   :  { %v6910_v5 = vpop.f32.mrf.mxu0 }
 0x590   :  { %v5544_v49 = vpop.f32.mrf.mxu0 }
 0x592   :  { %v6912_v25 = vpop.f32.mrf.mxu0 }
 0x593   :  { %v1280_v17 = vpack.c.bf16 %v6912_v25, %v6910_v5  ;;  %v5973_v5 = vld [vmem:[%s8056_s8 + $0x20] sm:$0xff]   ;;  %v5974_v25 = vld [vmem:[%s8056_s8 + $0x18] sm:$0xff]  }
 0x594   :  { %v5545_v62 = vpop.f32.mrf.mxu0 }
 0x596   :  { %v6916_v6 = vpop.f32.mrf.mxu1 }
 0x598   :  { %v5550_v61 = vpop.f32.mrf.mxu1 }
 0x59a   :  { %v6918_v8 = vpop.f32.mrf.mxu1 }
 0x59b   :  { %v1281_v21 = vpack.c.bf16 %v6918_v8, %v6916_v6  ;;  %v5985_v6 = vld [vmem:[%s8056_s8 + $0x40] sm:$0xff]  }
 0x59c   :  { %v5551_v15 = vpop.f32.mrf.mxu1 }
 0x59e   :  { %v6922_v59 = vpop.f32.mrf.mxu0 }
 0x5a0   :  { %v5556_v34 = vpop.f32.mrf.mxu0 }
 0x5a2   :  { %v6924_v44 = vpop.f32.mrf.mxu0 }
 0x5a3   :  { %v1282_v53 = vpack.c.bf16 %v6924_v44, %v6922_v59 }
 0x5a4   :  { %v5557_v43 = vpop.f32.mrf.mxu0 }
 0x5a6   :  { %v6928_v38 = vpop.f32.mrf.mxu1  ;;  %v1346_v32 = vpop.f32.mrf.mxu0 }
 0x5a7   :  { %v1476_v4 = vmul.f32 0.17677669, %v1346_v32 }
 0x5a8   :  { %v5562_v26 = vpop.f32.mrf.mxu1  ;;  %v5568_v24 = vpop.f32.mrf.mxu0 }
 0x5a9   :  { %v1484_v56 = vadd.f32 %v1476_v4, %v6818_v46 }
 0x5aa   :  { %v6931_v11 = vpop.f32.mrf.mxu1  ;;  %v1349_v10 = vpop.f32.mrf.mxu0 }
 0x5ab   :  { %v1492_v41 = vmul.f32 1.442695, %v1484_v56  ;;  %v1283_v42 = vpack.c.bf16 %v6931_v11, %v6928_v38  ;;  %v1477_v28 = vmul.f32 0.17677669, %v1349_v10 }
 0x5ac   :  { %v5563_v40 = vpop.f32.mrf.mxu1  ;;  %v5569_v22 = vpop.f32.mrf.mxu0 }
 0x5ad   :  { %6118 = vpow2.f32 %v1492_v41  ;;  %v1485_v29 = vadd.f32 %v1477_v28, %v6818_v46 }
 0x5ae   :  { %v1387_v51 = vpop.f32.mrf.mxu1  ;;  %v1428_v1 = vpop.f32.mrf.mxu0 }
 0x5af   :  { %v1494_v58 = vmul.f32 1.442695, %v1485_v29  ;;  %v1478_v9 = vmul.f32 0.17677669, %v1387_v51  ;;  %v1480_v30 = vmul.f32 0.17677669, %v1428_v1 }
 0x5b0   :  { %v5574_v31 = vpop.f32.mrf.mxu1  ;;  %v5580_v47 = vpop.f32.mrf.mxu0 }
 0x5b1   :  { %6120 = vpow2.f32 %v1494_v58  ;;  %v1486_v45 = vadd.f32 %v1478_v9, %v6823_v7  ;;  %v1488_v33 = vadd.f32 %v1480_v30, %v6828_v60 }
 0x5b2   :  { %v1390_v57 = vpop.f32.mrf.mxu1  ;;  %v1431_v50 = vpop.f32.mrf.mxu0 }
 0x5b3   :  { %v1496_v63 = vmul.f32 1.442695, %v1486_v45  ;;  %v1500_v18 = vmul.f32 1.442695, %v1488_v33  ;;  %v1479_v52 = vmul.f32 0.17677669, %v1390_v57 }
 0x5b4   :  { %v1481_v39 = vmul.f32 0.17677669, %v1431_v50  ;;  %v5575_v49 = vpop.f32.mrf.mxu1  ;;  %v5581_v62 = vpop.f32.mrf.mxu0 }
 0x5b5   :  { %6122 = vpow2.f32 %v1496_v63  ;;  %v1487_v61 = vadd.f32 %v1479_v52, %v6823_v7 }
 0x5b6   :  { %v1489_v15 = vadd.f32 %v1481_v39, %v6828_v60  ;;  %v1469_v34 = vpop.f32.mrf.mxu1  ;;  %6124 = vpow2.f32 %v1500_v18 }
 0x5b7   :  { %v1498_v43 = vmul.f32 1.442695, %v1487_v61  ;;  %v1482_v32 = vmul.f32 0.17677669, %v1469_v34 }
 0x5b8   :  { %v1502_v4 = vmul.f32 1.442695, %v1489_v15  ;;  %v5586_v26 = vpop.f32.mrf.mxu1 }
 0x5b9   :  { %6126 = vpow2.f32 %v1498_v43  ;;  %v1490_v24 = vadd.f32 %v1482_v32, %v6834_v14 }
 0x5ba   :  { %v6119_v56 = vpop.eup %6118  ;;  %v1472_v10 = vpop.f32.mrf.mxu1  ;;  %6128 = vpow2.f32 %v1502_v4 }
 0x5bb   :  { %v1504_v41 = vmul.f32 1.442695, %v1490_v24  ;;  %v1483_v28 = vmul.f32 0.17677669, %v1472_v10  ;;  %v1508_v40 = vsel %vm1059_vm10, %v6119_v56, 0.0 }
 0x5bc   :  { %1509 = vadd.xlane.f32.xlu1 %v1508_v40  ;;  %v5587_v22 = vpop.f32.mrf.mxu1  ;;  %v5978_v40 = vld [vmem:[%s8056_s8 + $0x78] sm:$0xff]  }
 0x5bd   :  { %6130 = vpow2.f32 %v1504_v41  ;;  %v1491_v29 = vadd.f32 %v1483_v28, %v6834_v14  ;;  %v8099_v22 = vpack.c.bf16 %v6793_v27, %v6786_v12  ;;  %v8100_v12 = vpack.c.bf16 %v6807_v16, %v6800_v48  ;;  %v5971_v48 = vld [vmem:[%s8056_s8 + $0x30] sm:$0xff]   ;;  %v5980_v16 = vld [vmem:[%s8056_s8 + $0x68] sm:$0xff]  }
 0x5be   :  { %v6121_v51 = vpop.eup %6120 }
 0x5bf   :  { %v1506_v1 = vmul.f32 1.442695, %v1491_v29  ;;  %v1511_v58 = vsel %vm1059_vm10, %v6121_v51, 0.0 }
 0x5c0   :  { %1512 = vadd.xlane.f32.xlu0 %v1511_v58 }
 0x5c1   :  { %6132 = vpow2.f32 %v1506_v1 }
 0x5c2   :  { %v6123_v9 = vpop.eup %6122 }
 0x5c3   :  { %v1514_v30 = vsel %vm1059_vm10, %v6123_v9, 0.0  ;;  %v6125_v31 = vpop.eup %6124 }
 0x5c4   :  { %1515 = vadd.xlane.f32.xlu1 %v1514_v30  ;;  %v1520_v45 = vsel %vm1059_vm10, %v6125_v31, 0.0 }
 0x5c6   :  { %v6127_v47 = vpop.eup %6126 }
 0x5c7   :  { %v1517_v33 = vsel %vm1059_vm10, %v6127_v47, 0.0  ;;  %v6129_v57 = vpop.eup %6128 }
 0x5c8   :  { %1521 = vadd.xlane.f32.xlu1 %v1520_v45  ;;  %1518 = vadd.xlane.f32.xlu0 %v1517_v33  ;;  %v1523_v63 = vsel %vm1059_vm10, %v6129_v57, 0.0  ;;  %v5970_v33 = vld [vmem:[%s8056_s8 + $0x38] sm:$0xff]  }
 0x5ca   :  { %v6131_v50 = vpop.eup %6130 }
 0x5cb   :  { %v1526_v18 = vsel %vm1059_vm10, %v6131_v50, 0.0 }
 0x5cc   :  { %1524 = vadd.xlane.f32.xlu0 %v1523_v63  ;;  %1527 = vadd.xlane.f32.xlu1 %v1526_v18 }
 0x5ce   :  { %v6133_v52 = vpop.eup %6132 }
 0x5cf   :  { %v1529_v39 = vsel %vm1059_vm10, %v6133_v52, 0.0 }
 0x5d0   :  { %1530 = vadd.xlane.f32.xlu0 %v1529_v39 }
 0x645   :  { %v1510_v49 = vpop.xlane.xlu1 %1509 }
 0x646   :  { %6134 = vrcp.f32 %v1510_v49 }
 0x649   :  { %v1513_v62 = vpop.xlane.xlu0 %1512 }
 0x64a   :  { %6136 = vrcp.f32 %v1513_v62  ;;  %v5982_v62 = vld [vmem:[%s8056_s8 + $0x58] sm:$0xff]  }
 0x64d   :  { %v1516_v61 = vpop.xlane.xlu1 %1515 }
 0x64e   :  { %6138 = vrcp.f32 %v1516_v61  ;;  %v5976_v61 = vld [vmem:[%s8056_s8 + $0x8] sm:$0xff]  }
 0x651   :  { %v1522_v15 = vpop.xlane.xlu1 %1521  ;;  %v1519_v34 = vpop.xlane.xlu0 %1518 }
 0x652   :  { %6140 = vrcp.f32 %v1519_v34  ;;  %v5983_v34 = vld [vmem:[%s8056_s8 + $0x50] sm:$0xff]  }
 0x653   :  { %6142 = vrcp.f32 %v1522_v15  ;;  %v6135_v43 = vpop.eup %6134  ;;  %v5977_v15 = vld [vmem:[%s8056_s8] sm:$0xff]  }
 0x654   :  { %v1540_v24 = vmul.f32 %v6135_v43, %v6119_v56  ;;  %v5984_v43 = vld [vmem:[%s8056_s8 + $0x48] sm:$0xff]  }
 0x655   :  { %v1525_v32 = vpop.xlane.xlu0 %1524  ;;  %v1528_v4 = vpop.xlane.xlu1 %1527 }
 0x656   :  { %6144 = vrcp.f32 %v1525_v32 }
 0x657   :  { %v6137_v26 = vpop.eup %6136  ;;  %6146 = vrcp.f32 %v1528_v4 }
 0x658   :  { %v1541_v10 = vmul.f32 %v6137_v26, %v6121_v51 }
 0x659   :  { %v1531_v41 = vpop.xlane.xlu0 %1530 }
 0x65a   :  { %6148 = vrcp.f32 %v1531_v41  ;;  %v1548_v28 = vpack.c.bf16 %v1541_v10, %v1540_v24 }
 0x65b   :  { %v6139_v29 = vpop.eup %6138 }
 0x65c   :  { %5591 = vmatmul.mubr.msk.bf16.vlgmr.msra.gmra.mxu0 %vm1059_vm10, %v1548_v28  ;;  %v1542_v1 = vmul.f32 %v6139_v29, %v6123_v9  ;;  %v5979_v9 = vld [vmem:[%s8056_s8 + $0x70] sm:$0xff]  }
 0x65d   :  { %5601 = vmatpush3.bf16.msra.mxu0 %v8099_v22  ;;  %5602 = vmatprep.mubr.msk.bf16.mxu0 %vm6316_vm9, %v8096_v0 }
 0x65e   :  { %5612 = vmatprep.subr.bf16.mxu0 %v5978_v40 }
 0x65f   :  { %v6141_v56 = vpop.eup %6140 }
 0x660   :  { %v6143_v51 = vpop.eup %6142  ;;  %v1543_v58 = vmul.f32 %v6141_v56, %v6127_v47 }
 0x661   :  { %v1544_v63 = vmul.f32 %v6143_v51, %v6125_v31 }
 0x662   :  { %v1549_v45 = vpack.c.bf16 %v1543_v58, %v1542_v1 }
 0x663   :  { %v6145_v30 = vpop.eup %6144 }
 0x664   :  { %v1545_v18 = vmul.f32 %v6145_v30, %v6129_v57  ;;  %v6147_v39 = vpop.eup %6146  ;;  %5597 = vmatmul.mubr.msk.bf16.vlgmr.msra.gmra.mxu1 %vm1059_vm10, %v1549_v45 }
 0x665   :  { %5607 = vmatpush3.bf16.msra.mxu1 %v8100_v12  ;;  %5608 = vmatprep.mubr.msk.bf16.mxu1 %vm6316_vm9, %v8096_v0  ;;  %v1546_v31 = vmul.f32 %v6147_v39, %v6131_v50  ;;  %v5981_v50 = vld [vmem:[%s8056_s8 + $0x60] sm:$0xff]  }
 0x666   :  { %v1550_v27 = vpack.c.bf16 %v1545_v18, %v1544_v63  ;;  %5636 = vmatprep.subr.bf16.mxu1 %v5970_v33  ;;  %v7027_v18 = vld [vmem:[%s8057_s11] sm:$0x3f] }
 0x667   :  { %v6149_v47 = vpop.eup %6148 }
 0x668   :  { %5603 = vmatmul.mubr.msk.bf16.vlgmr.msra.gmra.mxu0 %vm1059_vm10, %v1550_v27  ;;  %v1547_v57 = vmul.f32 %v6149_v47, %v6133_v52  ;;  %v5972_v52 = vld [vmem:[%s8056_s8 + $0x28] sm:$0xff]  }
 0x669   :  { %5613 = vmatpush3.bf16.msra.mxu0 %v5978_v40 }
 0x66a   :  { %v1551_v49 = vpack.c.bf16 %v1547_v57, %v1546_v31  ;;  %5614 = vmatprep.subr.bf16.mxu0 %v5979_v9  ;;  %v1986_v31 = vrot.slane %v7027_v18, %v6497_v37 }
 0x66c   :  { %5609 = vmatmul.mubr.msk.bf16.vlgmr.msra.gmra.mxu1 %vm1059_vm10, %v1551_v49 }
 0x66d   :  { %5615 = vmatpush3.bf16.msra.mxu0 %v5979_v9  ;;  %5637 = vmatpush3.bf16.msra.mxu1 %v5970_v33 }
 0x66e   :  { %5652 = vmatprep.mubr.bf16.mxu1 %v1280_v17  ;;  %5638 = vmatprep.subr.bf16.mxu1 %v5971_v48  ;;  %v5975_v17 = vld [vmem:[%s8056_s8 + $0x10] sm:$0xff]  }
 0x66f   :  { %5616 = vmatprep.subr.bf16.mxu0 %v5980_v16 }
 0x671   :  { %5617 = vmatpush3.bf16.msra.mxu0 %v5980_v16  ;;  %5639 = vmatpush3.bf16.msra.mxu1 %v5971_v48 }
 0x672   :  { %5618 = vmatprep.subr.bf16.mxu0 %v5981_v50  ;;  %5640 = vmatprep.subr.bf16.mxu1 %v5972_v52 }
 0x675   :  { %5619 = vmatpush3.bf16.msra.mxu0 %v5981_v50  ;;  %5641 = vmatpush3.bf16.msra.mxu1 %v5972_v52 }
 0x676   :  { %5620 = vmatprep.subr.bf16.mxu0 %v5982_v62  ;;  %5642 = vmatprep.subr.bf16.mxu1 %v5973_v5 }
 0x679   :  { %5621 = vmatpush3.bf16.msra.mxu0 %v5982_v62  ;;  %5643 = vmatpush3.bf16.msra.mxu1 %v5973_v5 }
 0x67a   :  { %5644 = vmatprep.subr.bf16.mxu1 %v5974_v25  ;;  %5622 = vmatprep.subr.bf16.mxu0 %v5983_v34 }
 0x67d   :  { %5645 = vmatpush3.bf16.msra.mxu1 %v5974_v25  ;;  %5623 = vmatpush3.bf16.msra.mxu0 %v5983_v34 }
 0x67e   :  { %5646 = vmatprep.subr.bf16.mxu1 %v5975_v17  ;;  %5624 = vmatprep.subr.bf16.mxu0 %v5984_v43 }
 0x681   :  { %5647 = vmatpush3.bf16.msra.mxu1 %v5975_v17  ;;  %5625 = vmatpush3.bf16.msra.mxu0 %v5984_v43 }
 0x682   :  { %5648 = vmatprep.subr.bf16.mxu1 %v5976_v61  ;;  %5626 = vmatprep.subr.bf16.mxu0 %v5985_v6 }
 0x685   :  { %5649 = vmatpush3.bf16.msra.mxu1 %v5976_v61  ;;  %5627 = vmatpush3.bf16.msra.mxu0 %v5985_v6 }
 0x686   :  { %5650 = vmatprep.subr.bf16.mxu1 %v5977_v15 }
 0x689   :  { %5651 = vmatpush3.bf16.msra.mxu1 %v5977_v15 }
 0x68c   :  { %5653 = vmatmul.mubr.bf16.vlgmr.msra.gmra.mxu1 %v1281_v21 }
 0x68d   :  { %5656 = vmatprep.mubr.bf16.mxu1 %v1282_v53 }
 0x694   :  { %5657 = vmatmul.mubr.bf16.gmra.mxu1 %v1283_v42 }
 0x71c   :  { %v1589_v8 = vpop.f32.mrf.mxu0 }
 0x71e   :  { %v5592_v21 = vpop.f32.mrf.mxu0 }
 0x720   :  { %v1592_v59 = vpop.f32.mrf.mxu0 }
 0x721   :  { %v1728_v44 = vpack.c.bf16 %v1592_v59, %v1589_v8 }
 0x722   :  { %v5593_v53 = vpop.f32.mrf.mxu0 }
 0x723   :  { %5628 = vmatprep.mubr.bf16.mxu0 %v1728_v44 }
 0x724   :  { %v1633_v38 = vpop.f32.mrf.mxu1 }
 0x726   :  { %v5598_v11 = vpop.f32.mrf.mxu1 }
 0x728   :  { %v1677_v42 = vpop.f32.mrf.mxu0  ;;  %v1636_v32 = vpop.f32.mrf.mxu1 }
 0x729   :  { %v1729_v4 = vpack.c.bf16 %v1636_v32, %v1633_v38 }
 0x72a   :  { %v5604_v26 = vpop.f32.mrf.mxu0  ;;  %v5599_v24 = vpop.f32.mrf.mxu1 }
 0x72b   :  { %5629 = vmatmul.mubr.bf16.vlgmr.msra.gmra.mxu0 %v1729_v4  ;;  %v8101_v26 = vld [vmem:[#allocation4_spill] sm:$0xff] }
 0x72c   :  { %v1680_v10 = vpop.f32.mrf.mxu0  ;;  %v1721_v28 = vpop.f32.mrf.mxu1 }
 0x72d   :  { %v1730_v41 = vpack.c.bf16 %v1680_v10, %v1677_v42 }
 0x72e   :  { %v5605_v40 = vpop.f32.mrf.mxu0  ;;  %v5610_v22 = vpop.f32.mrf.mxu1 }
 0x72f   :  { %5632 = vmatprep.mubr.bf16.mxu0 %v1730_v41 }
 0x730   :  { %v1724_v29 = vpop.f32.mrf.mxu1 }
 0x731   :  { %v1731_v56 = vpack.c.bf16 %v1724_v29, %v1721_v28 }
 0x732   :  { %v5611_v51 = vpop.f32.mrf.mxu1 }
 0x733   :  { %5633 = vmatmul.mubr.bf16.gmra.mxu0 %v1731_v56 }
 0x74c   :  { %v5654_v1 = vpop.f32.mrf.mxu1 }
 0x74e   :  { %v1944_v58 = vpop.f32.mrf.mxu1 }
 0x750   :  { %v5655_v30 = vpop.f32.mrf.mxu1 }
 0x752   :  { %v1947_v45 = vpop.f32.mrf.mxu1 }
 0x754   :  { %v5658_v39 = vpop.f32.mrf.mxu1 }
 0x756   :  { %v1960_v48 = vpop.f32.mrf.mxu1 }
 0x758   :  { %v5659_v15 = vpop.f32.mrf.mxu1 }
 0x7eb   :  { %v5630_v33 = vpop.f32.mrf.mxu0 }
 0x7ec   :  { %v1953_v63 = vadd.f32 %v5654_v1, %v5630_v33 }
 0x7ed   :  { %v1831_v12 = vpop.f32.mrf.mxu0 }
 0x7ee   :  { %v1945_v27 = vadd.f32 %v1944_v58, %v1831_v12  ;;  %v1977_v9 = vadd.f32 %v1953_v63, %v6648_v2 }
 0x7ef   :  { %v5631_v47 = vpop.f32.mrf.mxu0 }
 0x7f0   :  { %v1975_v57 = vadd.f32 %v1945_v27, %v6622_v54  ;;  %v1956_v49 = vadd.f32 %v5655_v30, %v5631_v47  ;;  %v1989_v25 = vadd.f32 %v1986_v31, %v1977_v9 }
 0x7f1   :  { %v1834_v16 = vpop.f32.mrf.mxu0 }
 0x7f2   :  { %v1948_v50 = vadd.f32 %v1947_v45, %v1834_v16  ;;  %v1987_v52 = vadd.f32 %v1986_v31, %v1975_v57  ;;  %v1978_v62 = vadd.f32 %v1956_v49, %v6650_v3  ;;  %v2001_v8 = vsel %vm260_vm8, %v1989_v25, 0.0 }
 0x7f3   :  { %v5634_v5 = vpop.f32.mrf.mxu0 }
 0x7f4   :  { %v1976_v17 = vadd.f32 %v1948_v50, %v6624_v55  ;;  %v1969_v61 = vadd.f32 %v5658_v39, %v5634_v5  ;;  %v1995_v2 = vsel %vm260_vm8, %v1987_v52, 0.0  ;;  %v1990_v21 = vadd.f32 %v1986_v31, %v1978_v62  ;;  %v1963_v55 = vpop.f32.mrf.mxu1 }
 0x7f5   :  { %v1847_v34 = vpop.f32.mrf.mxu0  ;;  %1996 = vadd.xlane.f32.xlu1 %v1995_v2 }
 0x7f6   :  { %v1961_v43 = vadd.f32 %v1960_v48, %v1847_v34  ;;  %v1988_v6 = vadd.f32 %v1986_v31, %v1976_v17  ;;  %v1981_v59 = vadd.f32 %v1969_v61, %v6687_v20  ;;  %v2004_v32 = vsel %vm260_vm8, %v1990_v21, 0.0 }
 0x7f7   :  { %v5635_v54 = vpop.f32.mrf.mxu0 }
 0x7f8   :  { %v1979_v3 = vadd.f32 %v1961_v43, %v6674_v13  ;;  %v1972_v44 = vadd.f32 %v5659_v15, %v5635_v54  ;;  %v1998_v53 = vsel %vm260_vm8, %v1988_v6, 0.0  ;;  %v1993_v20 = vadd.f32 %v1986_v31, %v1981_v59 }
 0x7f9   :  { %v1850_v38 = vpop.f32.mrf.mxu0  ;;  %1999 = vadd.xlane.f32.xlu0 %v1998_v53  ;;  %2002 = vadd.xlane.f32.xlu1 %v2001_v8 }
 0x7fa   :  { %v1964_v11 = vadd.f32 %v1963_v55, %v1850_v38  ;;  %v1991_v42 = vadd.f32 %v1986_v31, %v1979_v3  ;;  %v1982_v4 = vadd.f32 %v1972_v44, %v6685_v19  ;;  %v2013_v28 = vsel %vm260_vm8, %v1993_v20, 0.0  ;;  %v5986_v38 = vld [vmem:[%s8058_s9 + $0x18] sm:$0xff]  }
 0x7fb   :  { %5660 = vmatprep.subr.bf16.mxu0 %v5986_v38 }
 0x7fc   :  { %v1980_v24 = vadd.f32 %v1964_v11, %v8101_v26  ;;  %v2007_v10 = vsel %vm260_vm8, %v1991_v42, 0.0  ;;  %v1994_v40 = vadd.f32 %v1986_v31, %v1982_v4  ;;  %5661 = vmatpush3.bf16.msra.mxu0 %v5986_v38  ;;  %v5987_v11 = vld [vmem:[%s8058_s9 + $0x10] sm:$0xff]  }
 0x7fd   :  { %2005 = vadd.xlane.f32.xlu0 %v2004_v32  ;;  %2008 = vadd.xlane.f32.xlu1 %v2007_v10  ;;  %v5989_v32 = vld [vmem:[%s8058_s9] sm:$0xff]  }
 0x7fe   :  { %v1992_v13 = vadd.f32 %v1986_v31, %v1980_v24  ;;  %v2016_v22 = vsel %vm260_vm8, %v1994_v40, 0.0  ;;  %5662 = vmatprep.subr.bf16.mxu0 %v5987_v11 }
 0x800   :  { %v2010_v41 = vsel %vm260_vm8, %v1992_v13, 0.0  ;;  %5663 = vmatpush3.bf16.msra.mxu0 %v5987_v11 }
 0x801   :  { %2011 = vadd.xlane.f32.xlu0 %v2010_v41  ;;  %2014 = vadd.xlane.f32.xlu1 %v2013_v28 }
 0x805   :  { %2017 = vadd.xlane.f32.xlu0 %v2016_v22 }
 0x87e   :  { %v1997_v29 = vpop.xlane.xlu1 %1996 }
 0x87f   :  { %v2019_v19 = vmul.f32 0.015625, %v1997_v29 }
 0x881   :  { %v7047_v56 = vsub.f32 %v1987_v52, %v2019_v19 }
 0x882   :  { %v2000_v51 = vpop.xlane.xlu0 %1999  ;;  %v2003_v1 = vpop.xlane.xlu1 %2002 }
 0x883   :  { %v2020_v58 = vmul.f32 0.015625, %v2000_v51  ;;  %v2021_v30 = vmul.f32 0.015625, %v2003_v1  ;;  %v2035_v45 = vmul.f32 %v7047_v56, %v7047_v56 }
 0x885   :  { %v7051_v33 = vsub.f32 %v1988_v6, %v2020_v58  ;;  %v7053_v63 = vsub.f32 %v1989_v25, %v2021_v30  ;;  %v2043_v39 = vsel %vm260_vm8, %v2035_v45, 0.0 }
 0x886   :  { %v2006_v12 = vpop.xlane.xlu0 %2005  ;;  %2044 = vadd.xlane.f32.xlu1 %v2043_v39  ;;  %v2009_v27 = vpop.xlane.xlu1 %2008 }
 0x887   :  { %v2022_v9 = vmul.f32 0.015625, %v2006_v12  ;;  %v2023_v47 = vmul.f32 0.015625, %v2009_v27  ;;  %v2036_v31 = vmul.f32 %v7051_v33, %v7051_v33  ;;  %v2037_v57 = vmul.f32 %v7053_v63, %v7053_v63 }
 0x889   :  { %v7060_v49 = vsub.f32 %v1990_v21, %v2022_v9  ;;  %v7062_v48 = vsub.f32 %v1991_v42, %v2023_v47  ;;  %v2046_v16 = vsel %vm260_vm8, %v2036_v31, 0.0  ;;  %v2049_v50 = vsel %vm260_vm8, %v2037_v57, 0.0  ;;  %v5988_v42 = vld [vmem:[%s8058_s9 + $0x8] sm:$0xff]  }
 0x88a   :  { %2047 = vadd.xlane.f32.xlu0 %v2046_v16  ;;  %v2012_v52 = vpop.xlane.xlu0 %2011  ;;  %2050 = vadd.xlane.f32.xlu1 %v2049_v50  ;;  %v2015_v62 = vpop.xlane.xlu1 %2014  ;;  %v2102_v16 = vrot.slane %v7027_v18, %v6615_v35 }
 0x88b   :  { %v2024_v5 = vmul.f32 0.015625, %v2012_v52  ;;  %v2025_v25 = vmul.f32 0.015625, %v2015_v62  ;;  %v2038_v17 = vmul.f32 %v7060_v49, %v7060_v49  ;;  %v2039_v61 = vmul.f32 %v7062_v48, %v7062_v48  ;;  %5664 = vmatprep.subr.bf16.mxu0 %v5988_v42 }
 0x88c   :  { %5665 = vmatpush3.bf16.msra.mxu0 %v5988_v42 }
 0x88d   :  { %v7070_v2 = vsub.f32 %v1992_v13, %v2024_v5  ;;  %v7072_v15 = vsub.f32 %v1993_v20, %v2025_v25  ;;  %v2052_v34 = vsel %vm260_vm8, %v2038_v17, 0.0  ;;  %v2055_v43 = vsel %vm260_vm8, %v2039_v61, 0.0  ;;  %5666 = vmatprep.subr.bf16.mxu0 %v5989_v32  ;;  %v8102_v61 = vld [vmem:[#allocation5_spill] sm:$0xff] }
 0x88e   :  { %2053 = vadd.xlane.f32.xlu0 %v2052_v34  ;;  %v2018_v6 = vpop.xlane.xlu0 %2017  ;;  %2056 = vadd.xlane.f32.xlu1 %v2055_v43  ;;  %v2114_v34 = vrot.slane %v7027_v18, %v8102_v61 }
 0x88f   :  { %v2026_v54 = vmul.f32 0.015625, %v2018_v6  ;;  %v2040_v8 = vmul.f32 %v7070_v2, %v7070_v2  ;;  %v2041_v21 = vmul.f32 %v7072_v15, %v7072_v15 }
 0x890   :  { %5667 = vmatpush3.bf16.msra.mxu0 %v5989_v32 }
 0x891   :  { %v7080_v59 = vsub.f32 %v1994_v40, %v2026_v54  ;;  %v2058_v3 = vsel %vm260_vm8, %v2040_v8, 0.0  ;;  %v2061_v44 = vsel %vm260_vm8, %v2041_v21, 0.0 }
 0x892   :  { %2059 = vadd.xlane.f32.xlu0 %v2058_v3  ;;  %2062 = vadd.xlane.f32.xlu1 %v2061_v44 }
 0x893   :  { %v2042_v53 = vmul.f32 %v7080_v59, %v7080_v59 }
 0x895   :  { %v2064_v55 = vsel %vm260_vm8, %v2042_v53, 0.0 }
 0x896   :  { %2065 = vadd.xlane.f32.xlu0 %v2064_v55 }
 0x90f   :  { %v2045_v4 = vpop.xlane.xlu1 %2044 }
 0x910   :  { %v2067_v26 = vmul.f32 0.015625, %v2045_v4 }
 0x912   :  { %v2075_v24 = vadd.f32 1e-12, %v2067_v26 }
 0x913   :  { %v2048_v10 = vpop.xlane.xlu0 %2047  ;;  %v2051_v20 = vpop.xlane.xlu1 %2050 }
 0x914   :  { %6150 = vrsqrt.f32 %v2075_v24  ;;  %v2068_v13 = vmul.f32 0.015625, %v2048_v10  ;;  %v2069_v41 = vmul.f32 0.015625, %v2051_v20 }
 0x916   :  { %v2076_v28 = vadd.f32 1e-12, %v2068_v13  ;;  %v2077_v40 = vadd.f32 1e-12, %v2069_v41 }
 0x917   :  { %v2054_v22 = vpop.xlane.xlu0 %2053  ;;  %v2057_v29 = vpop.xlane.xlu1 %2056 }
 0x918   :  { %6152 = vrsqrt.f32 %v2076_v28  ;;  %v2070_v19 = vmul.f32 0.015625, %v2054_v22  ;;  %v2071_v51 = vmul.f32 0.015625, %v2057_v29  ;;  %v8103_v29 = vmov 0  }
 0x919   :  { %6154 = vrsqrt.f32 %v2077_v40 }
 0x91a   :  { %v2078_v1 = vadd.f32 1e-12, %v2070_v19  ;;  %v2079_v58 = vadd.f32 1e-12, %v2071_v51  ;;  %v5991_v19 = vld [vmem:[%s8059_s10 + $0x30] sm:$0xff]   ;;  %v5992_v51 = vld [vmem:[%s8059_s10 + $0x28] sm:$0xff]  }
 0x91b   :  { %v2060_v30 = vpop.xlane.xlu0 %2059  ;;  %v2063_v45 = vpop.xlane.xlu1 %2062 }
 0x91c   :  { %6156 = vrsqrt.f32 %v2078_v1  ;;  %v2072_v39 = vmul.f32 0.015625, %v2060_v30  ;;  %v2073_v12 = vmul.f32 0.015625, %v2063_v45  ;;  %v5993_v1 = vld [vmem:[%s8059_s10 + $0x20] sm:$0xff]   ;;  %v5995_v30 = vld [vmem:[%s8059_s10 + $0x10] sm:$0xff]   ;;  %v5996_v45 = vld [vmem:[%s8059_s10 + $0x8] sm:$0xff]  }
 0x91d   :  { %6158 = vrsqrt.f32 %v2079_v58  ;;  %v5994_v58 = vld [vmem:[%s8059_s10 + $0x18] sm:$0xff]  }
 0x91e   :  { %v2080_v27 = vadd.f32 1e-12, %v2072_v39  ;;  %v2081_v9 = vadd.f32 1e-12, %v2073_v12  ;;  %v5997_v39 = vld [vmem:[%s8059_s10] sm:$0xff]  }
 0x91f   :  { %v2066_v47 = vpop.xlane.xlu0 %2065  ;;  %v5086_v12 = vld [vmem:[%s8060_s12] ss:$0 sm:$0xff] }
 0x920   :  { %6160 = vrsqrt.f32 %v2080_v27  ;;  %v2074_v31 = vmul.f32 0.015625, %v2066_v47 }
 0x921   :  { %v6151_v57 = vpop.eup %6150  ;;  %6162 = vrsqrt.f32 %v2081_v9 }
 0x922   :  { %v2082_v50 = vadd.f32 1e-12, %v2074_v31  ;;  %v2091_v52 = vmul.f32 %v6151_v57, %v7047_v56 }
 0x924   :  { %6164 = vrsqrt.f32 %v2082_v50  ;;  %v2103_v17 = vmul.f32 %v2102_v16, %v2091_v52 }
 0x925   :  { %v6153_v62 = vpop.eup %6152 }
 0x926   :  { %v6155_v5 = vpop.eup %6154  ;;  %v2092_v25 = vmul.f32 %v6153_v62, %v7051_v33  ;;  %v7107_v44 = vadd.f32 %v2114_v34, %v2103_v17 }
 0x927   :  { %v2093_v43 = vmul.f32 %v6155_v5, %v7053_v63 }
 0x928   :  { %v2104_v6 = vmul.f32 %v2102_v16, %v2092_v25 }
 0x929   :  { %v6157_v54 = vpop.eup %6156  ;;  %v2105_v21 = vmul.f32 %v2102_v16, %v2093_v43 }
 0x92a   :  { %v6159_v8 = vpop.eup %6158  ;;  %v2094_v3 = vmul.f32 %v6157_v54, %v7060_v49  ;;  %v7109_v56 = vadd.f32 %v2114_v34, %v2104_v6 }
 0x92b   :  { %v2095_v53 = vmul.f32 %v6159_v8, %v7062_v48  ;;  %v7115_v63 = vadd.f32 %v2114_v34, %v2105_v21 }
 0x92c   :  { %v2106_v55 = vmul.f32 %v2102_v16, %v2094_v3  ;;  %v2123_v33 = vpack.c.bf16 %v7109_v56, %v7107_v44 }
 0x92d   :  { %v6161_v38 = vpop.eup %6160  ;;  %v2107_v32 = vmul.f32 %v2102_v16, %v2095_v53 }
 0x92e   :  { %v6163_v11 = vpop.eup %6162  ;;  %5668 = vmatprep.mubr.msk.bf16.mxu0 %vm260_vm8, %v2123_v33  ;;  %v7117_v42 = vadd.f32 %v2114_v34, %v2106_v55  ;;  %v2096_v49 = vmul.f32 %v6161_v38, %v7070_v2 }
 0x92f   :  { %v2097_v4 = vmul.f32 %v6163_v11, %v7072_v15  ;;  %v7124_v10 = vadd.f32 %v2114_v34, %v2107_v32 }
 0x930   :  { %v2124_v48 = vpack.c.bf16 %v7117_v42, %v7115_v63  ;;  %v2108_v26 = vmul.f32 %v2102_v16, %v2096_v49 }
 0x931   :  { %v6165_v24 = vpop.eup %6164  ;;  %v2109_v41 = vmul.f32 %v2102_v16, %v2097_v4 }
 0x932   :  { %5669 = vmatmul.mubr.msk.bf16.vlgmr.msra.gmra.mxu0 %vm260_vm8, %v2124_v48  ;;  %v7126_v20 = vadd.f32 %v2114_v34, %v2108_v26  ;;  %v2098_v13 = vmul.f32 %v6165_v24, %v7080_v59  ;;  %v5990_v59 = vld [vmem:[%s8059_s10 + $0x38] sm:$0xff]  }
 0x933   :  { %v7132_v15 = vadd.f32 %v2114_v34, %v2109_v41  ;;  %5676 = vmatprep.subr.bf16.mxu1 %v5990_v59 }
 0x934   :  { %v2125_v2 = vpack.c.bf16 %v7126_v20, %v7124_v10  ;;  %v2110_v28 = vmul.f32 %v2102_v16, %v2098_v13  ;;  %5677 = vmatpush3.bf16.msra.mxu1 %v5990_v59 }
 0x935   :  { %5678 = vmatprep.subr.bf16.mxu1 %v5991_v19 }
 0x936   :  { %5672 = vmatprep.mubr.msk.bf16.mxu0 %vm260_vm8, %v2125_v2  ;;  %v7134_v40 = vadd.f32 %v2114_v34, %v2110_v28 }
 0x938   :  { %v2126_v22 = vpack.c.bf16 %v7134_v40, %v7132_v15  ;;  %5679 = vmatpush3.bf16.msra.mxu1 %v5991_v19 }
 0x939   :  { %5680 = vmatprep.subr.bf16.mxu1 %v5992_v51 }
 0x93a   :  { %5673 = vmatmul.mubr.msk.bf16.gmra.mxu0 %vm260_vm8, %v2126_v22 }
 0x93b   :  { %2816 = vmatprep.mubr.bf16.mxu0 %v8103_v29 }
 0x93c   :  { %5681 = vmatpush3.bf16.msra.mxu1 %v5992_v51 }
 0x93d   :  { %5682 = vmatprep.subr.bf16.mxu1 %v5993_v1 }
 0x940   :  { %5683 = vmatpush3.bf16.msra.mxu1 %v5993_v1 }
 0x941   :  { %5684 = vmatprep.subr.bf16.mxu1 %v5994_v58 }
 0x944   :  { %5685 = vmatpush3.bf16.msra.mxu1 %v5994_v58 }
 0x945   :  { %5686 = vmatprep.subr.bf16.mxu1 %v5995_v30 }
 0x948   :  { %5687 = vmatpush3.bf16.msra.mxu1 %v5995_v30 }
 0x949   :  { %5688 = vmatprep.subr.bf16.mxu1 %v5996_v45 }
 0x94c   :  { %5689 = vmatpush3.bf16.msra.mxu1 %v5996_v45 }
 0x94d   :  { %5690 = vmatprep.subr.bf16.mxu1 %v5997_v39 }
 0x950   :  { %5691 = vmatpush3.bf16.msra.mxu1 %v5997_v39 }
 0x9f2   :  { %v5670_v27 = vpop.f32.mrf.mxu0 }
 0x9f3   :  { %v7167_v9 = vadd.f32 %v5670_v27, %v5086_v12 }
 0x9f4   :  { %v2212_v47 = vpop.f32.mrf.mxu0 }
 0x9f5   :  { %v2253_v31 = vmul.f32 0.044715, %v7167_v9  ;;  %v7170_v57 = vadd.f32 %v5086_v12, %v2212_v47 }
 0x9f6   :  { %v5671_v16 = vpop.f32.mrf.mxu0 }
 0x9f7   :  { %v2261_v50 = vmul.f32 %v2253_v31, %v7167_v9  ;;  %v2251_v52 = vmul.f32 0.044715, %v7170_v57  ;;  %v2224_v62 = vadd.f32 %v5671_v16, %v5086_v12 }
 0x9f8   :  { %v2215_v5 = vpop.f32.mrf.mxu0 }
 0x9f9   :  { %v2269_v25 = vmul.f32 %v2261_v50, %v7167_v9  ;;  %v2259_v17 = vmul.f32 %v2251_v52, %v7170_v57  ;;  %v2254_v34 = vmul.f32 0.044715, %v2224_v62  ;;  %v2216_v43 = vadd.f32 %v5086_v12, %v2215_v5 }
 0x9fa   :  { %v5674_v6 = vpop.f32.mrf.mxu0 }
 0x9fb   :  { %v2277_v54 = vadd.f32 %v2269_v25, %v7167_v9  ;;  %v2267_v8 = vmul.f32 %v2259_v17, %v7170_v57  ;;  %v2262_v21 = vmul.f32 %v2254_v34, %v2224_v62  ;;  %v7178_v3 = vadd.f32 %v5674_v6, %v5086_v12 }
 0x9fc   :  { %v2252_v53 = vmul.f32 0.044715, %v2216_v43  ;;  %v2228_v55 = vpop.f32.mrf.mxu0 }
 0x9fd   :  { %v2285_v33 = vmul.f32 0.7978846, %v2277_v54  ;;  %v2270_v38 = vmul.f32 %v2262_v21, %v2224_v62  ;;  %v2257_v11 = vmul.f32 0.044715, %v7178_v3  ;;  %v7181_v49 = vadd.f32 %v5086_v12, %v2228_v55 }
 0x9fe   :  { %v2260_v32 = vmul.f32 %v2252_v53, %v2216_v43  ;;  %v5675_v4 = vpop.f32.mrf.mxu0  ;;  %v2275_v48 = vadd.f32 %v2267_v8, %v7170_v57 }
 0x9ff   :  { %v2278_v26 = vadd.f32 %v2270_v38, %v2224_v62  ;;  %v2265_v24 = vmul.f32 %v2257_v11, %v7178_v3  ;;  %v2255_v13 = vmul.f32 0.044715, %v7181_v49  ;;  %6166 = vtanh.f32 %v2285_v33 }
 0xa00   :  { %v2268_v41 = vmul.f32 %v2260_v32, %v2216_v43  ;;  %v2240_v2 = vadd.f32 %v5675_v4, %v5086_v12  ;;  %v2231_v28 = vpop.f32.mrf.mxu0  ;;  %v2283_v22 = vmul.f32 0.7978846, %v2275_v48  ;;  %v2246_v11 = vmul.f32 0.5, %v2224_v62 }
 0xa01   :  { %v2286_v59 = vmul.f32 0.7978846, %v2278_v26  ;;  %v2273_v19 = vmul.f32 %v2265_v24, %v7178_v3  ;;  %v2263_v51 = vmul.f32 %v2255_v13, %v7181_v49  ;;  %v2232_v1 = vadd.f32 %v5086_v12, %v2231_v28 }
 0xa02   :  { %v2258_v58 = vmul.f32 0.044715, %v2240_v2  ;;  %v2276_v30 = vadd.f32 %v2268_v41, %v2216_v43  ;;  %6168 = vtanh.f32 %v2283_v22  ;;  %v2243_v4 = vmul.f32 0.5, %v7170_v57 }
 0xa03   :  { %6170 = vtanh.f32 %v2286_v59  ;;  %v2271_v45 = vmul.f32 %v2263_v51, %v7181_v49  ;;  %v2256_v39 = vmul.f32 0.044715, %v2232_v1  ;;  %v2281_v31 = vadd.f32 %v2273_v19, %v7178_v3 }
 0xa04   :  { %v2266_v27 = vmul.f32 %v2258_v58, %v2240_v2  ;;  %v2284_v47 = vmul.f32 0.7978846, %v2276_v30  ;;  %v2244_v48 = vmul.f32 0.5, %v2216_v43  ;;  %v2245_v24 = vmul.f32 0.5, %v7167_v9 }
 0xa05   :  { %v2264_v16 = vmul.f32 %v2256_v39, %v2232_v1  ;;  %v2279_v50 = vadd.f32 %v2271_v45, %v7181_v49  ;;  %v2289_v17 = vmul.f32 0.7978846, %v2281_v31  ;;  %v2247_v62 = vmul.f32 0.5, %v7181_v49 }
 0xa06   :  { %v2274_v52 = vmul.f32 %v2266_v27, %v2240_v2  ;;  %6172 = vtanh.f32 %v2284_v47  ;;  %v2248_v57 = vmul.f32 0.5, %v2232_v1  ;;  %v2250_v47 = vmul.f32 0.5, %v2240_v2 }
 0xa07   :  { %v2272_v5 = vmul.f32 %v2264_v16, %v2232_v1  ;;  %v2287_v25 = vmul.f32 0.7978846, %v2279_v50  ;;  %v2249_v50 = vmul.f32 0.5, %v7178_v3  ;;  %v2338_v49 = vrot.slane %v7027_v18, %v6853_v23 }
 0xa08   :  { %v2282_v12 = vadd.f32 %v2274_v52, %v2240_v2 }
 0xa09   :  { %v2280_v34 = vadd.f32 %v2272_v5, %v2232_v1  ;;  %6174 = vtanh.f32 %v2287_v25 }
 0xa0a   :  { %v2290_v6 = vmul.f32 0.7978846, %v2282_v12  ;;  %6176 = vtanh.f32 %v2289_v17 }
 0xa0b   :  { %v2288_v54 = vmul.f32 0.7978846, %v2280_v34 }
 0xa0c   :  { %6178 = vtanh.f32 %v2290_v6  ;;  %v6167_v8 = vpop.eup %6166 }
 0xa0d   :  { %6180 = vtanh.f32 %v2288_v54  ;;  %v2301_v32 = vadd.f32 1.0, %v6167_v8 }
 0xa0f   :  { %v6169_v21 = vpop.eup %6168  ;;  %v2309_v59 = vmul.f32 %v2301_v32, %v2245_v24 }
 0xa10   :  { %v6171_v53 = vpop.eup %6170  ;;  %v2299_v33 = vadd.f32 1.0, %v6169_v21 }
 0xa11   :  { %v2302_v55 = vadd.f32 1.0, %v6171_v53 }
 0xa12   :  { %v2307_v28 = vmul.f32 %v2299_v33, %v2243_v4 }
 0xa13   :  { %v6173_v38 = vpop.eup %6172  ;;  %v2310_v13 = vmul.f32 %v2302_v55, %v2246_v11 }
 0xa14   :  { %v2300_v26 = vadd.f32 1.0, %v6173_v38 }
 0xa15   :  { %v2316_v30 = vpack.c.bf16 %v2310_v13, %v2309_v59 }
 0xa16   :  { %v6175_v41 = vpop.eup %6174  ;;  %v2308_v22 = vmul.f32 %v2300_v26, %v2244_v48 }
 0xa17   :  { %v6177_v19 = vpop.eup %6176  ;;  %v2303_v45 = vadd.f32 1.0, %v6175_v41 }
 0xa18   :  { %v2315_v51 = vpack.c.bf16 %v2308_v22, %v2307_v28  ;;  %v2305_v9 = vadd.f32 1.0, %v6177_v19 }
 0xa19   :  { %v6179_v58 = vpop.eup %6178  ;;  %v2311_v31 = vmul.f32 %v2303_v45, %v2247_v62 }
 0xa1a   :  { %v6181_v39 = vpop.eup %6180  ;;  %5692 = vmatprep.mubr.bf16.mxu1 %v2315_v51  ;;  %v2306_v27 = vadd.f32 1.0, %v6179_v58  ;;  %v2313_v25 = vmul.f32 %v2305_v9, %v2249_v50 }
 0xa1b   :  { %5693 = vmatmul.mubr.bf16.vlgmr.msra.gmra.mxu1 %v2316_v30  ;;  %v2304_v43 = vadd.f32 1.0, %v6181_v39 }
 0xa1c   :  { %v2314_v52 = vmul.f32 %v2306_v27, %v2250_v47 }
 0xa1d   :  { %v2312_v16 = vmul.f32 %v2304_v43, %v2248_v57 }
 0xa1e   :  { %v2318_v17 = vpack.c.bf16 %v2314_v52, %v2313_v25 }
 0xa1f   :  { %v2317_v5 = vpack.c.bf16 %v2312_v16, %v2311_v31 }
 0xa21   :  { %5696 = vmatprep.mubr.bf16.mxu1 %v2317_v5 }
 0xa23   :  { %5697 = vmatmul.mubr.bf16.gmra.mxu1 %v2318_v17 }
 0xa24   :  { %2889 = vmatprep.mubr.bf16.mxu1 %v8103_v29 }
 0xadb   :  { %v5694_v12 = vpop.f32.mrf.mxu1 }
 0xadc   :  { %v2430_v34 = vadd.f32 %v5694_v12, %v2338_v49 }
 0xadd   :  { %v2421_v1 = vpop.f32.mrf.mxu1 }
 0xade   :  { %v2422_v2 = vadd.f32 %v2421_v1, %v2338_v49  ;;  %v2454_v55 = vadd.f32 %v2430_v34, %v7115_v63 }
 0xadf   :  { %v5695_v6 = vpop.f32.mrf.mxu1 }
 0xae0   :  { %v2452_v54 = vadd.f32 %v2422_v2, %v7107_v44  ;;  %v2433_v8 = vadd.f32 %v5695_v6, %v2338_v49  ;;  %v2466_v44 = vsel %vm260_vm8, %v2454_v55, 0.0 }
 0xae1   :  { %v2424_v3 = vpop.f32.mrf.mxu1 }
 0xae2   :  { %v2425_v21 = vadd.f32 %v2424_v3, %v2338_v49  ;;  %v2460_v53 = vsel %vm260_vm8, %v2452_v54, 0.0  ;;  %v2455_v18 = vadd.f32 %v2433_v8, %v7117_v42 }
 0xae3   :  { %2461 = vadd.xlane.f32.xlu1 %v2460_v53  ;;  %v5698_v33 = vpop.f32.mrf.mxu1 }
 0xae4   :  { %v2453_v38 = vadd.f32 %v2425_v21, %v7109_v56  ;;  %v2446_v32 = vadd.f32 %v5698_v33, %v2338_v49  ;;  %v2469_v63 = vsel %vm260_vm8, %v2455_v18, 0.0 }
 0xae5   :  { %v2437_v11 = vpop.f32.mrf.mxu1 }
 0xae6   :  { %v2438_v4 = vadd.f32 %v2437_v11, %v2338_v49  ;;  %v2463_v48 = vsel %vm260_vm8, %v2453_v38, 0.0  ;;  %v2458_v42 = vadd.f32 %v2446_v32, %v7132_v15 }
 0xae7   :  { %2464 = vadd.xlane.f32.xlu0 %v2463_v48  ;;  %2467 = vadd.xlane.f32.xlu1 %v2466_v44  ;;  %v5699_v26 = vpop.f32.mrf.mxu1 }
 0xae8   :  { %v2456_v24 = vadd.f32 %v2438_v4, %v7124_v10  ;;  %v2449_v41 = vadd.f32 %v5699_v26, %v2338_v49  ;;  %v2478_v19 = vsel %vm260_vm8, %v2458_v42, 0.0  ;;  %v6000_v26 = vld [vmem:[%s8052_s6 + $0x154] ss:$24 sps:$4 sm:$0xff]  }
 0xae9   :  { %v2440_v13 = vpop.f32.mrf.mxu1  ;;  %2792 = vmatprep.subr.bf16.mxu0 %v6000_v26 }
 0xaea   :  { %v2441_v28 = vadd.f32 %v2440_v13, %v2338_v49  ;;  %v2472_v56 = vsel %vm260_vm8, %v2456_v24, 0.0  ;;  %v2459_v51 = vadd.f32 %v2449_v41, %v7134_v40  ;;  %v5998_v13 = vld [vmem:[%s8052_s6 + $0x150] ss:$24 sps:$4 sm:$0xff]   ;;  %v6006_v41 = vld [vmem:[%s8052_s6 + $0x124] ss:$24 sps:$4 sm:$0xff]  }
 0xaeb   :  { %2470 = vadd.xlane.f32.xlu0 %v2469_v63  ;;  %2473 = vadd.xlane.f32.xlu1 %v2472_v56  ;;  %v6001_v63 = vld [vmem:[%s8052_s6 + $0x158] ss:$24 sps:$4 sm:$0xff]  }
 0xaec   :  { %v2457_v22 = vadd.f32 %v2441_v28, %v7126_v20  ;;  %v2481_v10 = vsel %vm260_vm8, %v2459_v51, 0.0  ;;  %2793 = vmatpush1.bf16.msra.mxu0 %v5998_v13  ;;  %v6009_v28 = vld [vmem:[%s8052_s6 + $0x12c] ss:$24 sps:$4 sm:$0xff]   ;;  %v6004_v56 = vld [vmem:[%s8052_s6 + $0x120] ss:$24 sps:$4 sm:$0xff]  }
 0xaed   :  { %2794 = vmatprep.subr.bf16.mxu0 %v6006_v41  ;;  %v8105_v41 = vld [vmem:[#allocation7_spill] sm:$0xff] }
 0xaee   :  { %v2475_v59 = vsel %vm260_vm8, %v2457_v22, 0.0 }
 0xaef   :  { %2476 = vadd.xlane.f32.xlu0 %v2475_v59  ;;  %2479 = vadd.xlane.f32.xlu1 %v2478_v19  ;;  %v6015_v59 = vld [vmem:[%s8052_s6 + $0xfc] ss:$24 sps:$4 sm:$0xff]   ;;  %v6010_v19 = vld [vmem:[%s8052_s6 + $0xf0] ss:$24 sps:$4 sm:$0xff]  }
 0xaf0   :  { %2795 = vmatpush1.bf16.msra.mxu0 %v6004_v56 }
 0xaf3   :  { %2482 = vadd.xlane.f32.xlu0 %v2481_v10  ;;  %v6016_v10 = vld [vmem:[%s8052_s6 + $0xc0] ss:$24 sps:$4 sm:$0xff]  }
 0xb6c   :  { %v2462_v58 = vpop.xlane.xlu1 %2461 }
 0xb6d   :  { %v2484_v30 = vmul.f32 0.015625, %v2462_v58  ;;  %v6018_v58 = vld [vmem:[%s8052_s6 + $0xc4] ss:$24 sps:$4 sm:$0xff]  }
 0xb6f   :  { %v7214_v45 = vsub.f32 %v2452_v54, %v2484_v30  ;;  %v6019_v30 = vld [vmem:[%s8052_s6 + $0xc8] ss:$24 sps:$4 sm:$0xff]  }
 0xb70   :  { %v2465_v15 = vpop.xlane.xlu0 %2464  ;;  %v2468_v39 = vpop.xlane.xlu1 %2467 }
 0xb71   :  { %v2485_v62 = vmul.f32 0.015625, %v2465_v15  ;;  %v2486_v27 = vmul.f32 0.015625, %v2468_v39  ;;  %v2500_v20 = vmul.f32 %v7214_v45, %v7214_v45  ;;  %v6021_v15 = vld [vmem:[%s8052_s6 + $0xcc] ss:$24 sps:$4 sm:$0xff]  }
 0xb72   :  { %v6024_v39 = vld [vmem:[%s8052_s6 + $0x164] ss:$24 sps:$4 sm:$0xff]  }
 0xb73   :  { %v7218_v57 = vsub.f32 %v2453_v38, %v2485_v62  ;;  %v7220_v43 = vsub.f32 %v2454_v55, %v2486_v27  ;;  %v2508_v40 = vsel %vm260_vm8, %v2500_v20, 0.0 }
 0xb74   :  { %v2471_v47 = vpop.xlane.xlu0 %2470  ;;  %2509 = vadd.xlane.f32.xlu1 %v2508_v40  ;;  %v2474_v9 = vpop.xlane.xlu1 %2473 }
 0xb75   :  { %v2487_v31 = vmul.f32 0.015625, %v2471_v47  ;;  %v2488_v16 = vmul.f32 0.015625, %v2474_v9  ;;  %v2501_v50 = vmul.f32 %v7218_v57, %v7218_v57  ;;  %v2502_v52 = vmul.f32 %v7220_v43, %v7220_v43 }
 0xb77   :  { %v7227_v5 = vsub.f32 %v2455_v18, %v2487_v31  ;;  %v7229_v25 = vsub.f32 %v2456_v24, %v2488_v16  ;;  %v2511_v17 = vsel %vm260_vm8, %v2501_v50, 0.0  ;;  %v2514_v49 = vsel %vm260_vm8, %v2502_v52, 0.0  ;;  %v6003_v24 = vld [vmem:[%s8052_s6 + $0x15c] ss:$24 sps:$4 sm:$0xff]  }
 0xb78   :  { %2512 = vadd.xlane.f32.xlu0 %v2511_v17  ;;  %v2477_v12 = vpop.xlane.xlu0 %2476  ;;  %2515 = vadd.xlane.f32.xlu1 %v2514_v49  ;;  %v2480_v1 = vpop.xlane.xlu1 %2479 }
 0xb79   :  { %v2489_v34 = vmul.f32 0.015625, %v2477_v12  ;;  %v2490_v2 = vmul.f32 0.015625, %v2480_v1  ;;  %v2503_v6 = vmul.f32 %v7227_v5, %v7227_v5  ;;  %v2504_v54 = vmul.f32 %v7229_v25, %v7229_v25  ;;  %2865 = vmatprep.subr.bf16.mxu1 %v6003_v24 }
 0xb7a   :  { %2866 = vmatpush1.bf16.msra.mxu1 %v6001_v63 }
 0xb7b   :  { %v7237_v8 = vsub.f32 %v2457_v22, %v2489_v34  ;;  %v7239_v3 = vsub.f32 %v2458_v42, %v2490_v2  ;;  %v2517_v21 = vsel %vm260_vm8, %v2503_v6, 0.0  ;;  %v2520_v53 = vsel %vm260_vm8, %v2504_v54, 0.0  ;;  %v6007_v42 = vld [vmem:[%s8052_s6 + $0x128] ss:$24 sps:$4 sm:$0xff]   ;;  %2867 = vmatprep.subr.bf16.mxu1 %v6009_v28  ;;  %v6012_v22 = vld [vmem:[%s8052_s6 + $0xf4] ss:$24 sps:$4 sm:$0xff]  }
 0xb7c   :  { %2518 = vadd.xlane.f32.xlu0 %v2517_v21  ;;  %v2483_v55 = vpop.xlane.xlu0 %2482  ;;  %2521 = vadd.xlane.f32.xlu1 %v2520_v53 }
 0xb7d   :  { %v2491_v33 = vmul.f32 0.015625, %v2483_v55  ;;  %v2505_v38 = vmul.f32 %v7237_v8, %v7237_v8  ;;  %v2506_v11 = vmul.f32 %v7239_v3, %v7239_v3  ;;  %2796 = vmatprep.subr.bf16.mxu0 %v6012_v22 }
 0xb7e   :  { %2868 = vmatpush1.bf16.msra.mxu1 %v6007_v42  ;;  %2797 = vmatpush1.bf16.msra.mxu0 %v6010_v19 }
 0xb7f   :  { %v7247_v18 = vsub.f32 %v2459_v51, %v2491_v33  ;;  %v2523_v32 = vsel %vm260_vm8, %v2505_v38, 0.0  ;;  %v2526_v4 = vsel %vm260_vm8, %v2506_v11, 0.0  ;;  %v6013_v51 = vld [vmem:[%s8052_s6 + $0xf8] ss:$24 sps:$4 sm:$0xff]   ;;  %2869 = vmatprep.subr.bf16.mxu1 %v6015_v59  ;;  %2798 = vmatprep.subr.bf16.mxu0 %v6018_v58  ;;  %v6312_v11 = vld [vmem:[%s8057_s11] sm:$0x3f] }
 0xb80   :  { %2524 = vadd.xlane.f32.xlu0 %v2523_v32  ;;  %2527 = vadd.xlane.f32.xlu1 %v2526_v4  ;;  %v8104_v32 = vld [vmem:[#allocation6_spill] sm:$0xff]  ;;  %v2579_v28 = vrot.slane %v6312_v11, %v8105_v41 }
 0xb81   :  { %v2507_v48 = vmul.f32 %v7247_v18, %v7247_v18  ;;  %v7310_v4 = vrot.slane %v6312_v11, %v8104_v32  ;;  %v6022_v58 = vld [vmem:[%s8052_s6 + $0x160] ss:$24 sps:$4 sm:$0xff]  }
 0xb82   :  { %2870 = vmatpush1.bf16.msra.mxu1 %v6013_v51  ;;  %2799 = vmatpush1.bf16.msra.mxu0 %v6016_v10 }
 0xb83   :  { %v2529_v44 = vsel %vm260_vm8, %v2507_v48, 0.0  ;;  %2871 = vmatprep.subr.bf16.mxu1 %v6021_v15  ;;  %2938 = vmatprep.subr.bf16.mxu0 %v6024_v39  ;;  %v6027_v15 = vld [vmem:[%s8052_s6 + $0x134] ss:$24 sps:$4 sm:$0xff]  }
 0xb84   :  { %2530 = vadd.xlane.f32.xlu0 %v2529_v44 }
 0xb86   :  { %2872 = vmatpush1.bf16.msra.mxu1 %v6019_v30 }
 0xb87   :  { %5700 = vmatprep.subr.bf16.mxu1 %v8096_v0 }
 0xbfd   :  { %v2510_v62 = vpop.xlane.xlu1 %2509 }
 0xbfe   :  { %v2532_v27 = vmul.f32 0.015625, %v2510_v62 }
 0xc00   :  { %v2540_v20 = vadd.f32 1e-12, %v2532_v27  ;;  %v6025_v27 = vld [vmem:[%s8052_s6 + $0x130] ss:$24 sps:$4 sm:$0xff]  }
 0xc01   :  { %v2513_v40 = vpop.xlane.xlu0 %2512  ;;  %v2516_v47 = vpop.xlane.xlu1 %2515 }
 0xc02   :  { %6182 = vrsqrt.f32 %v2540_v20  ;;  %v2533_v9 = vmul.f32 0.015625, %v2513_v40  ;;  %v2534_v31 = vmul.f32 0.015625, %v2516_v47  ;;  %v6030_v20 = vld [vmem:[%s8052_s6 + $0x104] ss:$24 sps:$4 sm:$0xff]  }
 0xc04   :  { %v2541_v16 = vadd.f32 1e-12, %v2533_v9  ;;  %v2542_v50 = vadd.f32 1e-12, %v2534_v31 }
 0xc05   :  { %v2519_v52 = vpop.xlane.xlu0 %2518  ;;  %v2522_v17 = vpop.xlane.xlu1 %2521 }
 0xc06   :  { %6184 = vrsqrt.f32 %v2541_v16  ;;  %v2535_v49 = vmul.f32 0.015625, %v2519_v52  ;;  %v2536_v1 = vmul.f32 0.015625, %v2522_v17 }
 0xc07   :  { %6186 = vrsqrt.f32 %v2542_v50  ;;  %v6033_v50 = vld [vmem:[%s8052_s6 + $0xd4] ss:$24 sps:$4 sm:$0xff]  }
 0xc08   :  { %v2543_v12 = vadd.f32 1e-12, %v2535_v49  ;;  %v2544_v6 = vadd.f32 1e-12, %v2536_v1 }
 0xc09   :  { %v2525_v34 = vpop.xlane.xlu0 %2524  ;;  %v2528_v21 = vpop.xlane.xlu1 %2527 }
 0xc0a   :  { %6188 = vrsqrt.f32 %v2543_v12  ;;  %v2537_v2 = vmul.f32 0.015625, %v2525_v34  ;;  %v2538_v38 = vmul.f32 0.015625, %v2528_v21  ;;  %v6031_v12 = vld [vmem:[%s8052_s6 + $0xd0] ss:$24 sps:$4 sm:$0xff]  }
 0xc0c   :  { %v2545_v54 = vadd.f32 1e-12, %v2537_v2  ;;  %v2546_v24 = vadd.f32 1e-12, %v2538_v38 }
 0xc0d   :  { %v2531_v53 = vpop.xlane.xlu0 %2530 }
 0xc0e   :  { %6190 = vrsqrt.f32 %v2545_v54  ;;  %v2539_v55 = vmul.f32 0.015625, %v2531_v53  ;;  %v7404_v53 = vld [vmem:[%s8054_s7 + $0x6] sm:$0x3f] }
 0xc0f   :  { %v6183_v33 = vpop.eup %6182  ;;  %6192 = vrsqrt.f32 %v2544_v6  ;;  %v7408_v38 = vrot.slane %v7404_v53, %v8102_v61  ;;  %v7412_v11 = vrot.slane %v7404_v53, %v6615_v35 }
 0xc10   :  { %v2556_v48 = vmul.f32 %v6183_v33, %v7214_v45  ;;  %v2547_v44 = vadd.f32 1e-12, %v2539_v55 }
 0xc12   :  { %v2568_v13 = vmul.f32 %v7310_v4, %v2556_v48  ;;  %6194 = vrsqrt.f32 %v2547_v44  ;;  %v7416_v48 = vrot.slane %v7404_v53, %v6853_v23 }
 0xc13   :  { %v6185_v26 = vpop.eup %6184  ;;  %6196 = vrsqrt.f32 %v2546_v24 }
 0xc14   :  { %v2557_v63 = vmul.f32 %v6185_v26, %v7218_v57  ;;  %v6187_v56 = vpop.eup %6186  ;;  %v7317_v59 = vadd.f32 %v2579_v28, %v2568_v13 }
 0xc15   :  { %v2558_v45 = vmul.f32 %v6187_v56, %v7220_v43 }
 0xc16   :  { %v2569_v42 = vmul.f32 %v7310_v4, %v2557_v63 }
 0xc17   :  { %v6189_v22 = vpop.eup %6188  ;;  %v2570_v43 = vmul.f32 %v7310_v4, %v2558_v45 }
 0xc18   :  { %v7319_v19 = vadd.f32 %v2579_v28, %v2569_v42  ;;  %v2559_v51 = vmul.f32 %v6189_v22, %v7227_v5 }
 0xc19   :  { %v7346_v40 = vadd.f32 %v2579_v28, %v2570_v43 }
 0xc1a   :  { %v2590_v10 = vpack.c.bf16 %v7319_v19, %v7317_v59  ;;  %v2571_v57 = vmul.f32 %v7310_v4, %v2559_v51 }
 0xc1b   :  { %v6191_v30 = vpop.eup %6190 }
 0xc1c   :  { %5153 = vmatmul.mubr.msk.bf16.vlgmr.msra.gmra.mxu0 %vm260_vm8, %v2590_v10  ;;  %5157 = vmatmul.mubr.msk.bf16.vlgmr.msra.gmra.mxu1 %vm260_vm8, %v2590_v10  ;;  %v6193_v5 = vpop.eup %6192  ;;  %v7337_v39 = vadd.f32 %v2579_v28, %v2571_v57  ;;  %v2561_v62 = vmul.f32 %v6191_v30, %v7237_v8  ;;  %v6028_v8 = vld [vmem:[%s8052_s6 + $0x100] ss:$24 sps:$4 sm:$0xff]  }
 0xc1d   :  { %2826 = vmatprep.mubr.bf16.mxu0 %v8103_v29  ;;  %2899 = vmatprep.mubr.bf16.mxu1 %v8103_v29  ;;  %v2560_v47 = vmul.f32 %v6193_v5, %v7229_v25 }
 0xc1e   :  { %2939 = vmatpush1.bf16.msra.mxu0 %v6022_v58  ;;  %v2591_v9 = vpack.c.bf16 %v7337_v39, %v7346_v40  ;;  %v2573_v31 = vmul.f32 %v7310_v4, %v2561_v62 }
 0xc1f   :  { %2940 = vmatprep.subr.bf16.mxu0 %v6027_v15  ;;  %v6195_v16 = vpop.eup %6194  ;;  %v2572_v25 = vmul.f32 %v7310_v4, %v2560_v47 }
 0xc20   :  { %v6197_v52 = vpop.eup %6196  ;;  %v7363_v17 = vadd.f32 %v2579_v28, %v2573_v31  ;;  %v2563_v49 = vmul.f32 %v6195_v16, %v7247_v18 }
 0xc21   :  { %v7369_v1 = vadd.f32 %v2579_v28, %v2572_v25  ;;  %v2562_v34 = vmul.f32 %v6197_v52, %v7239_v3 }
 0xc22   :  { %2941 = vmatpush1.bf16.msra.mxu0 %v6025_v27  ;;  %v2575_v6 = vmul.f32 %v7310_v4, %v2563_v49 }
 0xc23   :  { %2942 = vmatprep.subr.bf16.mxu0 %v6030_v20  ;;  %v2592_v2 = vpack.c.bf16 %v7363_v17, %v7369_v1  ;;  %v2574_v18 = vmul.f32 %v7310_v4, %v2562_v34 }
 0xc24   :  { %5154 = vmatmul.mubr.msk.bf16.gmra.mxu0 %vm260_vm8, %v2591_v9  ;;  %5158 = vmatmul.mubr.msk.bf16.gmra.mxu1 %vm260_vm8, %v2591_v9  ;;  %v7381_v54 = vadd.f32 %v2579_v28, %v2575_v6 }
 0xc25   :  { %2836 = vmatprep.mubr.bf16.mxu0 %v8103_v29  ;;  %2909 = vmatprep.mubr.bf16.mxu1 %v8103_v29  ;;  %v7383_v3 = vadd.f32 %v2579_v28, %v2574_v18 }
 0xc26   :  { %2943 = vmatpush1.bf16.msra.mxu0 %v6028_v8 }
 0xc27   :  { %2944 = vmatprep.subr.bf16.mxu0 %v6033_v50  ;;  %v2593_v21 = vpack.c.bf16 %v7381_v54, %v7383_v3 }
 0xc2a   :  { %2945 = vmatpush1.bf16.msra.mxu0 %v6031_v12 }
 0xc2b   :  { %5712 = vmatprep.subr.bf16.mxu0 %v8096_v0 }
 0xc2c   :  { %5155 = vmatmul.mubr.msk.bf16.gmra.mxu0 %vm260_vm8, %v2592_v2  ;;  %5159 = vmatmul.mubr.msk.bf16.gmra.mxu1 %vm260_vm8, %v2592_v2 }
 0xc2d   :  { %2846 = vmatprep.mubr.bf16.mxu0 %v8103_v29  ;;  %2919 = vmatprep.mubr.bf16.mxu1 %v8103_v29 }
 0xc34   :  { %5156 = vmatmul.mubr.msk.bf16.gmra.mxu0 %vm260_vm8, %v2593_v21  ;;  %5160 = vmatmul.mubr.msk.bf16.gmra.mxu1 %vm260_vm8, %v2593_v21 }
 0xc35   :  { %2962 = vmatprep.mubr.bf16.mxu0 %v8103_v29  ;;  %5702 = vmatprep.mubr.msk.bf16.mxu1 %vm6316_vm9, %v8096_v0 }
 0xc3c   :  { %5161 = vmatmul.mubr.msk.bf16.vlgmr.msra.gmra.mxu0 %vm260_vm8, %v2590_v10  ;;  %v7434_v10 = vrot.slane %v7404_v53, %v6497_v37 }
 0xc3d   :  { %2972 = vmatprep.mubr.bf16.mxu0 %v8103_v29 }
 0xc44   :  { %5162 = vmatmul.mubr.msk.bf16.gmra.mxu0 %vm260_vm8, %v2591_v9 }
 0xc45   :  { %2982 = vmatprep.mubr.bf16.mxu0 %v8103_v29 }
 0xc4c   :  { %5163 = vmatmul.mubr.msk.bf16.gmra.mxu0 %vm260_vm8, %v2592_v2 }
 0xc4d   :  { %2992 = vmatprep.mubr.bf16.mxu0 %v8103_v29 }
 0xc54   :  { %5164 = vmatmul.mubr.msk.bf16.gmra.mxu0 %vm260_vm8, %v2593_v21 }
 0xc55   :  { %5714 = vmatprep.mubr.msk.bf16.mxu0 %vm6316_vm9, %v8096_v0 }
 0xcdc   :  { %v2818_v55 = vpop.f32.mrf.mxu0  ;;  %v2891_v33 = vpop.f32.mrf.mxu1 }
 0xcdd   :  { %v2892_v24 = vadd.f32 %v2891_v33, %v7408_v38  ;;  %v2819_v27 = vadd.f32 %v2818_v55, %v7434_v10 }
 0xcde   :  { %v2820_v29 = vpop.f32.mrf.mxu0  ;;  %v2893_v4 = vpop.f32.mrf.mxu1 }
 0xcdf   :  { %v7421_v63 = vadd.f32 %v2820_v29, %v7412_v11  ;;  %v7424_v42 = vadd.f32 %v2893_v4, %v7416_v48 }
 0xce0   :  { %v2822_v44 = vpop.f32.mrf.mxu0  ;;  %v2895_v26 = vpop.f32.mrf.mxu1 }
 0xce1   :  { %v2896_v13 = vadd.f32 %v2895_v26, %v7408_v38  ;;  %v2823_v43 = vadd.f32 %v2822_v44, %v7434_v10 }
 0xce2   :  { %v2824_v28 = vpop.f32.mrf.mxu0  ;;  %v2897_v56 = vpop.f32.mrf.mxu1 }
 0xce3   :  { %v3007_v22 = vpack.c.bf16 %v2896_v13, %v2892_v24  ;;  %v7427_v45 = vadd.f32 %v2824_v28, %v7412_v11  ;;  %v7430_v51 = vadd.f32 %v2897_v56, %v7416_v48  ;;  %v3003_v8 = vpack.c.bf16 %v2823_v43, %v2819_v27 }
 0xce4   :  { %v2828_v57 = vpop.f32.mrf.mxu0  ;;  %v2901_v58 = vpop.f32.mrf.mxu1 }
 0xce5   :  { %5701 = vmatpush3.bf16.xpose.msra.mxu1 %v3007_v22  ;;  %v2902_v9 = vadd.f32 %v2901_v58, %v7408_v38  ;;  %v2829_v4 = vadd.f32 %v2828_v57, %v7434_v10 }
 0xce6   :  { %v2830_v5 = vpop.f32.mrf.mxu0  ;;  %v2903_v62 = vpop.f32.mrf.mxu1  ;;  %5706 = vmatprep.subr.bf16.mxu1 %v8096_v0 }
 0xce7   :  { %v7446_v16 = vadd.f32 %v2830_v5, %v7412_v11  ;;  %v7449_v25 = vadd.f32 %v2903_v62, %v7416_v48 }
 0xce8   :  { %v2832_v20 = vpop.f32.mrf.mxu0  ;;  %v2905_v47 = vpop.f32.mrf.mxu1 }
 0xce9   :  { %v2906_v31 = vadd.f32 %v2905_v47, %v7408_v38  ;;  %v2833_v55 = vadd.f32 %v2832_v20, %v7434_v10 }
 0xcea   :  { %v2834_v50 = vpop.f32.mrf.mxu0  ;;  %v2907_v52 = vpop.f32.mrf.mxu1 }
 0xceb   :  { %v3008_v49 = vpack.c.bf16 %v2906_v31, %v2902_v9  ;;  %v7452_v12 = vadd.f32 %v2834_v50, %v7412_v11  ;;  %v7455_v34 = vadd.f32 %v2907_v52, %v7416_v48  ;;  %v3004_v28 = vpack.c.bf16 %v2833_v55, %v2829_v4 }
 0xcec   :  { %v2838_v2 = vpop.f32.mrf.mxu0  ;;  %v2911_v6 = vpop.f32.mrf.mxu1  ;;  %5703 = vmatmul.mubr.bf16.vlgmr.msra.gmra.mxu1 %v3003_v8 }
 0xced   :  { %5707 = vmatpush3.bf16.xpose.msra.mxu1 %v3008_v49  ;;  %5708 = vmatprep.mubr.msk.bf16.mxu1 %vm6316_vm9, %v8096_v0  ;;  %v2912_v24 = vadd.f32 %v2911_v6, %v7408_v38  ;;  %v2839_v52 = vadd.f32 %v2838_v2, %v7434_v10 }
 0xcee   :  { %v2840_v33 = vpop.f32.mrf.mxu0  ;;  %v2913_v29 = vpop.f32.mrf.mxu1  ;;  %5718 = vmatprep.subr.bf16.mxu1 %v8096_v0 }
 0xcef   :  { %v7469_v56 = vadd.f32 %v2840_v33, %v7412_v11  ;;  %v7472_v43 = vadd.f32 %v2913_v29, %v7416_v48 }
 0xcf0   :  { %v2842_v44 = vpop.f32.mrf.mxu0  ;;  %v2915_v26 = vpop.f32.mrf.mxu1 }
 0xcf1   :  { %v2916_v13 = vadd.f32 %v2915_v26, %v7408_v38  ;;  %v2843_v31 = vadd.f32 %v2842_v44, %v7434_v10 }
 0xcf2   :  { %v2844_v22 = vpop.f32.mrf.mxu0  ;;  %v2917_v58 = vpop.f32.mrf.mxu1 }
 0xcf3   :  { %v3009_v5 = vpack.c.bf16 %v2916_v13, %v2912_v24  ;;  %v7475_v62 = vadd.f32 %v2844_v22, %v7412_v11  ;;  %v7478_v57 = vadd.f32 %v2917_v58, %v7416_v48  ;;  %v3005_v29 = vpack.c.bf16 %v2843_v31, %v2839_v52 }
 0xcf4   :  { %v2848_v27 = vpop.f32.mrf.mxu0  ;;  %v2921_v20 = vpop.f32.mrf.mxu1  ;;  %5709 = vmatmul.mubr.bf16.vlgmr.msra.gmra.mxu1 %v3004_v28  ;;  %v2641_v28 = vrot.slane %v7404_v53, %v8104_v32 }
 0xcf5   :  { %5713 = vmatpush3.bf16.xpose.msra.mxu0 %v3009_v5  ;;  %5720 = vmatprep.mubr.msk.bf16.mxu1 %vm6316_vm9, %v8096_v0  ;;  %v2922_v55 = vadd.f32 %v2921_v20, %v7408_v38  ;;  %v2849_v58 = vadd.f32 %v2848_v27, %v7434_v10 }
 0xcf6   :  { %v2850_v8 = vpop.f32.mrf.mxu0  ;;  %v7485_v50 = vpop.f32.mrf.mxu1  ;;  %5724 = vmatprep.subr.bf16.mxu0 %v8096_v0 }
 0xcf7   :  { %v7494_v44 = vadd.f32 %v2850_v8, %v7412_v11 }
 0xcf8   :  { %v2852_v49 = vpop.f32.mrf.mxu0  ;;  %v2925_v6 = vpop.f32.mrf.mxu1 }
 0xcf9   :  { %v2926_v33 = vadd.f32 %v2925_v6, %v7408_v38  ;;  %v2853_v38 = vadd.f32 %v2852_v49, %v7434_v10 }
 0xcfa   :  { %v2854_v4 = vpop.f32.mrf.mxu0  ;;  %v7550_v47 = vpop.f32.mrf.mxu1 }
 0xcfb   :  { %v3010_v26 = vpack.c.bf16 %v2926_v33, %v2922_v55  ;;  %v7497_v24 = vadd.f32 %v2854_v4, %v7412_v11  ;;  %v2645_v11 = vrot.slane %v7404_v53, %v8105_v41  ;;  %v3006_v8 = vpack.c.bf16 %v2853_v38, %v2849_v58 }
 0xcfc   :  { %v2964_v13 = vpop.f32.mrf.mxu0  ;;  %5715 = vmatmul.mubr.bf16.vlgmr.msra.gmra.mxu0 %v3005_v29 }
 0xcfd   :  { %5719 = vmatpush3.bf16.xpose.msra.mxu1 %v3010_v26  ;;  %5726 = vmatprep.mubr.msk.bf16.mxu0 %vm6316_vm9, %v8096_v0  ;;  %v2965_v20 = vadd.f32 %v2964_v13, %v2641_v28 }
 0xcfe   :  { %v2966_v22 = vpop.f32.mrf.mxu0  ;;  %5730 = vmatprep.subr.bf16.mxu1 %v8096_v0 }
 0xcff   :  { %v7510_v6 = vadd.f32 %v2966_v22, %v2645_v11 }
 0xd00   :  { %v2968_v5 = vpop.f32.mrf.mxu0 }
 0xd01   :  { %v2969_v31 = vadd.f32 %v2968_v5, %v2641_v28 }
 0xd02   :  { %v2970_v52 = vpop.f32.mrf.mxu0 }
 0xd03   :  { %v3011_v55 = vpack.c.bf16 %v2969_v31, %v2965_v20  ;;  %v7512_v33 = vadd.f32 %v2970_v52, %v2645_v11 }
 0xd04   :  { %v2974_v29 = vpop.f32.mrf.mxu0  ;;  %5721 = vmatmul.mubr.bf16.vlgmr.msra.gmra.mxu1 %v3006_v8 }
 0xd05   :  { %5725 = vmatpush3.bf16.msra.mxu0 %v3011_v55  ;;  %5732 = vmatprep.mubr.msk.bf16.mxu1 %vm6316_vm9, %v8096_v0  ;;  %v2975_v27 = vadd.f32 %v2974_v29, %v2641_v28 }
 0xd06   :  { %v2976_v53 = vpop.f32.mrf.mxu0  ;;  %5736 = vmatprep.subr.bf16.mxu0 %v8096_v0 }
 0xd07   :  { %v7519_v13 = vadd.f32 %v2976_v53, %v2645_v11 }
 0xd08   :  { %v2978_v10 = vpop.f32.mrf.mxu0 }
 0xd09   :  { %v2979_v4 = vadd.f32 %v2978_v10, %v2641_v28 }
 0xd0a   :  { %v2980_v26 = vpop.f32.mrf.mxu0 }
 0xd0b   :  { %v3012_v38 = vpack.c.bf16 %v2979_v4, %v2975_v27  ;;  %v7521_v22 = vadd.f32 %v2980_v26, %v2645_v11 }
 0xd0c   :  { %v2984_v58 = vpop.f32.mrf.mxu0 }
 0xd0d   :  { %v7525_v20 = vadd.f32 %v2984_v58, %v2641_v28  ;;  %5731 = vmatpush3.bf16.msra.mxu1 %v3012_v38 }
 0xd0e   :  { %v2986_v31 = vpop.f32.mrf.mxu0  ;;  %5742 = vmatprep.subr.bf16.mxu1 %v8096_v0 }
 0xd0f   :  { %v7528_v8 = vadd.f32 %v2986_v31, %v2645_v11 }
 0xd10   :  { %v2988_v52 = vpop.f32.mrf.mxu0 }
 0xd11   :  { %v7530_v55 = vadd.f32 %v2988_v52, %v2641_v28 }
 0xd12   :  { %v2990_v29 = vpop.f32.mrf.mxu0 }
 0xd13   :  { %v7534_v10 = vadd.f32 %v2990_v29, %v2645_v11 }
 0xd14   :  { %v2994_v27 = vpop.f32.mrf.mxu0 }
 0xd15   :  { %v7538_v26 = vadd.f32 %v2994_v27, %v2641_v28 }
 0xd16   :  { %v2996_v38 = vpop.f32.mrf.mxu0 }
 0xd17   :  { %v7540_v58 = vadd.f32 %v2996_v38, %v2645_v11 }
 0xd18   :  { %v2998_v31 = vpop.f32.mrf.mxu0 }
 0xd19   :  { %v7542_v5 = vadd.f32 %v2998_v31, %v2641_v28 }
 0xd1a   :  { %v3000_v52 = vpop.f32.mrf.mxu0 }
 0xd1b   :  { %v7546_v49 = vadd.f32 %v3000_v52, %v2645_v11 }
 0xdac   :  { %v3049_v4 = vpop.f32.mrf.mxu1 }
 0xdad   :  { %v3179_v27 = vmul.f32 0.17677669, %v3049_v4 }
 0xdae   :  { %v5704_v18 = vpop.f32.mrf.mxu1 }
 0xdaf   :  { %v3187_v38 = vadd.f32 %v3179_v27, %v6818_v46 }
 0xdb0   :  { %v3052_v9 = vpop.f32.mrf.mxu1 }
 0xdb1   :  { %v3195_v21 = vmul.f32 1.442695, %v3187_v38  ;;  %v3180_v28 = vmul.f32 0.17677669, %v3052_v9 }
 0xdb2   :  { %v5705_v31 = vpop.f32.mrf.mxu1 }
 0xdb3   :  { %6198 = vpow2.f32 %v3195_v21  ;;  %v3188_v30 = vadd.f32 %v3180_v28, %v6818_v46 }
 0xdb4   :  { %v3090_v15 = vpop.f32.mrf.mxu1 }
 0xdb5   :  { %v3197_v11 = vmul.f32 1.442695, %v3188_v30  ;;  %v3181_v52 = vmul.f32 0.17677669, %v3090_v15 }
 0xdb6   :  { %v5710_v2 = vpop.f32.mrf.mxu1 }
 0xdb7   :  { %6200 = vpow2.f32 %v3197_v11  ;;  %v3189_v29 = vadd.f32 %v3181_v52, %v6823_v7 }
 0xdb8   :  { %v3093_v53 = vpop.f32.mrf.mxu1 }
 0xdb9   :  { %v3199_v36 = vmul.f32 1.442695, %v3189_v29  ;;  %v3182_v4 = vmul.f32 0.17677669, %v3093_v53 }
 0xdba   :  { %v5711_v18 = vpop.f32.mrf.mxu1 }
 0xdbb   :  { %6202 = vpow2.f32 %v3199_v36  ;;  %v3190_v27 = vadd.f32 %v3182_v4, %v6823_v7 }
 0xdbc   :  { %v3131_v38 = vpop.f32.mrf.mxu0 }
 0xdbd   :  { %v3201_v9 = vmul.f32 1.442695, %v3190_v27  ;;  %v3183_v31 = vmul.f32 0.17677669, %v3131_v38 }
 0xdbe   :  { %v5716_v21 = vpop.f32.mrf.mxu0 }
 0xdbf   :  { %6204 = vpow2.f32 %v3201_v9  ;;  %v3191_v28 = vadd.f32 %v3183_v31, %v6828_v60 }
 0xdc0   :  { %v6199_v30 = vpop.eup %6198  ;;  %v3134_v15 = vpop.f32.mrf.mxu0 }
 0xdc1   :  { %v3203_v2 = vmul.f32 1.442695, %v3191_v28  ;;  %v3184_v11 = vmul.f32 0.17677669, %v3134_v15  ;;  %v3211_v52 = vsel %vm1059_vm10, %v6199_v30, 0.0 }
 0xdc2   :  { %3212 = vadd.xlane.f32.xlu1 %v3211_v52  ;;  %v5717_v29 = vpop.f32.mrf.mxu0 }
 0xdc3   :  { %6206 = vpow2.f32 %v3203_v2  ;;  %v3192_v36 = vadd.f32 %v3184_v11, %v6828_v60 }
 0xdc4   :  { %v6201_v53 = vpop.eup %6200  ;;  %v3172_v4 = vpop.f32.mrf.mxu1 }
 0xdc5   :  { %v3205_v18 = vmul.f32 1.442695, %v3192_v36  ;;  %v3185_v27 = vmul.f32 0.17677669, %v3172_v4  ;;  %v3214_v38 = vsel %vm1059_vm10, %v6201_v53, 0.0 }
 0xdc6   :  { %3215 = vadd.xlane.f32.xlu0 %v3214_v38  ;;  %v5722_v9 = vpop.f32.mrf.mxu1 }
 0xdc7   :  { %6208 = vpow2.f32 %v3205_v18  ;;  %v3193_v31 = vadd.f32 %v3185_v27, %v6834_v14 }
 0xdc8   :  { %v6203_v21 = vpop.eup %6202  ;;  %v3175_v28 = vpop.f32.mrf.mxu1 }
 0xdc9   :  { %v3207_v15 = vmul.f32 1.442695, %v3193_v31  ;;  %v3186_v41 = vmul.f32 0.17677669, %v3175_v28  ;;  %v3217_v52 = vsel %vm1059_vm10, %v6203_v21, 0.0 }
 0xdca   :  { %3218 = vadd.xlane.f32.xlu1 %v3217_v52  ;;  %v5723_v2 = vpop.f32.mrf.mxu1 }
 0xdcb   :  { %6210 = vpow2.f32 %v3207_v15  ;;  %v3194_v11 = vadd.f32 %v3186_v41, %v6834_v14 }
 0xdcc   :  { %v6205_v29 = vpop.eup %6204 }
 0xdcd   :  { %v3209_v36 = vmul.f32 1.442695, %v3194_v11  ;;  %v3220_v4 = vsel %vm1059_vm10, %v6205_v29, 0.0 }
 0xdce   :  { %3221 = vadd.xlane.f32.xlu0 %v3220_v4 }
 0xdcf   :  { %6212 = vpow2.f32 %v3209_v36 }
 0xdd0   :  { %v6207_v18 = vpop.eup %6206 }
 0xdd1   :  { %v3223_v27 = vsel %vm1059_vm10, %v6207_v18, 0.0 }
 0xdd2   :  { %3224 = vadd.xlane.f32.xlu1 %v3223_v27 }
 0xdd4   :  { %v6209_v38 = vpop.eup %6208 }
 0xdd5   :  { %v3226_v9 = vsel %vm1059_vm10, %v6209_v38, 0.0 }
 0xdd6   :  { %3227 = vadd.xlane.f32.xlu0 %v3226_v9 }
 0xdd8   :  { %v6211_v31 = vpop.eup %6210 }
 0xdd9   :  { %v3229_v28 = vsel %vm1059_vm10, %v6211_v31, 0.0 }
 0xdda   :  { %3230 = vadd.xlane.f32.xlu1 %v3229_v28 }
 0xddc   :  { %v6213_v15 = vpop.eup %6212 }
 0xddd   :  { %v3232_v41 = vsel %vm1059_vm10, %v6213_v15, 0.0 }
 0xdde   :  { %3233 = vadd.xlane.f32.xlu0 %v3232_v41 }
 0xe4b   :  { %v3213_v52 = vpop.xlane.xlu1 %3212 }
 0xe4c   :  { %6214 = vrcp.f32 %v3213_v52  ;;  %v8106_v52 = vpack.c.bf16 %v7530_v55, %v7525_v20  ;;  %v8107_v20 = vpack.c.bf16 %v7542_v5, %v7538_v26 }
 0xe4f   :  { %v3216_v2 = vpop.xlane.xlu0 %3215 }
 0xe50   :  { %6216 = vrcp.f32 %v3216_v2 }
 0xe53   :  { %v3219_v11 = vpop.xlane.xlu1 %3218 }
 0xe54   :  { %6218 = vrcp.f32 %v3219_v11 }
 0xe57   :  { %v3222_v36 = vpop.xlane.xlu0 %3221 }
 0xe58   :  { %6220 = vrcp.f32 %v3222_v36 }
 0xe59   :  { %v6215_v4 = vpop.eup %6214 }
 0xe5a   :  { %v3243_v9 = vmul.f32 %v6215_v4, %v6199_v30 }
 0xe5b   :  { %v3225_v27 = vpop.xlane.xlu1 %3224 }
 0xe5c   :  { %6222 = vrcp.f32 %v3225_v27  ;;  %v8108_v27 = vpack.c.bf16 %v7430_v51, %v7424_v42  ;;  %v8111_v42 = vpack.c.bf16 %v7478_v57, %v7472_v43  ;;  %v2928_v51 = vadd.f32 %v7550_v47, %v7416_v48 }
 0xe5d   :  { %v6217_v32 = vpop.eup %6216  ;;  %v8114_v43 = vpack.c.bf16 %v7512_v33, %v7510_v6 }
 0xe5e   :  { %v3244_v23 = vmul.f32 %v6217_v32, %v6201_v53 }
 0xe5f   :  { %v3228_v61 = vpop.xlane.xlu0 %3227 }
 0xe60   :  { %6224 = vrcp.f32 %v3228_v61  ;;  %v3251_v28 = vpack.c.bf16 %v3244_v23, %v3243_v9 }
 0xe61   :  { %v6219_v41 = vpop.eup %6218 }
 0xe62   :  { %5727 = vmatmul.mubr.msk.bf16.vlgmr.msra.gmra.mxu0 %vm1059_vm10, %v3251_v28  ;;  %v3245_v30 = vmul.f32 %v6219_v41, %v6203_v21 }
 0xe63   :  { %5737 = vmatpush3.bf16.msra.mxu0 %v8106_v52  ;;  %v3231_v2 = vpop.xlane.xlu1 %3230  ;;  %5738 = vmatprep.mubr.msk.bf16.mxu0 %vm6316_vm9, %v8096_v0 }
 0xe64   :  { %5748 = vmatprep.subr.bf16.mxu0 %v8096_v0  ;;  %6226 = vrcp.f32 %v3231_v2 }
 0xe65   :  { %v6221_v11 = vpop.eup %6220 }
 0xe66   :  { %v3246_v32 = vmul.f32 %v6221_v11, %v6205_v29 }
 0xe67   :  { %v3234_v53 = vpop.xlane.xlu0 %3233 }
 0xe68   :  { %6228 = vrcp.f32 %v3234_v53  ;;  %v3252_v23 = vpack.c.bf16 %v3246_v32, %v3245_v30 }
 0xe69   :  { %v6223_v61 = vpop.eup %6222 }
 0xe6a   :  { %5733 = vmatmul.mubr.msk.bf16.vlgmr.msra.gmra.mxu1 %vm1059_vm10, %v3252_v23  ;;  %v3247_v36 = vmul.f32 %v6223_v61, %v6207_v18  ;;  %v8109_v18 = vpack.c.bf16 %v7427_v45, %v7421_v63  ;;  %v2924_v63 = vadd.f32 %v7485_v50, %v7416_v48  ;;  %v8115_v48 = vpack.c.bf16 %v7497_v24, %v7494_v44 }
 0xe6b   :  { %5743 = vmatpush3.bf16.msra.mxu1 %v8107_v20  ;;  %5744 = vmatprep.mubr.msk.bf16.mxu1 %vm6316_vm9, %v8096_v0 }
 0xe6c   :  { %5754 = vmatprep.subr.bf16.mxu1 %v8096_v0  ;;  %v3459_v45 = vpack.c.bf16 %v2928_v51, %v2924_v63 }
 0xe6d   :  { %v6225_v55 = vpop.eup %6224 }
 0xe6e   :  { %v3248_v4 = vmul.f32 %v6225_v55, %v6209_v38  ;;  %v8110_v38 = vpack.c.bf16 %v7455_v34, %v7449_v25  ;;  %v8112_v25 = vpack.c.bf16 %v7452_v12, %v7446_v16  ;;  %v8113_v34 = vpack.c.bf16 %v7475_v62, %v7469_v56 }
 0xe6f   :  { %v8116_v16 = vpack.c.bf16 %v7521_v22, %v7519_v13 }
 0xe70   :  { %v3253_v21 = vpack.c.bf16 %v3248_v4, %v3247_v36 }
 0xe71   :  { %v6227_v29 = vpop.eup %6226 }
 0xe72   :  { %5739 = vmatmul.mubr.msk.bf16.vlgmr.msra.gmra.mxu0 %vm1059_vm10, %v3253_v21  ;;  %v3249_v26 = vmul.f32 %v6227_v29, %v6211_v31 }
 0xe73   :  { %5749 = vmatpush3.bf16.xpose.msra.mxu0 %v8108_v27  ;;  %5750 = vmatprep.mubr.msk.bf16.mxu0 %vm6316_vm9, %v8096_v0 }
 0xe74   :  { %5760 = vmatprep.subr.bf16.mxu0 %v8096_v0 }
 0xe75   :  { %v6229_v5 = vpop.eup %6228 }
 0xe76   :  { %v3250_v9 = vmul.f32 %v6229_v5, %v6213_v15 }
 0xe78   :  { %v3254_v28 = vpack.c.bf16 %v3250_v9, %v3249_v26 }
 0xe7a   :  { %5745 = vmatmul.mubr.msk.bf16.vlgmr.msra.gmra.mxu1 %vm1059_vm10, %v3254_v28  ;;  %5751 = vmatmul.mubr.bf16.vlgmr.msra.gmra.mxu0 %v8109_v18 }
 0xe7b   :  { %5755 = vmatpush3.bf16.xpose.msra.mxu1 %v8110_v38  ;;  %5761 = vmatpush3.bf16.xpose.msra.mxu0 %v8111_v42 }
 0xe7c   :  { %5756 = vmatprep.mubr.msk.bf16.mxu1 %vm6316_vm9, %v8096_v0  ;;  %5762 = vmatprep.mubr.msk.bf16.mxu0 %vm6316_vm9, %v8096_v0 }
 0xe7d   :  { %5766 = vmatprep.subr.bf16.mxu1 %v8096_v0  ;;  %5772 = vmatprep.subr.bf16.mxu0 %v8096_v0 }
 0xe82   :  { %5757 = vmatmul.mubr.bf16.vlgmr.msra.gmra.mxu1 %v8112_v25  ;;  %5763 = vmatmul.mubr.bf16.vlgmr.msra.gmra.mxu0 %v8113_v34 }
 0xe83   :  { %5767 = vmatpush3.bf16.xpose.msra.mxu1 %v3459_v45  ;;  %5773 = vmatpush3.bf16.msra.mxu0 %v8114_v43 }
 0xe84   :  { %5768 = vmatprep.mubr.msk.bf16.mxu1 %vm6316_vm9, %v8096_v0  ;;  %5778 = vmatprep.subr.bf16.mxu1 %v8096_v0 }
 0xe85   :  { %5774 = vmatprep.mubr.msk.bf16.mxu0 %vm6316_vm9, %v8096_v0  ;;  %5784 = vmatprep.subr.bf16.mxu0 %v8096_v0 }
 0xe8a   :  { %5769 = vmatmul.mubr.bf16.vlgmr.msra.gmra.mxu1 %v8115_v48 }
 0xe8b   :  { %5779 = vmatpush3.bf16.msra.mxu1 %v8116_v16  ;;  %5780 = vmatprep.mubr.msk.bf16.mxu1 %vm6316_vm9, %v8096_v0 }
 0xe8c   :  { %5790 = vmatprep.subr.bf16.mxu1 %v8096_v0 }
 0xf22   :  { %v7633_v12 = vpop.f32.mrf.mxu0 }
 0xf24   :  { %v5728_v56 = vpop.f32.mrf.mxu0 }
 0xf26   :  { %v7635_v62 = vpop.f32.mrf.mxu0 }
 0xf27   :  { %v3431_v57 = vpack.c.bf16 %v7635_v62, %v7633_v12  ;;  %v6037_v12 = vld [vmem:[%s8056_s8 + $0xa0] sm:$0xff]   ;;  %v6038_v62 = vld [vmem:[%s8056_s8 + $0x98] sm:$0xff]  }
 0xf28   :  { %v5729_v47 = vpop.f32.mrf.mxu0 }
 0xf2a   :  { %v7639_v50 = vpop.f32.mrf.mxu1 }
 0xf2c   :  { %v5734_v44 = vpop.f32.mrf.mxu1 }
 0xf2e   :  { %v7641_v24 = vpop.f32.mrf.mxu1 }
 0xf2f   :  { %v3432_v6 = vpack.c.bf16 %v7641_v24, %v7639_v50  ;;  %v6049_v50 = vld [vmem:[%s8056_s8 + $0xc0] sm:$0xff]  }
 0xf30   :  { %v5735_v33 = vpop.f32.mrf.mxu1 }
 0xf32   :  { %v7645_v13 = vpop.f32.mrf.mxu0 }
 0xf34   :  { %v5740_v22 = vpop.f32.mrf.mxu0 }
 0xf36   :  { %v7647_v31 = vpop.f32.mrf.mxu0 }
 0xf37   :  { %v3433_v15 = vpack.c.bf16 %v7647_v31, %v7645_v13 }
 0xf38   :  { %v5741_v41 = vpop.f32.mrf.mxu0 }
 0xf3a   :  { %v7651_v52 = vpop.f32.mrf.mxu1  ;;  %v3498_v2 = vpop.f32.mrf.mxu0 }
 0xf3b   :  { %v3628_v11 = vmul.f32 0.17677669, %v3498_v2 }
 0xf3c   :  { %v5746_v30 = vpop.f32.mrf.mxu1  ;;  %v5752_v32 = vpop.f32.mrf.mxu0 }
 0xf3d   :  { %v3636_v53 = vadd.f32 %v3628_v11, %v6818_v46 }
 0xf3e   :  { %v7654_v23 = vpop.f32.mrf.mxu1  ;;  %v3501_v61 = vpop.f32.mrf.mxu0 }
 0xf3f   :  { %v3644_v20 = vmul.f32 1.442695, %v3636_v53  ;;  %v3434_v55 = vpack.c.bf16 %v7654_v23, %v7651_v52  ;;  %v3629_v36 = vmul.f32 0.17677669, %v3501_v61 }
 0xf40   :  { %v5747_v4 = vpop.f32.mrf.mxu1  ;;  %v5753_v21 = vpop.f32.mrf.mxu0 }
 0xf41   :  { %6230 = vpow2.f32 %v3644_v20  ;;  %v3637_v29 = vadd.f32 %v3629_v36, %v6818_v46 }
 0xf42   :  { %v3539_v27 = vpop.f32.mrf.mxu1  ;;  %v3580_v5 = vpop.f32.mrf.mxu0 }
 0xf43   :  { %v3646_v26 = vmul.f32 1.442695, %v3637_v29  ;;  %v3630_v9 = vmul.f32 0.17677669, %v3539_v27  ;;  %v3632_v28 = vmul.f32 0.17677669, %v3580_v5 }
 0xf44   :  { %v5758_v18 = vpop.f32.mrf.mxu1  ;;  %v5764_v38 = vpop.f32.mrf.mxu0 }
 0xf45   :  { %6232 = vpow2.f32 %v3646_v26  ;;  %v3638_v42 = vadd.f32 %v3630_v9, %v6823_v7  ;;  %v3640_v51 = vadd.f32 %v3632_v28, %v6828_v60 }
 0xf46   :  { %v3542_v63 = vpop.f32.mrf.mxu1  ;;  %v3583_v45 = vpop.f32.mrf.mxu0 }
 0xf47   :  { %v3648_v25 = vmul.f32 1.442695, %v3638_v42  ;;  %v3652_v34 = vmul.f32 1.442695, %v3640_v51  ;;  %v3631_v43 = vmul.f32 0.17677669, %v3542_v63 }
 0xf48   :  { %v3633_v48 = vmul.f32 0.17677669, %v3583_v45  ;;  %v5759_v16 = vpop.f32.mrf.mxu1  ;;  %v5765_v46 = vpop.f32.mrf.mxu0 }
 0xf49   :  { %6234 = vpow2.f32 %v3648_v25  ;;  %v3639_v56 = vadd.f32 %v3631_v43, %v6823_v7 }
 0xf4a   :  { %v3641_v47 = vadd.f32 %v3633_v48, %v6828_v60  ;;  %v3621_v44 = vpop.f32.mrf.mxu1  ;;  %6236 = vpow2.f32 %v3652_v34 }
 0xf4b   :  { %v3650_v33 = vmul.f32 1.442695, %v3639_v56  ;;  %v3634_v22 = vmul.f32 0.17677669, %v3621_v44 }
 0xf4c   :  { %v3654_v41 = vmul.f32 1.442695, %v3641_v47  ;;  %v5770_v2 = vpop.f32.mrf.mxu1 }
 0xf4d   :  { %6238 = vpow2.f32 %v3650_v33  ;;  %v3642_v11 = vadd.f32 %v3634_v22, %v6834_v14  ;;  %v6042_v2 = vld [vmem:[%s8056_s8 + $0xf8] sm:$0xff]  }
 0xf4e   :  { %v6231_v30 = vpop.eup %6230  ;;  %v3624_v32 = vpop.f32.mrf.mxu1  ;;  %6240 = vpow2.f32 %v3654_v41 }
 0xf4f   :  { %v3656_v53 = vmul.f32 1.442695, %v3642_v11  ;;  %v3635_v61 = vmul.f32 0.17677669, %v3624_v32  ;;  %v3660_v20 = vsel %vm1059_vm10, %v6231_v30, 0.0  ;;  %v8117_v11 = vpack.c.bf16 %v7534_v10, %v7528_v8 }
 0xf50   :  { %3661 = vadd.xlane.f32.xlu1 %v3660_v20  ;;  %v5771_v7 = vpop.f32.mrf.mxu1  ;;  %v8118_v10 = vpack.c.bf16 %v7546_v49, %v7540_v58  ;;  %v6035_v49 = vld [vmem:[%s8056_s8 + $0xb0] sm:$0xff]   ;;  %v6044_v58 = vld [vmem:[%s8056_s8 + $0xe8] sm:$0xff]  }
 0xf51   :  { %6242 = vpow2.f32 %v3656_v53  ;;  %v3643_v60 = vadd.f32 %v3635_v61, %v6834_v14 }
 0xf52   :  { %v6233_v36 = vpop.eup %6232 }
 0xf53   :  { %v3658_v4 = vmul.f32 1.442695, %v3643_v60  ;;  %v3663_v21 = vsel %vm1059_vm10, %v6233_v36, 0.0 }
 0xf54   :  { %3664 = vadd.xlane.f32.xlu0 %v3663_v21 }
 0xf55   :  { %6244 = vpow2.f32 %v3658_v4 }
 0xf56   :  { %v6235_v29 = vpop.eup %6234 }
 0xf57   :  { %v3666_v27 = vsel %vm1059_vm10, %v6235_v29, 0.0  ;;  %v6237_v5 = vpop.eup %6236 }
 0xf58   :  { %3667 = vadd.xlane.f32.xlu1 %v3666_v27  ;;  %v3672_v9 = vsel %vm1059_vm10, %v6237_v5, 0.0 }
 0xf5a   :  { %v6239_v26 = vpop.eup %6238 }
 0xf5b   :  { %v3669_v28 = vsel %vm1059_vm10, %v6239_v26, 0.0  ;;  %v6241_v18 = vpop.eup %6240 }
 0xf5c   :  { %3673 = vadd.xlane.f32.xlu1 %v3672_v9  ;;  %3670 = vadd.xlane.f32.xlu0 %v3669_v28  ;;  %v3675_v38 = vsel %vm1059_vm10, %v6241_v18, 0.0 }
 0xf5e   :  { %v6243_v14 = vpop.eup %6242 }
 0xf5f   :  { %v3678_v42 = vsel %vm1059_vm10, %v6243_v14, 0.0 }
 0xf60   :  { %3676 = vadd.xlane.f32.xlu0 %v3675_v38  ;;  %3679 = vadd.xlane.f32.xlu1 %v3678_v42  ;;  %v6046_v38 = vld [vmem:[%s8056_s8 + $0xd8] sm:$0xff]   ;;  %v6040_v42 = vld [vmem:[%s8056_s8 + $0x88] sm:$0xff]  }
 0xf62   :  { %v6245_v51 = vpop.eup %6244 }
 0xf63   :  { %v3681_v63 = vsel %vm1059_vm10, %v6245_v51, 0.0 }
 0xf64   :  { %3682 = vadd.xlane.f32.xlu0 %v3681_v63  ;;  %v6047_v63 = vld [vmem:[%s8056_s8 + $0xd0] sm:$0xff]  }
 0xfd9   :  { %v3662_v45 = vpop.xlane.xlu1 %3661 }
 0xfda   :  { %6246 = vrcp.f32 %v3662_v45  ;;  %v6048_v45 = vld [vmem:[%s8056_s8 + $0xc8] sm:$0xff]  }
 0xfdd   :  { %v3665_v25 = vpop.xlane.xlu0 %3664 }
 0xfde   :  { %6248 = vrcp.f32 %v3665_v25 }
 0xfe1   :  { %v3668_v34 = vpop.xlane.xlu1 %3667 }
 0xfe2   :  { %6250 = vrcp.f32 %v3668_v34 }
 0xfe5   :  { %v3674_v43 = vpop.xlane.xlu1 %3673  ;;  %v3671_v48 = vpop.xlane.xlu0 %3670 }
 0xfe6   :  { %6252 = vrcp.f32 %v3671_v48 }
 0xfe7   :  { %6254 = vrcp.f32 %v3674_v43  ;;  %v6247_v16 = vpop.eup %6246 }
 0xfe8   :  { %v3692_v44 = vmul.f32 %v6247_v16, %v6231_v30 }
 0xfe9   :  { %v3677_v46 = vpop.xlane.xlu0 %3676  ;;  %v3680_v56 = vpop.xlane.xlu1 %3679 }
 0xfea   :  { %6256 = vrcp.f32 %v3677_v46 }
 0xfeb   :  { %v6249_v47 = vpop.eup %6248  ;;  %6258 = vrcp.f32 %v3680_v56 }
 0xfec   :  { %v3693_v33 = vmul.f32 %v6249_v47, %v6233_v36  ;;  %v6034_v36 = vld [vmem:[%s8056_s8 + $0xb8] sm:$0xff]  }
 0xfed   :  { %v3683_v22 = vpop.xlane.xlu0 %3682 }
 0xfee   :  { %v3700_v41 = vpack.c.bf16 %v3693_v33, %v3692_v44  ;;  %6260 = vrcp.f32 %v3683_v22 }
 0xfef   :  { %v6251_v32 = vpop.eup %6250 }
 0xff0   :  { %5775 = vmatmul.mubr.msk.bf16.vlgmr.msra.gmra.mxu0 %vm1059_vm10, %v3700_v41  ;;  %v3694_v61 = vmul.f32 %v6251_v32, %v6235_v29  ;;  %v6043_v29 = vld [vmem:[%s8056_s8 + $0xf0] sm:$0xff]  }
 0xff1   :  { %5785 = vmatpush3.bf16.msra.mxu0 %v8117_v11  ;;  %5786 = vmatprep.mubr.msk.bf16.mxu0 %vm6316_vm9, %v8096_v0 }
 0xff2   :  { %5796 = vmatprep.subr.bf16.mxu0 %v6042_v2 }
 0xff3   :  { %v6253_v30 = vpop.eup %6252 }
 0xff4   :  { %v6255_v53 = vpop.eup %6254  ;;  %v3695_v20 = vmul.f32 %v6253_v30, %v6239_v26 }
 0xff5   :  { %v3696_v4 = vmul.f32 %v6255_v53, %v6237_v5 }
 0xff6   :  { %v3701_v60 = vpack.c.bf16 %v3695_v20, %v3694_v61  ;;  %v7750_v61 = vld [vmem:[%s8057_s11 + $0x8] sm:$0x3f] }
 0xff7   :  { %v6257_v7 = vpop.eup %6256 }
 0xff8   :  { %v3697_v21 = vmul.f32 %v6257_v7, %v6241_v18  ;;  %v6259_v27 = vpop.eup %6258  ;;  %5781 = vmatmul.mubr.msk.bf16.vlgmr.msra.gmra.mxu1 %vm1059_vm10, %v3701_v60  ;;  %v6045_v18 = vld [vmem:[%s8056_s8 + $0xe0] sm:$0xff]  }
 0xff9   :  { %5791 = vmatpush3.bf16.msra.mxu1 %v8118_v10  ;;  %5792 = vmatprep.mubr.msk.bf16.mxu1 %vm6316_vm9, %v8096_v0  ;;  %v3698_v9 = vmul.f32 %v6259_v27, %v6243_v14  ;;  %v6036_v14 = vld [vmem:[%s8056_s8 + $0xa8] sm:$0xff]   ;;  %v4138_v27 = vrot.slane %v7750_v61, %v6497_v37 }
 0xffa   :  { %v3702_v8 = vpack.c.bf16 %v3697_v21, %v3696_v4  ;;  %5820 = vmatprep.subr.bf16.mxu1 %v6034_v36 }
 0xffb   :  { %v6261_v26 = vpop.eup %6260 }
 0xffc   :  { %v3699_v5 = vmul.f32 %v6261_v26, %v6245_v51  ;;  %5787 = vmatmul.mubr.msk.bf16.vlgmr.msra.gmra.mxu0 %vm1059_vm10, %v3702_v8  ;;  %v6041_v51 = vld [vmem:[%s8056_s8 + $0x80] sm:$0xff]  }
 0xffd   :  { %5797 = vmatpush3.bf16.msra.mxu0 %v6042_v2 }
 0xffe   :  { %v3703_v28 = vpack.c.bf16 %v3699_v5, %v3698_v9  ;;  %5798 = vmatprep.subr.bf16.mxu0 %v6043_v29 }
0x1000   :  { %5793 = vmatmul.mubr.msk.bf16.vlgmr.msra.gmra.mxu1 %vm1059_vm10, %v3703_v28 }
0x1001   :  { %5799 = vmatpush3.bf16.msra.mxu0 %v6043_v29  ;;  %5821 = vmatpush3.bf16.msra.mxu1 %v6034_v36 }
0x1002   :  { %5836 = vmatprep.mubr.bf16.mxu1 %v3431_v57  ;;  %5822 = vmatprep.subr.bf16.mxu1 %v6035_v49  ;;  %v6039_v57 = vld [vmem:[%s8056_s8 + $0x90] sm:$0xff]  }
0x1003   :  { %5800 = vmatprep.subr.bf16.mxu0 %v6044_v58 }
0x1005   :  { %5801 = vmatpush3.bf16.msra.mxu0 %v6044_v58  ;;  %5823 = vmatpush3.bf16.msra.mxu1 %v6035_v49 }
0x1006   :  { %5802 = vmatprep.subr.bf16.mxu0 %v6045_v18  ;;  %5824 = vmatprep.subr.bf16.mxu1 %v6036_v14 }
0x1009   :  { %5803 = vmatpush3.bf16.msra.mxu0 %v6045_v18  ;;  %5825 = vmatpush3.bf16.msra.mxu1 %v6036_v14 }
0x100a   :  { %5804 = vmatprep.subr.bf16.mxu0 %v6046_v38  ;;  %5826 = vmatprep.subr.bf16.mxu1 %v6037_v12 }
0x100d   :  { %5805 = vmatpush3.bf16.msra.mxu0 %v6046_v38  ;;  %5827 = vmatpush3.bf16.msra.mxu1 %v6037_v12 }
0x100e   :  { %5828 = vmatprep.subr.bf16.mxu1 %v6038_v62  ;;  %5806 = vmatprep.subr.bf16.mxu0 %v6047_v63 }
0x1011   :  { %5829 = vmatpush3.bf16.msra.mxu1 %v6038_v62  ;;  %5807 = vmatpush3.bf16.msra.mxu0 %v6047_v63 }
0x1012   :  { %5830 = vmatprep.subr.bf16.mxu1 %v6039_v57  ;;  %5808 = vmatprep.subr.bf16.mxu0 %v6048_v45 }
0x1015   :  { %5831 = vmatpush3.bf16.msra.mxu1 %v6039_v57  ;;  %5809 = vmatpush3.bf16.msra.mxu0 %v6048_v45 }
0x1016   :  { %5832 = vmatprep.subr.bf16.mxu1 %v6040_v42  ;;  %5810 = vmatprep.subr.bf16.mxu0 %v6049_v50 }
0x1019   :  { %5833 = vmatpush3.bf16.msra.mxu1 %v6040_v42  ;;  %5811 = vmatpush3.bf16.msra.mxu0 %v6049_v50 }
0x101a   :  { %5834 = vmatprep.subr.bf16.mxu1 %v6041_v51 }
0x101d   :  { %5835 = vmatpush3.bf16.msra.mxu1 %v6041_v51 }
0x1020   :  { %5837 = vmatmul.mubr.bf16.vlgmr.msra.gmra.mxu1 %v3432_v6 }
0x1021   :  { %5840 = vmatprep.mubr.bf16.mxu1 %v3433_v15 }
0x1028   :  { %5841 = vmatmul.mubr.bf16.gmra.mxu1 %v3434_v55 }
0x10b0   :  { %v3741_v24 = vpop.f32.mrf.mxu0 }
0x10b2   :  { %v5776_v6 = vpop.f32.mrf.mxu0 }
0x10b4   :  { %v3744_v13 = vpop.f32.mrf.mxu0 }
0x10b5   :  { %v3880_v31 = vpack.c.bf16 %v3744_v13, %v3741_v24 }
0x10b6   :  { %v5777_v15 = vpop.f32.mrf.mxu0 }
0x10b7   :  { %5812 = vmatprep.mubr.bf16.mxu0 %v3880_v31 }
0x10b8   :  { %v3785_v52 = vpop.f32.mrf.mxu1 }
0x10ba   :  { %v5782_v23 = vpop.f32.mrf.mxu1 }
0x10bc   :  { %v3829_v55 = vpop.f32.mrf.mxu0  ;;  %v3788_v25 = vpop.f32.mrf.mxu1 }
0x10bd   :  { %v3881_v34 = vpack.c.bf16 %v3788_v25, %v3785_v52 }
0x10be   :  { %v5788_v43 = vpop.f32.mrf.mxu0  ;;  %v5783_v48 = vpop.f32.mrf.mxu1 }
0x10bf   :  { %5813 = vmatmul.mubr.bf16.vlgmr.msra.gmra.mxu0 %v3881_v34 }
0x10c0   :  { %v3832_v16 = vpop.f32.mrf.mxu0  ;;  %v3873_v56 = vpop.f32.mrf.mxu1 }
0x10c1   :  { %v3882_v46 = vpack.c.bf16 %v3832_v16, %v3829_v55 }
0x10c2   :  { %v5789_v47 = vpop.f32.mrf.mxu0  ;;  %v5794_v44 = vpop.f32.mrf.mxu1 }
0x10c3   :  { %5816 = vmatprep.mubr.bf16.mxu0 %v3882_v46 }
0x10c4   :  { %v3876_v33 = vpop.f32.mrf.mxu1 }
0x10c5   :  { %v3883_v22 = vpack.c.bf16 %v3876_v33, %v3873_v56 }
0x10c6   :  { %v5795_v41 = vpop.f32.mrf.mxu1 }
0x10c7   :  { %5817 = vmatmul.mubr.bf16.gmra.mxu0 %v3883_v22 }
0x10e0   :  { %v5838_v2 = vpop.f32.mrf.mxu1 }
0x10e2   :  { %v4096_v11 = vpop.f32.mrf.mxu1 }
0x10e4   :  { %v5839_v32 = vpop.f32.mrf.mxu1 }
0x10e6   :  { %v4099_v30 = vpop.f32.mrf.mxu1 }
0x10e8   :  { %v5842_v7 = vpop.f32.mrf.mxu1 }
0x10ea   :  { %v4112_v29 = vpop.f32.mrf.mxu1 }
0x10ec   :  { %v5843_v38 = vpop.f32.mrf.mxu1 }
0x117f   :  { %v5814_v53 = vpop.f32.mrf.mxu0 }
0x1180   :  { %v4105_v20 = vadd.f32 %v5838_v2, %v5814_v53 }
0x1181   :  { %v3983_v60 = vpop.f32.mrf.mxu0 }
0x1182   :  { %v4097_v36 = vadd.f32 %v4096_v11, %v3983_v60  ;;  %v4129_v4 = vadd.f32 %v4105_v20, %v7346_v40 }
0x1183   :  { %v5815_v21 = vpop.f32.mrf.mxu0 }
0x1184   :  { %v4127_v8 = vadd.f32 %v4097_v36, %v7317_v59  ;;  %v4108_v10 = vadd.f32 %v5839_v32, %v5815_v21  ;;  %v4141_v58 = vadd.f32 %v4138_v27, %v4129_v4 }
0x1185   :  { %v3986_v26 = vpop.f32.mrf.mxu0 }
0x1186   :  { %v4100_v9 = vadd.f32 %v4099_v30, %v3986_v26  ;;  %v4139_v5 = vadd.f32 %v4138_v27, %v4127_v8  ;;  %v4130_v28 = vadd.f32 %v4108_v10, %v7337_v39  ;;  %v4153_v57 = vsel %vm260_vm8, %v4141_v58, 0.0 }
0x1187   :  { %v5818_v49 = vpop.f32.mrf.mxu0 }
0x1188   :  { %v4128_v18 = vadd.f32 %v4100_v9, %v7319_v19  ;;  %v4121_v14 = vadd.f32 %v5842_v7, %v5818_v49  ;;  %v4147_v40 = vsel %vm260_vm8, %v4139_v5, 0.0  ;;  %v4142_v42 = vadd.f32 %v4138_v27, %v4130_v28  ;;  %v4115_v19 = vpop.f32.mrf.mxu1 }
0x1189   :  { %v3999_v12 = vpop.f32.mrf.mxu0  ;;  %4148 = vadd.xlane.f32.xlu1 %v4147_v40 }
0x118a   :  { %v4113_v37 = vadd.f32 %v4112_v29, %v3999_v12  ;;  %v4140_v62 = vadd.f32 %v4138_v27, %v4128_v18  ;;  %v4133_v51 = vadd.f32 %v4121_v14, %v7383_v3  ;;  %v4156_v13 = vsel %vm260_vm8, %v4142_v42, 0.0 }
0x118b   :  { %v5819_v59 = vpop.f32.mrf.mxu0 }
0x118c   :  { %v4131_v39 = vadd.f32 %v4113_v37, %v7369_v1  ;;  %v4124_v63 = vadd.f32 %v5843_v38, %v5819_v59  ;;  %v4150_v45 = vsel %vm260_vm8, %v4140_v62, 0.0  ;;  %v4145_v3 = vadd.f32 %v4138_v27, %v4133_v51  ;;  %v6050_v59 = vld [vmem:[%s8058_s9 + $0x38] sm:$0xff]   ;;  %v6053_v51 = vld [vmem:[%s8058_s9 + $0x20] sm:$0xff]  }
0x118d   :  { %v4002_v50 = vpop.f32.mrf.mxu0  ;;  %4151 = vadd.xlane.f32.xlu0 %v4150_v45  ;;  %4154 = vadd.xlane.f32.xlu1 %v4153_v57  ;;  %v6051_v57 = vld [vmem:[%s8058_s9 + $0x30] sm:$0xff]  }
0x118e   :  { %v4116_v24 = vadd.f32 %v4115_v19, %v4002_v50  ;;  %v4143_v6 = vadd.f32 %v4138_v27, %v4131_v39  ;;  %v4134_v31 = vadd.f32 %v4124_v63, %v7381_v54  ;;  %v4165_v55 = vsel %vm260_vm8, %v4145_v3, 0.0  ;;  %5844 = vmatprep.subr.bf16.mxu0 %v6050_v59 }
0x118f   :  { %5845 = vmatpush3.bf16.msra.mxu0 %v6050_v59 }
0x1190   :  { %v4132_v15 = vadd.f32 %v4116_v24, %v7363_v17  ;;  %v4159_v52 = vsel %vm260_vm8, %v4143_v6, 0.0  ;;  %v4146_v25 = vadd.f32 %v4138_v27, %v4134_v31  ;;  %5846 = vmatprep.subr.bf16.mxu0 %v6051_v57 }
0x1191   :  { %4157 = vadd.xlane.f32.xlu0 %v4156_v13  ;;  %4160 = vadd.xlane.f32.xlu1 %v4159_v52 }
0x1192   :  { %v4144_v1 = vadd.f32 %v4138_v27, %v4132_v15  ;;  %v4168_v34 = vsel %vm260_vm8, %v4146_v25, 0.0 }
0x1193   :  { %5847 = vmatpush3.bf16.msra.mxu0 %v6051_v57 }
0x1194   :  { %v4162_v23 = vsel %vm260_vm8, %v4144_v1, 0.0 }
0x1195   :  { %4163 = vadd.xlane.f32.xlu0 %v4162_v23  ;;  %4166 = vadd.xlane.f32.xlu1 %v4165_v55 }
0x1199   :  { %4169 = vadd.xlane.f32.xlu0 %v4168_v34 }
0x1212   :  { %v4149_v43 = vpop.xlane.xlu1 %4148 }
0x1213   :  { %v4171_v54 = vmul.f32 0.015625, %v4149_v43 }
0x1215   :  { %v7770_v48 = vsub.f32 %v4139_v5, %v4171_v54 }
0x1216   :  { %v4152_v17 = vpop.xlane.xlu0 %4151  ;;  %v4155_v16 = vpop.xlane.xlu1 %4154 }
0x1217   :  { %v4172_v46 = vmul.f32 0.015625, %v4152_v17  ;;  %v4173_v56 = vmul.f32 0.015625, %v4155_v16  ;;  %v4187_v47 = vmul.f32 %v7770_v48, %v7770_v48 }
0x1219   :  { %v7774_v44 = vsub.f32 %v4140_v62, %v4172_v46  ;;  %v7776_v33 = vsub.f32 %v4141_v58, %v4173_v56  ;;  %v4195_v22 = vsel %vm260_vm8, %v4187_v47, 0.0 }
0x121a   :  { %v4158_v41 = vpop.xlane.xlu0 %4157  ;;  %4196 = vadd.xlane.f32.xlu1 %v4195_v22  ;;  %v4161_v2 = vpop.xlane.xlu1 %4160  ;;  %v4254_v22 = vrot.slane %v7750_v61, %v6615_v35 }
0x121b   :  { %v4174_v11 = vmul.f32 0.015625, %v4158_v41  ;;  %v4175_v32 = vmul.f32 0.015625, %v4161_v2  ;;  %v4188_v30 = vmul.f32 %v7774_v44, %v7774_v44  ;;  %v4189_v53 = vmul.f32 %v7776_v33, %v7776_v33 }
0x121d   :  { %v7783_v20 = vsub.f32 %v4142_v42, %v4174_v11  ;;  %v7785_v7 = vsub.f32 %v4143_v6, %v4175_v32  ;;  %v4198_v60 = vsel %vm260_vm8, %v4188_v30, 0.0  ;;  %v4201_v36 = vsel %vm260_vm8, %v4189_v53, 0.0  ;;  %v6052_v42 = vld [vmem:[%s8058_s9 + $0x28] sm:$0xff]   ;;  %v8119_v30 = vld [vmem:[#allocation5_spill] sm:$0xff] }
0x121e   :  { %4199 = vadd.xlane.f32.xlu0 %v4198_v60  ;;  %v4164_v4 = vpop.xlane.xlu0 %4163  ;;  %4202 = vadd.xlane.f32.xlu1 %v4201_v36  ;;  %v4167_v21 = vpop.xlane.xlu1 %4166  ;;  %v4266_v53 = vrot.slane %v7750_v61, %v8119_v30 }
0x121f   :  { %v4176_v27 = vmul.f32 0.015625, %v4164_v4  ;;  %v4177_v8 = vmul.f32 0.015625, %v4167_v21  ;;  %v4190_v10 = vmul.f32 %v7783_v20, %v7783_v20  ;;  %v4191_v29 = vmul.f32 %v7785_v7, %v7785_v7  ;;  %5848 = vmatprep.subr.bf16.mxu0 %v6052_v42 }
0x1220   :  { %5849 = vmatpush3.bf16.msra.mxu0 %v6052_v42 }
0x1221   :  { %v7793_v26 = vsub.f32 %v4144_v1, %v4176_v27  ;;  %v7795_v9 = vsub.f32 %v4145_v3, %v4177_v8  ;;  %v4204_v5 = vsel %vm260_vm8, %v4190_v10, 0.0  ;;  %v4207_v28 = vsel %vm260_vm8, %v4191_v29, 0.0  ;;  %5850 = vmatprep.subr.bf16.mxu0 %v6053_v51 }
0x1222   :  { %4205 = vadd.xlane.f32.xlu0 %v4204_v5  ;;  %v4170_v49 = vpop.xlane.xlu0 %4169  ;;  %4208 = vadd.xlane.f32.xlu1 %v4207_v28 }
0x1223   :  { %v4178_v58 = vmul.f32 0.015625, %v4170_v49  ;;  %v4192_v18 = vmul.f32 %v7793_v26, %v7793_v26  ;;  %v4193_v14 = vmul.f32 %v7795_v9, %v7795_v9 }
0x1224   :  { %5851 = vmatpush3.bf16.msra.mxu0 %v6053_v51 }
0x1225   :  { %v7803_v40 = vsub.f32 %v4146_v25, %v4178_v58  ;;  %v4210_v38 = vsel %vm260_vm8, %v4192_v18, 0.0  ;;  %v4213_v12 = vsel %vm260_vm8, %v4193_v14, 0.0  ;;  %5884 = vmatprep.subr.mxu0 %v8096_v0 }
0x1226   :  { %4211 = vadd.xlane.f32.xlu0 %v4210_v38  ;;  %4214 = vadd.xlane.f32.xlu1 %v4213_v12 }
0x1227   :  { %v4194_v37 = vmul.f32 %v7803_v40, %v7803_v40 }
0x1229   :  { %v4216_v62 = vsel %vm260_vm8, %v4194_v37, 0.0 }
0x122a   :  { %4217 = vadd.xlane.f32.xlu0 %v4216_v62 }
0x12a3   :  { %v4197_v39 = vpop.xlane.xlu1 %4196 }
0x12a4   :  { %v4219_v63 = vmul.f32 0.015625, %v4197_v39 }
0x12a6   :  { %v4227_v45 = vadd.f32 1e-12, %v4219_v63  ;;  %v6054_v63 = vld [vmem:[%s8059_s10 + $0x78] sm:$0xff]  }
0x12a7   :  { %v4200_v19 = vpop.xlane.xlu0 %4199  ;;  %v4203_v50 = vpop.xlane.xlu1 %4202  ;;  %5860 = vmatprep.subr.bf16.mxu1 %v6054_v63 }
0x12a8   :  { %6262 = vrsqrt.f32 %v4227_v45  ;;  %v4220_v24 = vmul.f32 0.015625, %v4200_v19  ;;  %v4221_v6 = vmul.f32 0.015625, %v4203_v50  ;;  %5861 = vmatpush3.bf16.msra.mxu1 %v6054_v63  ;;  %v6055_v45 = vld [vmem:[%s8059_s10 + $0x70] sm:$0xff]   ;;  %v6056_v19 = vld [vmem:[%s8059_s10 + $0x68] sm:$0xff]   ;;  %v6057_v50 = vld [vmem:[%s8059_s10 + $0x60] sm:$0xff]  }
0x12a9   :  { %5862 = vmatprep.subr.bf16.mxu1 %v6055_v45 }
0x12aa   :  { %v4228_v13 = vadd.f32 1e-12, %v4220_v24  ;;  %v4229_v31 = vadd.f32 1e-12, %v4221_v6  ;;  %v6058_v24 = vld [vmem:[%s8059_s10 + $0x58] sm:$0xff]   ;;  %v6059_v6 = vld [vmem:[%s8059_s10 + $0x50] sm:$0xff]  }
0x12ab   :  { %v4206_v15 = vpop.xlane.xlu0 %4205  ;;  %v4209_v52 = vpop.xlane.xlu1 %4208 }
0x12ac   :  { %6264 = vrsqrt.f32 %v4228_v13  ;;  %v4222_v3 = vmul.f32 0.015625, %v4206_v15  ;;  %v4223_v1 = vmul.f32 0.015625, %v4209_v52  ;;  %5863 = vmatpush3.bf16.msra.mxu1 %v6055_v45  ;;  %v6060_v13 = vld [vmem:[%s8059_s10 + $0x48] sm:$0xff]   ;;  %v5230_v15 = vld [vmem:[%s8060_s12 + $0x1] ss:$0 sm:$0xff] }
0x12ad   :  { %6266 = vrsqrt.f32 %v4229_v31  ;;  %5864 = vmatprep.subr.bf16.mxu1 %v6056_v19  ;;  %v6061_v31 = vld [vmem:[%s8059_s10 + $0x40] sm:$0xff]  }
0x12ae   :  { %v4230_v23 = vadd.f32 1e-12, %v4222_v3  ;;  %v4231_v55 = vadd.f32 1e-12, %v4223_v1 }
0x12af   :  { %v4212_v25 = vpop.xlane.xlu0 %4211  ;;  %v4215_v34 = vpop.xlane.xlu1 %4214 }
0x12b0   :  { %6268 = vrsqrt.f32 %v4230_v23  ;;  %v4224_v43 = vmul.f32 0.015625, %v4212_v25  ;;  %v4225_v54 = vmul.f32 0.015625, %v4215_v34  ;;  %5865 = vmatpush3.bf16.msra.mxu1 %v6056_v19 }
0x12b1   :  { %6270 = vrsqrt.f32 %v4231_v55  ;;  %5866 = vmatprep.subr.bf16.mxu1 %v6057_v50 }
0x12b2   :  { %v4232_v17 = vadd.f32 1e-12, %v4224_v43  ;;  %v4233_v16 = vadd.f32 1e-12, %v4225_v54 }
0x12b3   :  { %v4218_v46 = vpop.xlane.xlu0 %4217 }
0x12b4   :  { %6272 = vrsqrt.f32 %v4232_v17  ;;  %v4226_v56 = vmul.f32 0.015625, %v4218_v46  ;;  %5867 = vmatpush3.bf16.msra.mxu1 %v6057_v50 }
0x12b5   :  { %v6263_v47 = vpop.eup %6262  ;;  %6274 = vrsqrt.f32 %v4233_v16  ;;  %5868 = vmatprep.subr.bf16.mxu1 %v6058_v24 }
0x12b6   :  { %v4234_v41 = vadd.f32 1e-12, %v4226_v56  ;;  %v4243_v2 = vmul.f32 %v6263_v47, %v7770_v48 }
0x12b8   :  { %6276 = vrsqrt.f32 %v4234_v41  ;;  %v4255_v36 = vmul.f32 %v4254_v22, %v4243_v2  ;;  %5869 = vmatpush3.bf16.msra.mxu1 %v6058_v24 }
0x12b9   :  { %v6265_v11 = vpop.eup %6264  ;;  %5870 = vmatprep.subr.bf16.mxu1 %v6059_v6 }
0x12ba   :  { %v6267_v32 = vpop.eup %6266  ;;  %v4244_v60 = vmul.f32 %v6265_v11, %v7774_v44  ;;  %v7831_v29 = vadd.f32 %v4266_v53, %v4255_v36 }
0x12bb   :  { %v4245_v4 = vmul.f32 %v6267_v32, %v7776_v33 }
0x12bc   :  { %v4256_v21 = vmul.f32 %v4254_v22, %v4244_v60  ;;  %5871 = vmatpush3.bf16.msra.mxu1 %v6059_v6 }
0x12bd   :  { %v6269_v27 = vpop.eup %6268  ;;  %v4257_v10 = vmul.f32 %v4254_v22, %v4245_v4  ;;  %5872 = vmatprep.subr.bf16.mxu1 %v6060_v13 }
0x12be   :  { %v6271_v8 = vpop.eup %6270  ;;  %v4246_v35 = vmul.f32 %v6269_v27, %v7783_v20  ;;  %v7833_v48 = vadd.f32 %v4266_v53, %v4256_v21 }
0x12bf   :  { %v4247_v5 = vmul.f32 %v6271_v8, %v7785_v7  ;;  %v7838_v18 = vadd.f32 %v4266_v53, %v4257_v10 }
0x12c0   :  { %v4258_v28 = vmul.f32 %v4254_v22, %v4246_v35  ;;  %v4275_v49 = vpack.c.bf16 %v7833_v48, %v7831_v29  ;;  %5873 = vmatpush3.bf16.msra.mxu1 %v6060_v13 }
0x12c1   :  { %v6273_v44 = vpop.eup %6272  ;;  %v4259_v14 = vmul.f32 %v4254_v22, %v4247_v5  ;;  %5874 = vmatprep.subr.bf16.mxu1 %v6061_v31 }
0x12c2   :  { %v6275_v58 = vpop.eup %6274  ;;  %v7840_v33 = vadd.f32 %v4266_v53, %v4258_v28  ;;  %5852 = vmatprep.mubr.msk.bf16.mxu0 %vm260_vm8, %v4275_v49  ;;  %v4248_v20 = vmul.f32 %v6273_v44, %v7793_v26 }
0x12c3   :  { %v4249_v38 = vmul.f32 %v6275_v58, %v7795_v9  ;;  %v7849_v59 = vadd.f32 %v4266_v53, %v4259_v14 }
0x12c4   :  { %v4276_v7 = vpack.c.bf16 %v7840_v33, %v7838_v18  ;;  %v4260_v12 = vmul.f32 %v4254_v22, %v4248_v20  ;;  %5875 = vmatpush3.bf16.msra.mxu1 %v6061_v31 }
0x12c5   :  { %v6277_v37 = vpop.eup %6276  ;;  %v4261_v42 = vmul.f32 %v4254_v22, %v4249_v38  ;;  %5915 = vmatprep.subr.bf16.mxu1 %v8096_v0 }
0x12c6   :  { %v4250_v62 = vmul.f32 %v6277_v37, %v7803_v40  ;;  %5853 = vmatmul.mubr.msk.bf16.vlgmr.msra.gmra.mxu0 %vm260_vm8, %v4276_v7  ;;  %v7851_v57 = vadd.f32 %v4266_v53, %v4260_v12 }
0x12c7   :  { %v7856_v9 = vadd.f32 %v4266_v53, %v4261_v42 }
0x12c8   :  { %v4277_v26 = vpack.c.bf16 %v7851_v57, %v7849_v59  ;;  %v4262_v51 = vmul.f32 %v4254_v22, %v4250_v62 }
0x12ca   :  { %5856 = vmatprep.mubr.msk.bf16.mxu0 %vm260_vm8, %v4277_v26  ;;  %v7858_v39 = vadd.f32 %v4266_v53, %v4262_v51 }
0x12cc   :  { %v4278_v40 = vpack.c.bf16 %v7858_v39, %v7856_v9 }
0x12ce   :  { %5857 = vmatmul.mubr.msk.bf16.gmra.mxu0 %vm260_vm8, %v4278_v40 }
0x12cf   :  { %5900 = vmatprep.mubr.msk.f32.mxu0 %vm6316_vm9, %v8096_v0 }
0x1386   :  { %v5854_v52 = vpop.f32.mrf.mxu0 }
0x1387   :  { %v7893_v3 = vadd.f32 %v5854_v52, %v5230_v15 }
0x1388   :  { %v4366_v1 = vpop.f32.mrf.mxu0 }
0x1389   :  { %v4407_v23 = vmul.f32 0.044715, %v7893_v3  ;;  %v7896_v55 = vadd.f32 %v5230_v15, %v4366_v1 }
0x138a   :  { %v5855_v25 = vpop.f32.mrf.mxu0 }
0x138b   :  { %v4415_v34 = vmul.f32 %v4407_v23, %v7893_v3  ;;  %v4405_v43 = vmul.f32 0.044715, %v7896_v55  ;;  %v4378_v54 = vadd.f32 %v5855_v25, %v5230_v15 }
0x138c   :  { %v4369_v17 = vpop.f32.mrf.mxu0 }
0x138d   :  { %v4423_v16 = vmul.f32 %v4415_v34, %v7893_v3  ;;  %v4413_v46 = vmul.f32 %v4405_v43, %v7896_v55  ;;  %v4408_v56 = vmul.f32 0.044715, %v4378_v54  ;;  %v4370_v47 = vadd.f32 %v5230_v15, %v4369_v17 }
0x138e   :  { %v5858_v22 = vpop.f32.mrf.mxu0 }
0x138f   :  { %v4431_v41 = vadd.f32 %v4423_v16, %v7893_v3  ;;  %v4421_v2 = vmul.f32 %v4413_v46, %v7896_v55  ;;  %v4416_v11 = vmul.f32 %v4408_v56, %v4378_v54  ;;  %v7904_v32 = vadd.f32 %v5858_v22, %v5230_v15 }
0x1390   :  { %v4406_v30 = vmul.f32 0.044715, %v4370_v47  ;;  %v4382_v53 = vpop.f32.mrf.mxu0  ;;  %v4400_v56 = vmul.f32 0.5, %v4378_v54  ;;  %v4397_v22 = vmul.f32 0.5, %v7896_v55 }
0x1391   :  { %v4439_v60 = vmul.f32 0.7978846, %v4431_v41  ;;  %v4424_v36 = vmul.f32 %v4416_v11, %v4378_v54  ;;  %v4411_v4 = vmul.f32 0.044715, %v7904_v32  ;;  %v7907_v21 = vadd.f32 %v5230_v15, %v4382_v53 }
0x1392   :  { %v4414_v27 = vmul.f32 %v4406_v30, %v4370_v47  ;;  %v5859_v8 = vpop.f32.mrf.mxu0  ;;  %v4429_v10 = vadd.f32 %v4421_v2, %v7896_v55  ;;  %v4398_v41 = vmul.f32 0.5, %v4370_v47  ;;  %v4399_v11 = vmul.f32 0.5, %v7893_v3 }
0x1393   :  { %v4432_v35 = vadd.f32 %v4424_v36, %v4378_v54  ;;  %v4419_v5 = vmul.f32 %v4411_v4, %v7904_v32  ;;  %v4409_v28 = vmul.f32 0.044715, %v7907_v21  ;;  %6278 = vtanh.f32 %v4439_v60 }
0x1394   :  { %v4422_v49 = vmul.f32 %v4414_v27, %v4370_v47  ;;  %v4394_v44 = vadd.f32 %v5859_v8, %v5230_v15  ;;  %v4385_v58 = vpop.f32.mrf.mxu0  ;;  %v4437_v20 = vmul.f32 0.7978846, %v4429_v10  ;;  %v4401_v54 = vmul.f32 0.5, %v7907_v21 }
0x1395   :  { %v4440_v14 = vmul.f32 0.7978846, %v4432_v35  ;;  %v4427_v38 = vmul.f32 %v4419_v5, %v7904_v32  ;;  %v4417_v7 = vmul.f32 %v4409_v28, %v7907_v21  ;;  %v4386_v12 = vadd.f32 %v5230_v15, %v4385_v58 }
0x1396   :  { %v4412_v37 = vmul.f32 0.044715, %v4394_v44  ;;  %v4430_v62 = vadd.f32 %v4422_v49, %v4370_v47  ;;  %6280 = vtanh.f32 %v4437_v20  ;;  %v4404_v58 = vmul.f32 0.5, %v4394_v44 }
0x1397   :  { %6282 = vtanh.f32 %v4440_v14  ;;  %v4435_v42 = vadd.f32 %v4427_v38, %v7904_v32  ;;  %v4425_v26 = vmul.f32 %v4417_v7, %v7907_v21  ;;  %v4410_v51 = vmul.f32 0.044715, %v4386_v12 }
0x1398   :  { %v4420_v40 = vmul.f32 %v4412_v37, %v4394_v44  ;;  %v4438_v63 = vmul.f32 0.7978846, %v4430_v62  ;;  %v4402_v55 = vmul.f32 0.5, %v4386_v12  ;;  %v4403_v38 = vmul.f32 0.5, %v7904_v32 }
0x1399   :  { %v4418_v45 = vmul.f32 %v4410_v51, %v4386_v12  ;;  %v4433_v19 = vadd.f32 %v4425_v26, %v7907_v21  ;;  %v4443_v24 = vmul.f32 0.7978846, %v4435_v42 }
0x139a   :  { %v4428_v50 = vmul.f32 %v4420_v40, %v4394_v44  ;;  %6284 = vtanh.f32 %v4438_v63  ;;  %v8120_v40 = vld [vmem:[#allocation8_spill] sm:$0xff] }
0x139b   :  { %v4426_v6 = vmul.f32 %v4418_v45, %v4386_v12  ;;  %v4441_v13 = vmul.f32 0.7978846, %v4433_v19 }
0x139c   :  { %v4436_v31 = vadd.f32 %v4428_v50, %v4394_v44  ;;  %v4493_v44 = vrot.slane %v7750_v61, %v8120_v40 }
0x139d   :  { %v4434_v15 = vadd.f32 %v4426_v6, %v4386_v12  ;;  %6286 = vtanh.f32 %v4441_v13 }
0x139e   :  { %v4444_v52 = vmul.f32 0.7978846, %v4436_v31  ;;  %6288 = vtanh.f32 %v4443_v24 }
0x139f   :  { %v4442_v1 = vmul.f32 0.7978846, %v4434_v15 }
0x13a0   :  { %6290 = vtanh.f32 %v4444_v52  ;;  %v6279_v23 = vpop.eup %6278 }
0x13a1   :  { %6292 = vtanh.f32 %v4442_v1  ;;  %v4455_v46 = vadd.f32 1.0, %v6279_v23 }
0x13a3   :  { %v6281_v25 = vpop.eup %6280  ;;  %v4463_v4 = vmul.f32 %v4455_v46, %v4399_v11 }
0x13a4   :  { %v6283_v34 = vpop.eup %6282  ;;  %v4453_v17 = vadd.f32 1.0, %v6281_v25 }
0x13a5   :  { %v4456_v43 = vadd.f32 1.0, %v6283_v34 }
0x13a6   :  { %v4461_v60 = vmul.f32 %v4453_v17, %v4397_v22 }
0x13a7   :  { %v6285_v16 = vpop.eup %6284  ;;  %v4464_v30 = vmul.f32 %v4456_v43, %v4400_v56 }
0x13a8   :  { %v4454_v2 = vadd.f32 1.0, %v6285_v16 }
0x13a9   :  { %v4470_v35 = vpack.c.bf16 %v4464_v30, %v4463_v4 }
0x13aa   :  { %v6287_v53 = vpop.eup %6286  ;;  %v4462_v36 = vmul.f32 %v4454_v2, %v4398_v41 }
0x13ab   :  { %v6289_v27 = vpop.eup %6288  ;;  %v4457_v5 = vadd.f32 1.0, %v6287_v53 }
0x13ac   :  { %v4469_v8 = vpack.c.bf16 %v4462_v36, %v4461_v60  ;;  %v4459_v3 = vadd.f32 1.0, %v6289_v27 }
0x13ad   :  { %v6291_v10 = vpop.eup %6290  ;;  %v4465_v20 = vmul.f32 %v4457_v5, %v4401_v54 }
0x13ae   :  { %v6293_v28 = vpop.eup %6292  ;;  %5876 = vmatprep.mubr.bf16.mxu1 %v4469_v8  ;;  %v4460_v49 = vadd.f32 1.0, %v6291_v10  ;;  %v4467_v62 = vmul.f32 %v4459_v3, %v4403_v38 }
0x13af   :  { %5877 = vmatmul.mubr.bf16.vlgmr.msra.gmra.mxu1 %v4470_v35  ;;  %v4458_v47 = vadd.f32 1.0, %v6293_v28 }
0x13b0   :  { %v4468_v7 = vmul.f32 %v4460_v49, %v4404_v58 }
0x13b1   :  { %v4466_v14 = vmul.f32 %v4458_v47, %v4402_v55 }
0x13b2   :  { %v4472_v42 = vpack.c.bf16 %v4468_v7, %v4467_v62 }
0x13b3   :  { %v4471_v37 = vpack.c.bf16 %v4466_v14, %v4465_v20 }
0x13b5   :  { %5880 = vmatprep.mubr.bf16.mxu1 %v4471_v37 }
0x13b7   :  { %5881 = vmatmul.mubr.bf16.gmra.mxu1 %v4472_v42 }
0x13b8   :  { %5923 = vmatprep.mubr.msk.bf16.mxu1 %vm6316_vm9, %v8096_v0 }
0x146f   :  { %v5878_v21 = vpop.f32.mrf.mxu1 }
0x1470   :  { %v4585_v24 = vadd.f32 %v5878_v21, %v4493_v44 }
0x1471   :  { %v4576_v26 = vpop.f32.mrf.mxu1 }
0x1472   :  { %v4609_v25 = vadd.f32 %v4585_v24, %v7838_v18  ;;  %v4577_v34 = vadd.f32 %v4576_v26, %v4493_v44 }
0x1473   :  { %v5879_v51 = vpop.f32.mrf.mxu1 }
0x1474   :  { %v4588_v43 = vadd.f32 %v5879_v51, %v4493_v44  ;;  %v4621_v22 = vsel %vm260_vm8, %v4609_v25, 0.0 }
0x1475   :  { %v4579_v12 = vpop.f32.mrf.mxu1 }
0x1476   :  { %v4610_v46 = vadd.f32 %v4588_v43, %v7840_v33  ;;  %v4580_v56 = vadd.f32 %v4579_v12, %v4493_v44 }
0x1477   :  { %v5882_v63 = vpop.f32.mrf.mxu1 }
0x1478   :  { %v4601_v45 = vadd.f32 %v5882_v63, %v4493_v44  ;;  %v4608_v18 = vadd.f32 %v4580_v56, %v7833_v48 }
0x1479   :  { %v4592_v19 = vpop.f32.mrf.mxu1 }
0x147a   :  { %v4613_v32 = vadd.f32 %v4601_v45, %v7856_v9  ;;  %v4593_v50 = vadd.f32 %v4592_v19, %v4493_v44  ;;  %v4618_v2 = vsel %vm260_vm8, %v4608_v18, 0.0 }
0x147b   :  { %v5883_v6 = vpop.f32.mrf.mxu1 }
0x147c   :  { %v4611_v13 = vadd.f32 %v4593_v50, %v7849_v59  ;;  %v4604_v31 = vadd.f32 %v5883_v6, %v4493_v44  ;;  %v4633_v15 = vsel %vm260_vm8, %v4613_v32, 0.0  ;;  %v4607_v59 = vadd.f32 %v4577_v34, %v7831_v29 }
0x147d   :  { %4634 = vadd.xlane.f32.xlu0 %v4633_v15  ;;  %v4595_v52 = vpop.f32.mrf.mxu1 }
0x147e   :  { %v4614_v1 = vadd.f32 %v4604_v31, %v7858_v39  ;;  %v4596_v23 = vadd.f32 %v4595_v52, %v4493_v44  ;;  %v4627_v16 = vsel %vm260_vm8, %v4611_v13, 0.0  ;;  %v4615_v41 = vsel %vm260_vm8, %v4607_v59, 0.0 }
0x1480   :  { %v4612_v17 = vadd.f32 %v4596_v23, %v7851_v57  ;;  %v4636_v9 = vsel %vm260_vm8, %v4614_v1, 0.0  ;;  %v4624_v57 = vsel %vm260_vm8, %v4610_v46, 0.0 }
0x1481   :  { %4637 = vadd.xlane.f32.xlu1 %v4636_v9  ;;  %4628 = vadd.xlane.f32.xlu0 %v4627_v16 }
0x1482   :  { %v4630_v39 = vsel %vm260_vm8, %v4612_v17, 0.0 }
0x1485   :  { %4631 = vadd.xlane.f32.xlu1 %v4630_v39  ;;  %4622 = vadd.xlane.f32.xlu0 %v4621_v22 }
0x1489   :  { %4625 = vadd.xlane.f32.xlu1 %v4624_v57  ;;  %4616 = vadd.xlane.f32.xlu0 %v4615_v41 }
0x148d   :  { %4619 = vadd.xlane.f32.xlu1 %v4618_v2 }
0x1506   :  { %v4635_v29 = vpop.xlane.xlu0 %4634 }
0x1507   :  { %v4645_v33 = vmul.f32 0.015625, %v4635_v29 }
0x1509   :  { %v7941_v11 = vsub.f32 %v4613_v32, %v4645_v33 }
0x150a   :  { %v4638_v30 = vpop.xlane.xlu1 %4637  ;;  %v4629_v53 = vpop.xlane.xlu0 %4628 }
0x150b   :  { %v4646_v60 = vmul.f32 0.015625, %v4638_v30  ;;  %v4643_v36 = vmul.f32 0.015625, %v4629_v53  ;;  %v4661_v48 = vmul.f32 %v7941_v11, %v7941_v11  ;;  %v8121_v53 = vld [vmem:[#allocation6_spill] sm:$0xff] }
0x150d   :  { %v7945_v4 = vsub.f32 %v4614_v1, %v4646_v60  ;;  %v7947_v27 = vsub.f32 %v4611_v13, %v4643_v36  ;;  %v4681_v8 = vsel %vm260_vm8, %v4661_v48, 0.0  ;;  %v4722_v60 = vrot.slane %v7750_v61, %v8121_v53 }
0x150e   :  { %v4632_v10 = vpop.xlane.xlu1 %4631  ;;  %4682 = vadd.xlane.f32.xlu0 %v4681_v8  ;;  %v4623_v35 = vpop.xlane.xlu0 %4622 }
0x150f   :  { %v4644_v5 = vmul.f32 0.015625, %v4632_v10  ;;  %v4641_v28 = vmul.f32 0.015625, %v4623_v35  ;;  %v4662_v54 = vmul.f32 %v7945_v4, %v7945_v4  ;;  %v4659_v49 = vmul.f32 %v7947_v27, %v7947_v27 }
0x1511   :  { %v7954_v55 = vsub.f32 %v4612_v17, %v4644_v5  ;;  %v7956_v47 = vsub.f32 %v4609_v25, %v4641_v28  ;;  %v4684_v58 = vsel %vm260_vm8, %v4662_v54, 0.0  ;;  %v4675_v3 = vsel %vm260_vm8, %v4659_v49, 0.0  ;;  %v8122_v5 = vld [vmem:[#allocation7_spill] sm:$0xff] }
0x1512   :  { %4685 = vadd.xlane.f32.xlu1 %v4684_v58  ;;  %v4626_v20 = vpop.xlane.xlu1 %4625  ;;  %4676 = vadd.xlane.f32.xlu0 %v4675_v3  ;;  %v4617_v14 = vpop.xlane.xlu0 %4616  ;;  %v4734_v28 = vrot.slane %v7750_v61, %v8122_v5 }
0x1513   :  { %v4642_v38 = vmul.f32 0.015625, %v4626_v20  ;;  %v4639_v7 = vmul.f32 0.015625, %v4617_v14  ;;  %v4660_v37 = vmul.f32 %v7954_v55, %v7954_v55  ;;  %v4657_v62 = vmul.f32 %v7956_v47, %v7956_v47 }
0x1515   :  { %v7964_v42 = vsub.f32 %v4610_v46, %v4642_v38  ;;  %v7966_v21 = vsub.f32 %v4607_v59, %v4639_v7  ;;  %v4678_v26 = vsel %vm260_vm8, %v4660_v37, 0.0  ;;  %v4669_v51 = vsel %vm260_vm8, %v4657_v62, 0.0 }
0x1516   :  { %4679 = vadd.xlane.f32.xlu1 %v4678_v26  ;;  %v4620_v12 = vpop.xlane.xlu1 %4619  ;;  %4670 = vadd.xlane.f32.xlu0 %v4669_v51 }
0x1517   :  { %v4640_v40 = vmul.f32 0.015625, %v4620_v12  ;;  %v4658_v44 = vmul.f32 %v7964_v42, %v7964_v42  ;;  %v4655_v63 = vmul.f32 %v7966_v21, %v7966_v21 }
0x1519   :  { %v7974_v45 = vsub.f32 %v4608_v18, %v4640_v40  ;;  %v4672_v19 = vsel %vm260_vm8, %v4658_v44, 0.0  ;;  %v4663_v32 = vsel %vm260_vm8, %v4655_v63, 0.0 }
0x151a   :  { %4673 = vadd.xlane.f32.xlu1 %v4672_v19  ;;  %4664 = vadd.xlane.f32.xlu0 %v4663_v32 }
0x151b   :  { %v4656_v50 = vmul.f32 %v7974_v45, %v7974_v45 }
0x151d   :  { %v4666_v24 = vsel %vm260_vm8, %v4656_v50, 0.0 }
0x151e   :  { %4667 = vadd.xlane.f32.xlu1 %v4666_v24  ;;  %v8124_v24 = vld [vmem:[#allocation2_spill] sm:$0xff] }
0x1597   :  { %v4683_v6 = vpop.xlane.xlu0 %4682 }
0x1598   :  { %v4693_v13 = vmul.f32 0.015625, %v4683_v6 }
0x159a   :  { %v4701_v31 = vadd.f32 1e-12, %v4693_v13 }
0x159b   :  { %v4686_v15 = vpop.xlane.xlu1 %4685  ;;  %v4677_v52 = vpop.xlane.xlu0 %4676 }
0x159c   :  { %6294 = vrsqrt.f32 %v4701_v31  ;;  %v4694_v1 = vmul.f32 0.015625, %v4686_v15  ;;  %v4691_v23 = vmul.f32 0.015625, %v4677_v52  ;;  %v6063_v31 = vld [vmem:[%s8061_s13 + $0x10] sm:$0xff]   ;;  %v6064_v15 = vld [vmem:[%s8061_s13 + $0x8] sm:$0xff]   ;;  %v6065_v52 = vld [vmem:[%s8061_s13] sm:$0xff]  }
0x159e   :  { %v4702_v25 = vadd.f32 1e-12, %v4694_v1  ;;  %v4699_v34 = vadd.f32 1e-12, %v4691_v23 }
0x159f   :  { %v4680_v43 = vpop.xlane.xlu1 %4679  ;;  %v4671_v17 = vpop.xlane.xlu0 %4670 }
0x15a0   :  { %6296 = vrsqrt.f32 %v4702_v25  ;;  %v4692_v9 = vmul.f32 0.015625, %v4680_v43  ;;  %v4689_v16 = vmul.f32 0.015625, %v4671_v17  ;;  %v6067_v43 = vld [vmem:[%s8062_s15 + $0x10] sm:$0xff]   ;;  %v6068_v17 = vld [vmem:[%s8062_s15 + $0x8] sm:$0xff]  }
0x15a1   :  { %6298 = vrsqrt.f32 %v4699_v34  ;;  %v6066_v34 = vld [vmem:[%s8062_s15 + $0x18] sm:$0xff]  }
0x15a2   :  { %v4700_v59 = vadd.f32 1e-12, %v4692_v9  ;;  %v4697_v46 = vadd.f32 1e-12, %v4689_v16  ;;  %5916 = vmatpush3.bf16.msra.mxu1 %v6066_v34  ;;  %v6069_v9 = vld [vmem:[%s8062_s15] sm:$0xff]  }
0x15a3   :  { %v4674_v56 = vpop.xlane.xlu1 %4673  ;;  %v4665_v39 = vpop.xlane.xlu0 %4664  ;;  %5917 = vmatprep.subr.bf16.mxu1 %v8096_v0  ;;  %v5265_v16 = vld [vmem:[%s8063_s14] ss:$0 sm:$0xff] }
0x15a4   :  { %6300 = vrsqrt.f32 %v4700_v59  ;;  %v4690_v22 = vmul.f32 0.015625, %v4674_v56  ;;  %v4687_v18 = vmul.f32 0.015625, %v4665_v39 }
0x15a5   :  { %6302 = vrsqrt.f32 %v4697_v46 }
0x15a6   :  { %v4698_v57 = vadd.f32 1e-12, %v4690_v22  ;;  %v4695_v41 = vadd.f32 1e-12, %v4687_v18  ;;  %5918 = vmatpush3.bf16.msra.mxu1 %v6067_v43 }
0x15a7   :  { %v4668_v2 = vpop.xlane.xlu1 %4667  ;;  %5919 = vmatprep.subr.bf16.mxu1 %v8096_v0 }
0x15a8   :  { %6304 = vrsqrt.f32 %v4698_v57  ;;  %v4688_v29 = vmul.f32 0.015625, %v4668_v2 }
0x15a9   :  { %v6295_v33 = vpop.eup %6294  ;;  %6306 = vrsqrt.f32 %v4695_v41 }
0x15aa   :  { %v4696_v30 = vadd.f32 1e-12, %v4688_v29  ;;  %v4717_v36 = vmul.f32 %v6295_v33, %v7941_v11  ;;  %5920 = vmatpush3.bf16.msra.mxu1 %v6068_v17 }
0x15ab   :  { %5921 = vmatprep.subr.bf16.mxu1 %v8096_v0 }
0x15ac   :  { %6308 = vrsqrt.f32 %v4696_v30  ;;  %v4729_v54 = vmul.f32 %v4722_v60, %v4717_v36 }
0x15ad   :  { %v6297_v48 = vpop.eup %6296 }
0x15ae   :  { %v6299_v8 = vpop.eup %6298  ;;  %v4718_v10 = vmul.f32 %v6297_v48, %v7945_v4  ;;  %v4741_v38 = vadd.f32 %v4734_v28, %v4729_v54  ;;  %5922 = vmatpush3.bf16.msra.mxu1 %v6069_v9 }
0x15af   :  { %v4715_v49 = vmul.f32 %v6299_v8, %v7947_v27 }
0x15b0   :  { %v4730_v35 = vmul.f32 %v4722_v60, %v4718_v10 }
0x15b1   :  { %v6301_v58 = vpop.eup %6300  ;;  %v4727_v11 = vmul.f32 %v4722_v60, %v4715_v49 }
0x15b2   :  { %v6303_v3 = vpop.eup %6302  ;;  %v4742_v20 = vadd.f32 %v4734_v28, %v4730_v35  ;;  %v4716_v14 = vmul.f32 %v6301_v58, %v7954_v55 }
0x15b3   :  { %v4713_v37 = vmul.f32 %v6303_v3, %v7956_v47  ;;  %v4739_v27 = vadd.f32 %v4734_v28, %v4727_v11  ;;  %v8123_v47 = vld [vmem:[#allocation3_spill] sm:$0xff] }
0x15b4   :  { %5885 = vmatpush3.msra.mxu0 %v4742_v20  ;;  %v4728_v7 = vmul.f32 %v4722_v60, %v4716_v14  ;;  %v4745_v44 = vmul.u32 16, %v8123_v47 }
0x15b5   :  { %v6305_v62 = vpop.eup %6304  ;;  %5886 = vmatprep.subr.mxu0 %v8096_v0  ;;  %v4725_v55 = vmul.f32 %v4722_v60, %v4713_v37 }
0x15b6   :  { %v6307_v4 = vpop.eup %6306  ;;  %5887 = vmatpush3.msra.mxu0 %v4741_v38  ;;  %v4740_v61 = vadd.f32 %v4734_v28, %v4728_v7  ;;  %v4714_v26 = vmul.f32 %v6305_v62, %v7964_v42  ;;  %vm4746_vm11 = vcmp.eq.s32.totalorder %v8124_v24, %v4745_v44 }
0x15b7   :  { %5888 = vmatprep.subr.mxu0 %v8096_v0  ;;  %v4711_v12 = vmul.f32 %v6307_v4, %v7966_v21  ;;  %v4737_v42 = vadd.f32 %v4734_v28, %v4725_v55  ;;  %v5263_v13 = vsel %vm4746_vm11, 1.0, %v8096_v0 }
0x15b8   :  { %5889 = vmatpush3.msra.mxu0 %v4740_v61  ;;  %v4726_v51 = vmul.f32 %v4722_v60, %v4714_v26 }
0x15b9   :  { %v6309_v40 = vpop.eup %6308  ;;  %5890 = vmatprep.subr.mxu0 %v8096_v0  ;;  %v4723_v50 = vmul.f32 %v4722_v60, %v4711_v12 }
0x15ba   :  { %5891 = vmatpush3.msra.mxu0 %v4739_v27  ;;  %v4738_v63 = vadd.f32 %v4734_v28, %v4726_v51  ;;  %v4712_v19 = vmul.f32 %v6309_v40, %v7974_v45  ;;  %v6062_v45 = vld [vmem:[%s8061_s13 + $0x18] sm:$0xff]  }
0x15bb   :  { %5892 = vmatprep.subr.mxu0 %v8096_v0  ;;  %v4735_v6 = vadd.f32 %v4734_v28, %v4723_v50 }
0x15bc   :  { %5893 = vmatpush3.msra.mxu0 %v4738_v63  ;;  %v4724_v32 = vmul.f32 %v4722_v60, %v4712_v19 }
0x15bd   :  { %5894 = vmatprep.subr.mxu0 %v8096_v0 }
0x15be   :  { %5895 = vmatpush3.msra.mxu0 %v4737_v42  ;;  %v4736_v21 = vadd.f32 %v4734_v28, %v4724_v32 }
0x15bf   :  { %5896 = vmatprep.subr.mxu0 %v8096_v0 }
0x15c0   :  { %5897 = vmatpush3.msra.mxu0 %v4736_v21 }
0x15c1   :  { %5898 = vmatprep.subr.mxu0 %v8096_v0 }
0x15c2   :  { %5899 = vmatpush3.msra.mxu0 %v4735_v6 }
0x15c3   :  { %5901 = vmatmul.mubr.msk.f32.vlgmr.msra.gmra.mxu0 %vm260_vm8, %v5263_v13  ;;  %5903 = vmatprep.subr.bf16.mxu0 %v8096_v0 }
0x15c4   :  { %5904 = vmatpush3.bf16.msra.mxu0 %v6062_v45  ;;  %5911 = vmatprep.mubr.msk.bf16.mxu0 %vm6316_vm9, %v8096_v0 }
0x15c5   :  { %5905 = vmatprep.subr.bf16.mxu0 %v8096_v0 }
0x15c8   :  { %5906 = vmatpush3.bf16.msra.mxu0 %v6063_v31 }
0x15c9   :  { %5907 = vmatprep.subr.bf16.mxu0 %v8096_v0 }
0x15cc   :  { %5908 = vmatpush3.bf16.msra.mxu0 %v6064_v15 }
0x15cd   :  { %5909 = vmatprep.subr.bf16.mxu0 %v8096_v0  ;;  %v5271_v0 = vld [vmem:[%s8064_s16] ss:$0 sm:$0xff] }
0x15d0   :  { %5910 = vmatpush3.bf16.msra.mxu0 %v6065_v52 }
0x1683   :  { %v4818_v1 = vpop.f32.mrf.mxu0 }
0x1684   :  { %v4822_v23 = vpack.c.bf16 %v4818_v1, %v4818_v1 }
0x1685   :  { %v5902_v25 = vpop.f32.mrf.mxu0 }
0x1686   :  { %5912 = vmatmul.mubr.msk.bf16.vlgmr.msra.gmra.mxu0 %vm260_vm8, %v4822_v23 }
0x1746   :  { %v4899_v59 = vpop.f32.mrf.mxu0 }
0x1747   :  { %v4900_v46 = vadd.f32 %v5265_v16, %v4899_v59 }
0x1748   :  { %v5913_v56 = vpop.f32.mrf.mxu0 }
0x1749   :  { %6310 = vtanh.f32 %v4900_v46 }
0x174a   :  { %v4902_v39 = vpop.f32.mrf.mxu0 }
0x174c   :  { %v5914_v22 = vpop.f32.mrf.mxu0 }
0x1756   :  { %v6311_v18 = vpop.eup %6310 }
0x1757   :  { %v4906_v57 = vpack.c.bf16 %v6311_v18, %v6311_v18 }
0x1759   :  { %5924 = vmatmul.mubr.msk.bf16.vlgmr.msra.gmra.mxu1 %vm260_vm8, %v4906_v57 }
0x1819   :  { %v4983_v41 = vpop.f32.mrf.mxu1 }
0x181a   :  { %v4984_v2 = vadd.f32 %v5271_v0, %v4983_v41 }
0x181b   :  { %v5925_v29 = vpop.f32.mrf.mxu1 }
0x181c   :  { %4989 = vst [vmem:[%s8065_s17] sm:$0xff] %v4984_v2 }
0x181d   :  { %v4986_v33 = vpop.f32.mrf.mxu1 }
0x181f   :  { %v5926_v30 = vpop.f32.mrf.mxu1 }

</bundles_post_ra>
